<compile_context>
chip_gen: v7x
topology: tpu7x:2x2x1
jax: 0.10.0
libtpu: 0.0.40
codegen_flags: <defaults>
</compile_context>

<pallas_src>
import math
import jax
import jax.numpy as jnp
from jax.experimental import pallas as pl
from jax.experimental.pallas import tpu as pltpu

# ---------------- synthetic BERT config (small) ----------------
VOCAB = 1000
HIDDEN = 128
NUM_HEADS = 4
HEAD_DIM = HIDDEN // NUM_HEADS
INTERMEDIATE = 256
NUM_LAYERS = 2
MAX_POS = 32
NUM_LABELS = 4
LANE_PAD = 128          # classifier logits padded to a full 128-lane width
LN_EPS = 1e-12
NEG_INF = -1e9


# ---------------- in-kernel helpers (traced) ----------------
def _layer_norm(x, g, b):
    mu = jnp.mean(x, axis=-1, keepdims=True)
    var = jnp.mean(jnp.square(x - mu), axis=-1, keepdims=True)
    return (x - mu) * jax.lax.rsqrt(var + LN_EPS) * g + b


def _gelu(x):
    # TODO(synk): HuggingFace BERT's default hidden_act is exact (erf) GELU;
    # the tanh approximation is used here (EUP-friendly, tiny numeric delta).
    c = math.sqrt(2.0 / math.pi)
    return 0.5 * x * (1.0 + jnp.tanh(c * (x + 0.044715 * x * x * x)))


# ---------------- fused forward kernel (one grid step = one example) ----------------
def fused_bert_kernel(x_ref, kbias_ref, onehot_ref,
                      emb_ln_g_ref, emb_ln_b_ref,
                      w_qkv_ref, b_qkv_ref, wo_ref, bo_ref,
                      ln1_g_ref, ln1_b_ref,
                      w1_ref, b1_ref, w2_ref, b2_ref,
                      ln2_g_ref, ln2_b_ref,
                      cls_w_ref, cls_b_ref,
                      logits_ref, loss_ref):
    S, H = x_ref.shape[1], x_ref.shape[2]
    L = w_qkv_ref.shape[0]
    scale = 1.0 / math.sqrt(HEAD_DIM)

    kbias = kbias_ref[0]                       # (1, S) key-padding additive bias, f32

    # embedding LayerNorm (f32 statistics)
    x = _layer_norm(x_ref[0], emb_ln_g_ref[...], emb_ln_b_ref[...])   # (S, H) f32

    # encoder layers (static unroll; all weights resident in VMEM at toy size)
    for l in range(L):
        # fused QKV projection: bf16 MXU operands, f32 accumulation
        qkv = (jnp.dot(x.astype(jnp.bfloat16), w_qkv_ref[l],
                       preferred_element_type=jnp.float32)
               + b_qkv_ref[l])                 # (S, 3H) f32
        qkv_bf = qkv.astype(jnp.bfloat16)

        # attention with the output projection fused per head: head contexts
        # never round-trip through a VMEM scratch, they are folded straight
        # into a 128-lane-wide register accumulator.
        attn = jnp.zeros((S, H), jnp.float32)
        for h in range(NUM_HEADS):
            lo = h * HEAD_DIM
            qh = qkv_bf[:, lo:lo + HEAD_DIM]
            kh = qkv_bf[:, H + lo:H + lo + HEAD_DIM]
            vh = qkv_bf[:, 2 * H + lo:2 * H + lo + HEAD_DIM]
            # q @ k^T without an explicit transpose (contract dim 1 of both)
            s = jax.lax.dot_general(
                qh, kh, (((1,), (1,)), ((), ())),
                preferred_element_type=jnp.float32) * scale + kbias
            # f32 softmax (EUP exp + approx reciprocal; ~1e-3 rel. error vs exact divide)
            s = s - jnp.max(s, axis=-1, keepdims=True)
            p = jnp.exp(s)
            p = p * pl.reciprocal(jnp.sum(p, axis=-1, keepdims=True), approx=True)
            ctx = jnp.dot(p.astype(jnp.bfloat16), vh,
                          preferred_element_type=jnp.float32)          # (S, HD)
            attn = attn + jnp.dot(ctx.astype(jnp.bfloat16),
                                  wo_ref[l, lo:lo + HEAD_DIM, :],
                                  preferred_element_type=jnp.float32)  # (S, H)
        attn = attn + bo_ref[l]

        h1 = _layer_norm(x + attn, ln1_g_ref[l], ln1_b_ref[l])
        ff = (jnp.dot(h1.astype(jnp.bfloat16), w1_ref[l],
                      preferred_element_type=jnp.float32) + b1_ref[l])
        ff = _gelu(ff)                          # f32 VPU/EUP path (v5e-safe)
        ff = (jnp.dot(ff.astype(jnp.bfloat16), w2_ref[l],
                      preferred_element_type=jnp.float32) + b2_ref[l])
        x = _layer_norm(h1 + ff, ln2_g_ref[l], ln2_b_ref[l])

    # CLS pooling: with the batch on the grid this is simply row 0.
    # TODO(synk): Dropout(0.3) is identity here (eval-mode semantics).
    pooled = x[0:1, :]                          # (1, H)

    # classifier on lane-padded weights -> lane-dense (1, 128) logits store
    logits = (jnp.dot(pooled.astype(jnp.bfloat16), cls_w_ref[...],
                      preferred_element_type=jnp.float32)
              + cls_b_ref[...])                 # (1, LANE_PAD) f32
    logits_ref[0] = logits

    # per-example cross-entropy over the first NUM_LABELS lanes (f32)
    lane = jax.lax.broadcasted_iota(jnp.int32, (1, LANE_PAD), 1)
    masked = jnp.where(lane < NUM_LABELS, logits, NEG_INF)
    m = jnp.max(masked, axis=-1, keepdims=True)
    lse = m + jnp.log(jnp.sum(jnp.exp(masked - m), axis=-1, keepdims=True))
    nll = jnp.sum(onehot_ref[0] * (lse - logits), axis=-1, keepdims=True)   # (1, 1)
    loss_ref[0] = jnp.broadcast_to(nll, (1, LANE_PAD))


# ---------------- pallas_call wrapper ----------------
def fused_forward_call(emb, kbias, onehot, params):
    B, S, H = emb.shape

    def blk(shape):
        return pl.BlockSpec(shape, lambda b: (b, 0, 0))

    weight_spec = pl.BlockSpec(memory_space=pltpu.MemorySpace.VMEM)  # whole array resident
    args = (emb, kbias, onehot,
            params["emb_ln_g"], params["emb_ln_b"],
            params["w_qkv"], params["b_qkv"], params["wo"], params["bo"],
            params["ln1_g"], params["ln1_b"],
            params["w1"], params["b1"], params["w2"], params["b2"],
            params["ln2_g"], params["ln2_b"],
            params["cls_w_pad"], params["cls_b_pad"])
    n_weights = len(args) - 3
    return pl.pallas_call(
        fused_bert_kernel,
        grid=(B,),
        out_shape=(jax.ShapeDtypeStruct((B, 1, LANE_PAD), jnp.float32),
                   jax.ShapeDtypeStruct((B, 1, LANE_PAD), jnp.float32)),
        in_specs=[blk((1, S, H)), blk((1, 1, S)), blk((1, 1, LANE_PAD))]
                 + [weight_spec] * n_weights,
        out_specs=(blk((1, 1, LANE_PAD)), blk((1, 1, LANE_PAD))),
        compiler_params=pltpu.CompilerParams(
            dimension_semantics=("parallel",)),     # shard examples across TCs (v7x)
    )(*args)


# ---------------- model forward (glue in plain JAX) ----------------
def forward(params, input_ids, attention_mask, token_type_ids=None, labels=None):
    B, S = input_ids.shape
    if token_type_ids is None:
        token_type_ids = jnp.zeros_like(input_ids)

    # TODO(synk): the embedding row gather stays in XLA glue; fusing it into
    # the kernel (scalar-prefetched ids + pl.Element row gather) would save
    # one HBM round-trip of the activations.
    emb = (params["word_emb"][input_ids]
           + params["pos_emb"][jnp.arange(S)][None, :, :]
           + params["type_emb"][token_type_ids]).astype(jnp.float32)   # (B, S, H)

    # O(B*S) key-padding additive bias; block-diagonal masking is implicit
    # because attention runs per example on the batch grid axis.
    kbias = jnp.where(attention_mask > 0, 0.0, NEG_INF).astype(jnp.float32)
    kbias = kbias.reshape(B, 1, S)

    if labels is not None:
        onehot = jax.nn.one_hot(labels, LANE_PAD, dtype=jnp.float32)
    else:
        onehot = jnp.zeros((B, LANE_PAD), jnp.float32)
    onehot = onehot.reshape(B, 1, LANE_PAD)

    logits_pad, nll = fused_forward_call(emb, kbias, onehot, params)
    logits = logits_pad[:, 0, :NUM_LABELS]
    if labels is None:
        return logits, None
    # CrossEntropyLoss(reduction='mean'): mean of per-example NLLs
    return logits, jnp.mean(nll[:, 0, 0])


# ---------------- deterministic parameter init (stacked/fused, bf16 matmul weights) ----------------
def init_params(key):
    def nrm(k, shape):
        return 0.02 * jax.random.normal(k, shape, jnp.float32)

    keys = iter(jax.random.split(key, 4 + 4 * NUM_LAYERS))
    params = {
        "word_emb": nrm(next(keys), (VOCAB, HIDDEN)),
        "pos_emb": nrm(next(keys), (MAX_POS, HIDDEN)),
        "type_emb": nrm(next(keys), (2, HIDDEN)),
        "emb_ln_g": jnp.ones((1, HIDDEN), jnp.float32),
        "emb_ln_b": jnp.zeros((1, HIDDEN), jnp.float32),
    }
    w_qkv, wo, w1, w2 = [], [], [], []
    for _ in range(NUM_LAYERS):
        w_qkv.append(nrm(next(keys), (HIDDEN, 3 * HIDDEN)))   # fused Wq|Wk|Wv
        wo.append(nrm(next(keys), (HIDDEN, HIDDEN)))
        w1.append(nrm(next(keys), (HIDDEN, INTERMEDIATE)))
        w2.append(nrm(next(keys), (INTERMEDIATE, HIDDEN)))
    params.update({
        # MXU operands stored in bf16 (native MXU rate, half the weight DMA)
        "w_qkv": jnp.stack(w_qkv).astype(jnp.bfloat16),
        "b_qkv": jnp.zeros((NUM_LAYERS, 1, 3 * HIDDEN), jnp.float32),
        "wo": jnp.stack(wo).astype(jnp.bfloat16),
        "bo": jnp.zeros((NUM_LAYERS, 1, HIDDEN), jnp.float32),
        "ln1_g": jnp.ones((NUM_LAYERS, 1, HIDDEN), jnp.float32),
        "ln1_b": jnp.zeros((NUM_LAYERS, 1, HIDDEN), jnp.float32),
        "w1": jnp.stack(w1).astype(jnp.bfloat16),
        "b1": jnp.zeros((NUM_LAYERS, 1, INTERMEDIATE), jnp.float32),
        "w2": jnp.stack(w2).astype(jnp.bfloat16),
        "b2": jnp.zeros((NUM_LAYERS, 1, HIDDEN), jnp.float32),
        "ln2_g": jnp.ones((NUM_LAYERS, 1, HIDDEN), jnp.float32),
        "ln2_b": jnp.zeros((NUM_LAYERS, 1, HIDDEN), jnp.float32),
    })
    cls_w = nrm(next(keys), (HIDDEN, NUM_LABELS))
    # lane-pad classifier weights so the logits output is lane-dense (1, 128)
    params["cls_w_pad"] = (jnp.zeros((HIDDEN, LANE_PAD), jnp.float32)
                           .at[:, :NUM_LABELS].set(cls_w)).astype(jnp.bfloat16)
    params["cls_b_pad"] = jnp.zeros((1, LANE_PAD), jnp.float32)
    return params


# ---------------- main ----------------
if __name__ == "__main__":
    B, S = 2, 8
    root = jax.random.PRNGKey(0)
    k_param, k_ids = jax.random.split(root)
    params = init_params(k_param)

    input_ids = jax.random.randint(k_ids, (B, S), 0, VOCAB, dtype=jnp.int32)
    attention_mask = jnp.ones((B, S), dtype=jnp.int32).at[1, 6:].set(0)  # pad tail of seq 1
    token_type_ids = jnp.zeros((B, S), dtype=jnp.int32)
    labels = jnp.array([1, 3], dtype=jnp.int32)

    fwd = jax.jit(forward)
    logits, loss = fwd(params, input_ids, attention_mask, token_type_ids, labels)
    jax.block_until_ready((logits, loss))

    assert logits.shape == (B, NUM_LABELS)
    assert loss.shape == ()
    print("KERNEL_OK")
</pallas_src>

<mosaic_0001>
module attributes {stable_mosaic.version = 11 : i64} {
  func.func @fused_bert_kernel(%arg0: i32, %arg1: memref<1x8x128xf32, #tpu.memory_space<vmem>>, %arg2: memref<1x1x8xf32, #tpu.memory_space<vmem>>, %arg3: memref<1x1x128xf32, #tpu.memory_space<vmem>>, %arg4: memref<1x128xf32, #tpu.memory_space<vmem>>, %arg5: memref<1x128xf32, #tpu.memory_space<vmem>>, %arg6: memref<2x128x384xbf16, #tpu.memory_space<vmem>>, %arg7: memref<2x1x384xf32, #tpu.memory_space<vmem>>, %arg8: memref<2x128x128xbf16, #tpu.memory_space<vmem>>, %arg9: memref<2x1x128xf32, #tpu.memory_space<vmem>>, %arg10: memref<2x1x128xf32, #tpu.memory_space<vmem>>, %arg11: memref<2x1x128xf32, #tpu.memory_space<vmem>>, %arg12: memref<2x128x256xbf16, #tpu.memory_space<vmem>>, %arg13: memref<2x1x256xf32, #tpu.memory_space<vmem>>, %arg14: memref<2x256x128xbf16, #tpu.memory_space<vmem>>, %arg15: memref<2x1x128xf32, #tpu.memory_space<vmem>>, %arg16: memref<2x1x128xf32, #tpu.memory_space<vmem>>, %arg17: memref<2x1x128xf32, #tpu.memory_space<vmem>>, %arg18: memref<128x128xbf16, #tpu.memory_space<vmem>>, %arg19: memref<1x128xf32, #tpu.memory_space<vmem>>, %arg20: memref<1x1x128xf32, #tpu.memory_space<vmem>>, %arg21: memref<1x1x128xf32, #tpu.memory_space<vmem>>) attributes {dimension_semantics = [#tpu.dimension_semantics<parallel>], iteration_bounds = array<i64: 2>, scalar_prefetch = 0 : i64, scratch_operands = 0 : i64, tpu.core_type = #tpu.core_type<tc>, window_params = [{transform_indices = @transform_0, window_bounds = array<i64: 1, 8, 128>}, {transform_indices = @transform_1, window_bounds = array<i64: 1, 1, 8>}, {transform_indices = @transform_2, window_bounds = array<i64: 1, 1, 128>}, {pipeline_mode = #tpu.pipeline_mode<synchronous>, transform_indices = @transform_3, window_bounds = array<i64: 1, 128>}, {pipeline_mode = #tpu.pipeline_mode<synchronous>, transform_indices = @transform_4, window_bounds = array<i64: 1, 128>}, {pipeline_mode = #tpu.pipeline_mode<synchronous>, transform_indices = @transform_5, window_bounds = array<i64: 2, 128, 384>}, {pipeline_mode = #tpu.pipeline_mode<synchronous>, transform_indices = @transform_6, window_bounds = array<i64: 2, 1, 384>}, {pipeline_mode = #tpu.pipeline_mode<synchronous>, transform_indices = @transform_7, window_bounds = array<i64: 2, 128, 128>}, {pipeline_mode = #tpu.pipeline_mode<synchronous>, transform_indices = @transform_8, window_bounds = array<i64: 2, 1, 128>}, {pipeline_mode = #tpu.pipeline_mode<synchronous>, transform_indices = @transform_9, window_bounds = array<i64: 2, 1, 128>}, {pipeline_mode = #tpu.pipeline_mode<synchronous>, transform_indices = @transform_10, window_bounds = array<i64: 2, 1, 128>}, {pipeline_mode = #tpu.pipeline_mode<synchronous>, transform_indices = @transform_11, window_bounds = array<i64: 2, 128, 256>}, {pipeline_mode = #tpu.pipeline_mode<synchronous>, transform_indices = @transform_12, window_bounds = array<i64: 2, 1, 256>}, {pipeline_mode = #tpu.pipeline_mode<synchronous>, transform_indices = @transform_13, window_bounds = array<i64: 2, 256, 128>}, {pipeline_mode = #tpu.pipeline_mode<synchronous>, transform_indices = @transform_14, window_bounds = array<i64: 2, 1, 128>}, {pipeline_mode = #tpu.pipeline_mode<synchronous>, transform_indices = @transform_15, window_bounds = array<i64: 2, 1, 128>}, {pipeline_mode = #tpu.pipeline_mode<synchronous>, transform_indices = @transform_16, window_bounds = array<i64: 2, 1, 128>}, {pipeline_mode = #tpu.pipeline_mode<synchronous>, transform_indices = @transform_17, window_bounds = array<i64: 128, 128>}, {pipeline_mode = #tpu.pipeline_mode<synchronous>, transform_indices = @transform_18, window_bounds = array<i64: 1, 128>}, {transform_indices = @transform_19, window_bounds = array<i64: 1, 1, 128>}, {transform_indices = @transform_20, window_bounds = array<i64: 1, 1, 128>}]} {
    %c0 = arith.constant 0 : index
    %c0_0 = arith.constant 0 : index
    %c0_1 = arith.constant 0 : index
    %0 = vector.load %arg2[%c0, %c0_0, %c0_1] : memref<1x1x8xf32, #tpu.memory_space<vmem>>, vector<1x1x8xf32>
    %1 = vector.shape_cast %0 : vector<1x1x8xf32> to vector<1x8xf32>
    %c0_2 = arith.constant 0 : index
    %c0_3 = arith.constant 0 : index
    %c0_4 = arith.constant 0 : index
    %2 = vector.load %arg1[%c0_2, %c0_3, %c0_4] : memref<1x8x128xf32, #tpu.memory_space<vmem>>, vector<1x8x128xf32>
    %3 = vector.shape_cast %2 : vector<1x8x128xf32> to vector<8x128xf32>
    %c0_5 = arith.constant 0 : index
    %c0_6 = arith.constant 0 : index
    %4 = vector.load %arg4[%c0_5, %c0_6] : memref<1x128xf32, #tpu.memory_space<vmem>>, vector<1x128xf32>
    %c0_7 = arith.constant 0 : index
    %c0_8 = arith.constant 0 : index
    %5 = vector.load %arg5[%c0_7, %c0_8] : memref<1x128xf32, #tpu.memory_space<vmem>>, vector<1x128xf32>
    %cst = arith.constant dense<0.000000e+00> : vector<8xf32>
    %6 = vector.multi_reduction <add>, %3, %cst [1] : vector<8x128xf32> to vector<8xf32>
    %7 = vector.shape_cast %6 : vector<8xf32> to vector<8x1xf32>
    %cst_9 = arith.constant 1.280000e+02 : f32
    %8 = vector.broadcast %cst_9 : f32 to vector<8x1xf32>
    %9 = arith.divf %7, %8 : vector<8x1xf32>
    %10 = vector.broadcast %9 : vector<8x1xf32> to vector<8x128xf32>
    %11 = arith.subf %3, %10 : vector<8x128xf32>
    %12 = arith.mulf %11, %11 : vector<8x128xf32>
    %cst_10 = arith.constant dense<0.000000e+00> : vector<8xf32>
    %13 = vector.multi_reduction <add>, %12, %cst_10 [1] : vector<8x128xf32> to vector<8xf32>
    %14 = vector.shape_cast %13 : vector<8xf32> to vector<8x1xf32>
    %cst_11 = arith.constant 1.280000e+02 : f32
    %15 = vector.broadcast %cst_11 : f32 to vector<8x1xf32>
    %16 = arith.divf %14, %15 : vector<8x1xf32>
    %17 = vector.broadcast %9 : vector<8x1xf32> to vector<8x128xf32>
    %18 = arith.subf %3, %17 : vector<8x128xf32>
    %cst_12 = arith.constant 9.99999996E-13 : f32
    %19 = vector.broadcast %cst_12 : f32 to vector<8x1xf32>
    %20 = arith.addf %16, %19 : vector<8x1xf32>
    %21 = math.rsqrt %20 : vector<8x1xf32>
    %22 = vector.broadcast %21 : vector<8x1xf32> to vector<8x128xf32>
    %23 = arith.mulf %18, %22 : vector<8x128xf32>
    %24 = vector.broadcast %4 : vector<1x128xf32> to vector<8x128xf32>
    %25 = arith.mulf %23, %24 : vector<8x128xf32>
    %26 = vector.broadcast %5 : vector<1x128xf32> to vector<8x128xf32>
    %27 = arith.addf %25, %26 : vector<8x128xf32>
    %28 = arith.truncf %27 : vector<8x128xf32> to vector<8x128xbf16>
    %c0_13 = arith.constant 0 : index
    %c0_14 = arith.constant 0 : index
    %c0_15 = arith.constant 0 : index
    %29 = vector.load %arg6[%c0_13, %c0_14, %c0_15] : memref<2x128x384xbf16, #tpu.memory_space<vmem>>, vector<1x128x384xbf16>
    %30 = vector.shape_cast %29 : vector<1x128x384xbf16> to vector<128x384xbf16>
    %cst_16 = arith.constant dense<0.000000e+00> : vector<8x384xf32>
    %31 = tpu.matmul %28, %30, %cst_16 {dimension_numbers = #tpu.dot_dimension_numbers<[1], [0], [0], [1], [0, 0, 1, 1], [], []>} : vector<8x128xbf16>, vector<128x384xbf16>, vector<8x384xf32> -> vector<8x384xf32>
    %c0_17 = arith.constant 0 : index
    %c0_18 = arith.constant 0 : index
    %c0_19 = arith.constant 0 : index
    %32 = vector.load %arg7[%c0_17, %c0_18, %c0_19] : memref<2x1x384xf32, #tpu.memory_space<vmem>>, vector<1x1x384xf32>
    %33 = vector.shape_cast %32 : vector<1x1x384xf32> to vector<1x384xf32>
    %34 = vector.broadcast %33 : vector<1x384xf32> to vector<8x384xf32>
    %35 = arith.addf %31, %34 : vector<8x384xf32>
    %36 = arith.truncf %35 : vector<8x384xf32> to vector<8x384xbf16>
    %cst_20 = arith.constant 0.000000e+00 : f32
    %37 = vector.broadcast %cst_20 : f32 to vector<8x128xf32>
    %38 = vector.extract_strided_slice %36 {offsets = [0, 0], sizes = [8, 32], strides = [1, 1]} : vector<8x384xbf16> to vector<8x32xbf16>
    %39 = vector.extract_strided_slice %36 {offsets = [0, 128], sizes = [8, 32], strides = [1, 1]} : vector<8x384xbf16> to vector<8x32xbf16>
    %40 = vector.extract_strided_slice %36 {offsets = [0, 256], sizes = [8, 32], strides = [1, 1]} : vector<8x384xbf16> to vector<8x32xbf16>
    %cst_21 = arith.constant dense<0.000000e+00> : vector<8x8xf32>
    %41 = tpu.matmul %38, %39, %cst_21 {dimension_numbers = #tpu.dot_dimension_numbers<[1], [1], [0], [0], [0, 0, 1, 0], [], []>} : vector<8x32xbf16>, vector<8x32xbf16>, vector<8x8xf32> -> vector<8x8xf32>
    %cst_22 = arith.constant 0.176776692 : f32
    %42 = vector.broadcast %cst_22 : f32 to vector<8x8xf32>
    %43 = arith.mulf %41, %42 : vector<8x8xf32>
    %44 = vector.broadcast %1 : vector<1x8xf32> to vector<8x8xf32>
    %45 = arith.addf %43, %44 : vector<8x8xf32>
    %cst_23 = arith.constant dense<0xFF800000> : vector<8xf32>
    %46 = vector.multi_reduction <maximumf>, %45, %cst_23 [1] : vector<8x8xf32> to vector<8xf32>
    %47 = vector.shape_cast %46 : vector<8xf32> to vector<8x1xf32>
    %48 = vector.broadcast %47 : vector<8x1xf32> to vector<8x8xf32>
    %49 = arith.subf %45, %48 : vector<8x8xf32>
    %50 = math.exp %49 : vector<8x8xf32>
    %cst_24 = arith.constant dense<0.000000e+00> : vector<8xf32>
    %51 = vector.multi_reduction <add>, %50, %cst_24 [1] : vector<8x8xf32> to vector<8xf32>
    %52 = vector.shape_cast %51 : vector<8xf32> to vector<8x1xf32>
    %53 = tpu.reciprocal %52 {approx = true} : vector<8x1xf32> -> vector<8x1xf32>
    %54 = vector.broadcast %53 : vector<8x1xf32> to vector<8x8xf32>
    %55 = arith.mulf %50, %54 : vector<8x8xf32>
    %56 = arith.truncf %55 : vector<8x8xf32> to vector<8x8xbf16>
    %cst_25 = arith.constant dense<0.000000e+00> : vector<8x32xf32>
    %57 = tpu.matmul %56, %40, %cst_25 {dimension_numbers = #tpu.dot_dimension_numbers<[1], [0], [0], [1], [0, 0, 1, 1], [], []>} : vector<8x8xbf16>, vector<8x32xbf16>, vector<8x32xf32> -> vector<8x32xf32>
    %58 = arith.truncf %57 : vector<8x32xf32> to vector<8x32xbf16>
    %c0_26 = arith.constant 0 : index
    %c0_27 = arith.constant 0 : index
    %c0_28 = arith.constant 0 : index
    %59 = vector.load %arg8[%c0_26, %c0_27, %c0_28] : memref<2x128x128xbf16, #tpu.memory_space<vmem>>, vector<1x32x128xbf16>
    %60 = vector.shape_cast %59 : vector<1x32x128xbf16> to vector<32x128xbf16>
    %cst_29 = arith.constant dense<0.000000e+00> : vector<8x128xf32>
    %61 = tpu.matmul %58, %60, %cst_29 {dimension_numbers = #tpu.dot_dimension_numbers<[1], [0], [0], [1], [0, 0, 1, 1], [], []>} : vector<8x32xbf16>, vector<32x128xbf16>, vector<8x128xf32> -> vector<8x128xf32>
    %62 = arith.addf %37, %61 : vector<8x128xf32>
    %63 = vector.extract_strided_slice %36 {offsets = [0, 32], sizes = [8, 32], strides = [1, 1]} : vector<8x384xbf16> to vector<8x32xbf16>
    %64 = vector.extract_strided_slice %36 {offsets = [0, 160], sizes = [8, 32], strides = [1, 1]} : vector<8x384xbf16> to vector<8x32xbf16>
    %65 = vector.extract_strided_slice %36 {offsets = [0, 288], sizes = [8, 32], strides = [1, 1]} : vector<8x384xbf16> to vector<8x32xbf16>
    %cst_30 = arith.constant dense<0.000000e+00> : vector<8x8xf32>
    %66 = tpu.matmul %63, %64, %cst_30 {dimension_numbers = #tpu.dot_dimension_numbers<[1], [1], [0], [0], [0, 0, 1, 0], [], []>} : vector<8x32xbf16>, vector<8x32xbf16>, vector<8x8xf32> -> vector<8x8xf32>
    %cst_31 = arith.constant 0.176776692 : f32
    %67 = vector.broadcast %cst_31 : f32 to vector<8x8xf32>
    %68 = arith.mulf %66, %67 : vector<8x8xf32>
    %69 = vector.broadcast %1 : vector<1x8xf32> to vector<8x8xf32>
    %70 = arith.addf %68, %69 : vector<8x8xf32>
    %cst_32 = arith.constant dense<0xFF800000> : vector<8xf32>
    %71 = vector.multi_reduction <maximumf>, %70, %cst_32 [1] : vector<8x8xf32> to vector<8xf32>
    %72 = vector.shape_cast %71 : vector<8xf32> to vector<8x1xf32>
    %73 = vector.broadcast %72 : vector<8x1xf32> to vector<8x8xf32>
    %74 = arith.subf %70, %73 : vector<8x8xf32>
    %75 = math.exp %74 : vector<8x8xf32>
    %cst_33 = arith.constant dense<0.000000e+00> : vector<8xf32>
    %76 = vector.multi_reduction <add>, %75, %cst_33 [1] : vector<8x8xf32> to vector<8xf32>
    %77 = vector.shape_cast %76 : vector<8xf32> to vector<8x1xf32>
    %78 = tpu.reciprocal %77 {approx = true} : vector<8x1xf32> -> vector<8x1xf32>
    %79 = vector.broadcast %78 : vector<8x1xf32> to vector<8x8xf32>
    %80 = arith.mulf %75, %79 : vector<8x8xf32>
    %81 = arith.truncf %80 : vector<8x8xf32> to vector<8x8xbf16>
    %cst_34 = arith.constant dense<0.000000e+00> : vector<8x32xf32>
    %82 = tpu.matmul %81, %65, %cst_34 {dimension_numbers = #tpu.dot_dimension_numbers<[1], [0], [0], [1], [0, 0, 1, 1], [], []>} : vector<8x8xbf16>, vector<8x32xbf16>, vector<8x32xf32> -> vector<8x32xf32>
    %83 = arith.truncf %82 : vector<8x32xf32> to vector<8x32xbf16>
    %c0_35 = arith.constant 0 : index
    %c32 = arith.constant 32 : index
    %c0_36 = arith.constant 0 : index
    %84 = vector.load %arg8[%c0_35, %c32, %c0_36] : memref<2x128x128xbf16, #tpu.memory_space<vmem>>, vector<1x32x128xbf16>
    %85 = vector.shape_cast %84 : vector<1x32x128xbf16> to vector<32x128xbf16>
    %cst_37 = arith.constant dense<0.000000e+00> : vector<8x128xf32>
    %86 = tpu.matmul %83, %85, %cst_37 {dimension_numbers = #tpu.dot_dimension_numbers<[1], [0], [0], [1], [0, 0, 1, 1], [], []>} : vector<8x32xbf16>, vector<32x128xbf16>, vector<8x128xf32> -> vector<8x128xf32>
    %87 = arith.addf %62, %86 : vector<8x128xf32>
    %88 = vector.extract_strided_slice %36 {offsets = [0, 64], sizes = [8, 32], strides = [1, 1]} : vector<8x384xbf16> to vector<8x32xbf16>
    %89 = vector.extract_strided_slice %36 {offsets = [0, 192], sizes = [8, 32], strides = [1, 1]} : vector<8x384xbf16> to vector<8x32xbf16>
    %90 = vector.extract_strided_slice %36 {offsets = [0, 320], sizes = [8, 32], strides = [1, 1]} : vector<8x384xbf16> to vector<8x32xbf16>
    %cst_38 = arith.constant dense<0.000000e+00> : vector<8x8xf32>
    %91 = tpu.matmul %88, %89, %cst_38 {dimension_numbers = #tpu.dot_dimension_numbers<[1], [1], [0], [0], [0, 0, 1, 0], [], []>} : vector<8x32xbf16>, vector<8x32xbf16>, vector<8x8xf32> -> vector<8x8xf32>
    %cst_39 = arith.constant 0.176776692 : f32
    %92 = vector.broadcast %cst_39 : f32 to vector<8x8xf32>
    %93 = arith.mulf %91, %92 : vector<8x8xf32>
    %94 = vector.broadcast %1 : vector<1x8xf32> to vector<8x8xf32>
    %95 = arith.addf %93, %94 : vector<8x8xf32>
    %cst_40 = arith.constant dense<0xFF800000> : vector<8xf32>
    %96 = vector.multi_reduction <maximumf>, %95, %cst_40 [1] : vector<8x8xf32> to vector<8xf32>
    %97 = vector.shape_cast %96 : vector<8xf32> to vector<8x1xf32>
    %98 = vector.broadcast %97 : vector<8x1xf32> to vector<8x8xf32>
    %99 = arith.subf %95, %98 : vector<8x8xf32>
    %100 = math.exp %99 : vector<8x8xf32>
    %cst_41 = arith.constant dense<0.000000e+00> : vector<8xf32>
    %101 = vector.multi_reduction <add>, %100, %cst_41 [1] : vector<8x8xf32> to vector<8xf32>
    %102 = vector.shape_cast %101 : vector<8xf32> to vector<8x1xf32>
    %103 = tpu.reciprocal %102 {approx = true} : vector<8x1xf32> -> vector<8x1xf32>
    %104 = vector.broadcast %103 : vector<8x1xf32> to vector<8x8xf32>
    %105 = arith.mulf %100, %104 : vector<8x8xf32>
    %106 = arith.truncf %105 : vector<8x8xf32> to vector<8x8xbf16>
    %cst_42 = arith.constant dense<0.000000e+00> : vector<8x32xf32>
    %107 = tpu.matmul %106, %90, %cst_42 {dimension_numbers = #tpu.dot_dimension_numbers<[1], [0], [0], [1], [0, 0, 1, 1], [], []>} : vector<8x8xbf16>, vector<8x32xbf16>, vector<8x32xf32> -> vector<8x32xf32>
    %108 = arith.truncf %107 : vector<8x32xf32> to vector<8x32xbf16>
    %c0_43 = arith.constant 0 : index
    %c64 = arith.constant 64 : index
    %c0_44 = arith.constant 0 : index
    %109 = vector.load %arg8[%c0_43, %c64, %c0_44] : memref<2x128x128xbf16, #tpu.memory_space<vmem>>, vector<1x32x128xbf16>
    %110 = vector.shape_cast %109 : vector<1x32x128xbf16> to vector<32x128xbf16>
    %cst_45 = arith.constant dense<0.000000e+00> : vector<8x128xf32>
    %111 = tpu.matmul %108, %110, %cst_45 {dimension_numbers = #tpu.dot_dimension_numbers<[1], [0], [0], [1], [0, 0, 1, 1], [], []>} : vector<8x32xbf16>, vector<32x128xbf16>, vector<8x128xf32> -> vector<8x128xf32>
    %112 = arith.addf %87, %111 : vector<8x128xf32>
    %113 = vector.extract_strided_slice %36 {offsets = [0, 96], sizes = [8, 32], strides = [1, 1]} : vector<8x384xbf16> to vector<8x32xbf16>
    %114 = vector.extract_strided_slice %36 {offsets = [0, 224], sizes = [8, 32], strides = [1, 1]} : vector<8x384xbf16> to vector<8x32xbf16>
    %115 = vector.extract_strided_slice %36 {offsets = [0, 352], sizes = [8, 32], strides = [1, 1]} : vector<8x384xbf16> to vector<8x32xbf16>
    %cst_46 = arith.constant dense<0.000000e+00> : vector<8x8xf32>
    %116 = tpu.matmul %113, %114, %cst_46 {dimension_numbers = #tpu.dot_dimension_numbers<[1], [1], [0], [0], [0, 0, 1, 0], [], []>} : vector<8x32xbf16>, vector<8x32xbf16>, vector<8x8xf32> -> vector<8x8xf32>
    %cst_47 = arith.constant 0.176776692 : f32
    %117 = vector.broadcast %cst_47 : f32 to vector<8x8xf32>
    %118 = arith.mulf %116, %117 : vector<8x8xf32>
    %119 = vector.broadcast %1 : vector<1x8xf32> to vector<8x8xf32>
    %120 = arith.addf %118, %119 : vector<8x8xf32>
    %cst_48 = arith.constant dense<0xFF800000> : vector<8xf32>
    %121 = vector.multi_reduction <maximumf>, %120, %cst_48 [1] : vector<8x8xf32> to vector<8xf32>
    %122 = vector.shape_cast %121 : vector<8xf32> to vector<8x1xf32>
    %123 = vector.broadcast %122 : vector<8x1xf32> to vector<8x8xf32>
    %124 = arith.subf %120, %123 : vector<8x8xf32>
    %125 = math.exp %124 : vector<8x8xf32>
    %cst_49 = arith.constant dense<0.000000e+00> : vector<8xf32>
    %126 = vector.multi_reduction <add>, %125, %cst_49 [1] : vector<8x8xf32> to vector<8xf32>
    %127 = vector.shape_cast %126 : vector<8xf32> to vector<8x1xf32>
    %128 = tpu.reciprocal %127 {approx = true} : vector<8x1xf32> -> vector<8x1xf32>
    %129 = vector.broadcast %128 : vector<8x1xf32> to vector<8x8xf32>
    %130 = arith.mulf %125, %129 : vector<8x8xf32>
    %131 = arith.truncf %130 : vector<8x8xf32> to vector<8x8xbf16>
    %cst_50 = arith.constant dense<0.000000e+00> : vector<8x32xf32>
    %132 = tpu.matmul %131, %115, %cst_50 {dimension_numbers = #tpu.dot_dimension_numbers<[1], [0], [0], [1], [0, 0, 1, 1], [], []>} : vector<8x8xbf16>, vector<8x32xbf16>, vector<8x32xf32> -> vector<8x32xf32>
    %133 = arith.truncf %132 : vector<8x32xf32> to vector<8x32xbf16>
    %c0_51 = arith.constant 0 : index
    %c96 = arith.constant 96 : index
    %c0_52 = arith.constant 0 : index
    %134 = vector.load %arg8[%c0_51, %c96, %c0_52] : memref<2x128x128xbf16, #tpu.memory_space<vmem>>, vector<1x32x128xbf16>
    %135 = vector.shape_cast %134 : vector<1x32x128xbf16> to vector<32x128xbf16>
    %cst_53 = arith.constant dense<0.000000e+00> : vector<8x128xf32>
    %136 = tpu.matmul %133, %135, %cst_53 {dimension_numbers = #tpu.dot_dimension_numbers<[1], [0], [0], [1], [0, 0, 1, 1], [], []>} : vector<8x32xbf16>, vector<32x128xbf16>, vector<8x128xf32> -> vector<8x128xf32>
    %137 = arith.addf %112, %136 : vector<8x128xf32>
    %c0_54 = arith.constant 0 : index
    %c0_55 = arith.constant 0 : index
    %c0_56 = arith.constant 0 : index
    %138 = vector.load %arg9[%c0_54, %c0_55, %c0_56] : memref<2x1x128xf32, #tpu.memory_space<vmem>>, vector<1x1x128xf32>
    %139 = vector.shape_cast %138 : vector<1x1x128xf32> to vector<1x128xf32>
    %140 = vector.broadcast %139 : vector<1x128xf32> to vector<8x128xf32>
    %141 = arith.addf %137, %140 : vector<8x128xf32>
    %142 = arith.addf %27, %141 : vector<8x128xf32>
    %c0_57 = arith.constant 0 : index
    %c0_58 = arith.constant 0 : index
    %c0_59 = arith.constant 0 : index
    %143 = vector.load %arg10[%c0_57, %c0_58, %c0_59] : memref<2x1x128xf32, #tpu.memory_space<vmem>>, vector<1x1x128xf32>
    %144 = vector.shape_cast %143 : vector<1x1x128xf32> to vector<1x128xf32>
    %c0_60 = arith.constant 0 : index
    %c0_61 = arith.constant 0 : index
    %c0_62 = arith.constant 0 : index
    %145 = vector.load %arg11[%c0_60, %c0_61, %c0_62] : memref<2x1x128xf32, #tpu.memory_space<vmem>>, vector<1x1x128xf32>
    %146 = vector.shape_cast %145 : vector<1x1x128xf32> to vector<1x128xf32>
    %cst_63 = arith.constant dense<0.000000e+00> : vector<8xf32>
    %147 = vector.multi_reduction <add>, %142, %cst_63 [1] : vector<8x128xf32> to vector<8xf32>
    %148 = vector.shape_cast %147 : vector<8xf32> to vector<8x1xf32>
    %cst_64 = arith.constant 1.280000e+02 : f32
    %149 = vector.broadcast %cst_64 : f32 to vector<8x1xf32>
    %150 = arith.divf %148, %149 : vector<8x1xf32>
    %151 = vector.broadcast %150 : vector<8x1xf32> to vector<8x128xf32>
    %152 = arith.subf %142, %151 : vector<8x128xf32>
    %153 = arith.mulf %152, %152 : vector<8x128xf32>
    %cst_65 = arith.constant dense<0.000000e+00> : vector<8xf32>
    %154 = vector.multi_reduction <add>, %153, %cst_65 [1] : vector<8x128xf32> to vector<8xf32>
    %155 = vector.shape_cast %154 : vector<8xf32> to vector<8x1xf32>
    %cst_66 = arith.constant 1.280000e+02 : f32
    %156 = vector.broadcast %cst_66 : f32 to vector<8x1xf32>
    %157 = arith.divf %155, %156 : vector<8x1xf32>
    %158 = vector.broadcast %150 : vector<8x1xf32> to vector<8x128xf32>
    %159 = arith.subf %142, %158 : vector<8x128xf32>
    %cst_67 = arith.constant 9.99999996E-13 : f32
    %160 = vector.broadcast %cst_67 : f32 to vector<8x1xf32>
    %161 = arith.addf %157, %160 : vector<8x1xf32>
    %162 = math.rsqrt %161 : vector<8x1xf32>
    %163 = vector.broadcast %162 : vector<8x1xf32> to vector<8x128xf32>
    %164 = arith.mulf %159, %163 : vector<8x128xf32>
    %165 = vector.broadcast %144 : vector<1x128xf32> to vector<8x128xf32>
    %166 = arith.mulf %164, %165 : vector<8x128xf32>
    %167 = vector.broadcast %146 : vector<1x128xf32> to vector<8x128xf32>
    %168 = arith.addf %166, %167 : vector<8x128xf32>
    %169 = arith.truncf %168 : vector<8x128xf32> to vector<8x128xbf16>
    %c0_68 = arith.constant 0 : index
    %c0_69 = arith.constant 0 : index
    %c0_70 = arith.constant 0 : index
    %170 = vector.load %arg12[%c0_68, %c0_69, %c0_70] : memref<2x128x256xbf16, #tpu.memory_space<vmem>>, vector<1x128x256xbf16>
    %171 = vector.shape_cast %170 : vector<1x128x256xbf16> to vector<128x256xbf16>
    %cst_71 = arith.constant dense<0.000000e+00> : vector<8x256xf32>
    %172 = tpu.matmul %169, %171, %cst_71 {dimension_numbers = #tpu.dot_dimension_numbers<[1], [0], [0], [1], [0, 0, 1, 1], [], []>} : vector<8x128xbf16>, vector<128x256xbf16>, vector<8x256xf32> -> vector<8x256xf32>
    %c0_72 = arith.constant 0 : index
    %c0_73 = arith.constant 0 : index
    %c0_74 = arith.constant 0 : index
    %173 = vector.load %arg13[%c0_72, %c0_73, %c0_74] : memref<2x1x256xf32, #tpu.memory_space<vmem>>, vector<1x1x256xf32>
    %174 = vector.shape_cast %173 : vector<1x1x256xf32> to vector<1x256xf32>
    %175 = vector.broadcast %174 : vector<1x256xf32> to vector<8x256xf32>
    %176 = arith.addf %172, %175 : vector<8x256xf32>
    %cst_75 = arith.constant 5.000000e-01 : f32
    %177 = vector.broadcast %cst_75 : f32 to vector<8x256xf32>
    %178 = arith.mulf %177, %176 : vector<8x256xf32>
    %cst_76 = arith.constant 4.471500e-02 : f32
    %179 = vector.broadcast %cst_76 : f32 to vector<8x256xf32>
    %180 = arith.mulf %179, %176 : vector<8x256xf32>
    %181 = arith.mulf %180, %176 : vector<8x256xf32>
    %182 = arith.mulf %181, %176 : vector<8x256xf32>
    %183 = arith.addf %176, %182 : vector<8x256xf32>
    %cst_77 = arith.constant 0.797884583 : f32
    %184 = vector.broadcast %cst_77 : f32 to vector<8x256xf32>
    %185 = arith.mulf %184, %183 : vector<8x256xf32>
    %186 = math.tanh %185 : vector<8x256xf32>
    %cst_78 = arith.constant 1.000000e+00 : f32
    %187 = vector.broadcast %cst_78 : f32 to vector<8x256xf32>
    %188 = arith.addf %187, %186 : vector<8x256xf32>
    %189 = arith.mulf %178, %188 : vector<8x256xf32>
    %190 = arith.truncf %189 : vector<8x256xf32> to vector<8x256xbf16>
    %c0_79 = arith.constant 0 : index
    %c0_80 = arith.constant 0 : index
    %c0_81 = arith.constant 0 : index
    %191 = vector.load %arg14[%c0_79, %c0_80, %c0_81] : memref<2x256x128xbf16, #tpu.memory_space<vmem>>, vector<1x256x128xbf16>
    %192 = vector.shape_cast %191 : vector<1x256x128xbf16> to vector<256x128xbf16>
    %cst_82 = arith.constant dense<0.000000e+00> : vector<8x128xf32>
    %193 = tpu.matmul %190, %192, %cst_82 {dimension_numbers = #tpu.dot_dimension_numbers<[1], [0], [0], [1], [0, 0, 1, 1], [], []>} : vector<8x256xbf16>, vector<256x128xbf16>, vector<8x128xf32> -> vector<8x128xf32>
    %c0_83 = arith.constant 0 : index
    %c0_84 = arith.constant 0 : index
    %c0_85 = arith.constant 0 : index
    %194 = vector.load %arg15[%c0_83, %c0_84, %c0_85] : memref<2x1x128xf32, #tpu.memory_space<vmem>>, vector<1x1x128xf32>
    %195 = vector.shape_cast %194 : vector<1x1x128xf32> to vector<1x128xf32>
    %196 = vector.broadcast %195 : vector<1x128xf32> to vector<8x128xf32>
    %197 = arith.addf %193, %196 : vector<8x128xf32>
    %198 = arith.addf %168, %197 : vector<8x128xf32>
    %c0_86 = arith.constant 0 : index
    %c0_87 = arith.constant 0 : index
    %c0_88 = arith.constant 0 : index
    %199 = vector.load %arg16[%c0_86, %c0_87, %c0_88] : memref<2x1x128xf32, #tpu.memory_space<vmem>>, vector<1x1x128xf32>
    %200 = vector.shape_cast %199 : vector<1x1x128xf32> to vector<1x128xf32>
    %c0_89 = arith.constant 0 : index
    %c0_90 = arith.constant 0 : index
    %c0_91 = arith.constant 0 : index
    %201 = vector.load %arg17[%c0_89, %c0_90, %c0_91] : memref<2x1x128xf32, #tpu.memory_space<vmem>>, vector<1x1x128xf32>
    %202 = vector.shape_cast %201 : vector<1x1x128xf32> to vector<1x128xf32>
    %cst_92 = arith.constant dense<0.000000e+00> : vector<8xf32>
    %203 = vector.multi_reduction <add>, %198, %cst_92 [1] : vector<8x128xf32> to vector<8xf32>
    %204 = vector.shape_cast %203 : vector<8xf32> to vector<8x1xf32>
    %cst_93 = arith.constant 1.280000e+02 : f32
    %205 = vector.broadcast %cst_93 : f32 to vector<8x1xf32>
    %206 = arith.divf %204, %205 : vector<8x1xf32>
    %207 = vector.broadcast %206 : vector<8x1xf32> to vector<8x128xf32>
    %208 = arith.subf %198, %207 : vector<8x128xf32>
    %209 = arith.mulf %208, %208 : vector<8x128xf32>
    %cst_94 = arith.constant dense<0.000000e+00> : vector<8xf32>
    %210 = vector.multi_reduction <add>, %209, %cst_94 [1] : vector<8x128xf32> to vector<8xf32>
    %211 = vector.shape_cast %210 : vector<8xf32> to vector<8x1xf32>
    %cst_95 = arith.constant 1.280000e+02 : f32
    %212 = vector.broadcast %cst_95 : f32 to vector<8x1xf32>
    %213 = arith.divf %211, %212 : vector<8x1xf32>
    %214 = vector.broadcast %206 : vector<8x1xf32> to vector<8x128xf32>
    %215 = arith.subf %198, %214 : vector<8x128xf32>
    %cst_96 = arith.constant 9.99999996E-13 : f32
    %216 = vector.broadcast %cst_96 : f32 to vector<8x1xf32>
    %217 = arith.addf %213, %216 : vector<8x1xf32>
    %218 = math.rsqrt %217 : vector<8x1xf32>
    %219 = vector.broadcast %218 : vector<8x1xf32> to vector<8x128xf32>
    %220 = arith.mulf %215, %219 : vector<8x128xf32>
    %221 = vector.broadcast %200 : vector<1x128xf32> to vector<8x128xf32>
    %222 = arith.mulf %220, %221 : vector<8x128xf32>
    %223 = vector.broadcast %202 : vector<1x128xf32> to vector<8x128xf32>
    %224 = arith.addf %222, %223 : vector<8x128xf32>
    %225 = arith.truncf %224 : vector<8x128xf32> to vector<8x128xbf16>
    %c1 = arith.constant 1 : index
    %c0_97 = arith.constant 0 : index
    %c0_98 = arith.constant 0 : index
    %226 = vector.load %arg6[%c1, %c0_97, %c0_98] : memref<2x128x384xbf16, #tpu.memory_space<vmem>>, vector<1x128x384xbf16>
    %227 = vector.shape_cast %226 : vector<1x128x384xbf16> to vector<128x384xbf16>
    %cst_99 = arith.constant dense<0.000000e+00> : vector<8x384xf32>
    %228 = tpu.matmul %225, %227, %cst_99 {dimension_numbers = #tpu.dot_dimension_numbers<[1], [0], [0], [1], [0, 0, 1, 1], [], []>} : vector<8x128xbf16>, vector<128x384xbf16>, vector<8x384xf32> -> vector<8x384xf32>
    %c1_100 = arith.constant 1 : index
    %c0_101 = arith.constant 0 : index
    %c0_102 = arith.constant 0 : index
    %229 = vector.load %arg7[%c1_100, %c0_101, %c0_102] : memref<2x1x384xf32, #tpu.memory_space<vmem>>, vector<1x1x384xf32>
    %230 = vector.shape_cast %229 : vector<1x1x384xf32> to vector<1x384xf32>
    %231 = vector.broadcast %230 : vector<1x384xf32> to vector<8x384xf32>
    %232 = arith.addf %228, %231 : vector<8x384xf32>
    %233 = arith.truncf %232 : vector<8x384xf32> to vector<8x384xbf16>
    %cst_103 = arith.constant 0.000000e+00 : f32
    %234 = vector.broadcast %cst_103 : f32 to vector<8x128xf32>
    %235 = vector.extract_strided_slice %233 {offsets = [0, 0], sizes = [8, 32], strides = [1, 1]} : vector<8x384xbf16> to vector<8x32xbf16>
    %236 = vector.extract_strided_slice %233 {offsets = [0, 128], sizes = [8, 32], strides = [1, 1]} : vector<8x384xbf16> to vector<8x32xbf16>
    %237 = vector.extract_strided_slice %233 {offsets = [0, 256], sizes = [8, 32], strides = [1, 1]} : vector<8x384xbf16> to vector<8x32xbf16>
    %cst_104 = arith.constant dense<0.000000e+00> : vector<8x8xf32>
    %238 = tpu.matmul %235, %236, %cst_104 {dimension_numbers = #tpu.dot_dimension_numbers<[1], [1], [0], [0], [0, 0, 1, 0], [], []>} : vector<8x32xbf16>, vector<8x32xbf16>, vector<8x8xf32> -> vector<8x8xf32>
    %cst_105 = arith.constant 0.176776692 : f32
    %239 = vector.broadcast %cst_105 : f32 to vector<8x8xf32>
    %240 = arith.mulf %238, %239 : vector<8x8xf32>
    %241 = vector.broadcast %1 : vector<1x8xf32> to vector<8x8xf32>
    %242 = arith.addf %240, %241 : vector<8x8xf32>
    %cst_106 = arith.constant dense<0xFF800000> : vector<8xf32>
    %243 = vector.multi_reduction <maximumf>, %242, %cst_106 [1] : vector<8x8xf32> to vector<8xf32>
    %244 = vector.shape_cast %243 : vector<8xf32> to vector<8x1xf32>
    %245 = vector.broadcast %244 : vector<8x1xf32> to vector<8x8xf32>
    %246 = arith.subf %242, %245 : vector<8x8xf32>
    %247 = math.exp %246 : vector<8x8xf32>
    %cst_107 = arith.constant dense<0.000000e+00> : vector<8xf32>
    %248 = vector.multi_reduction <add>, %247, %cst_107 [1] : vector<8x8xf32> to vector<8xf32>
    %249 = vector.shape_cast %248 : vector<8xf32> to vector<8x1xf32>
    %250 = tpu.reciprocal %249 {approx = true} : vector<8x1xf32> -> vector<8x1xf32>
    %251 = vector.broadcast %250 : vector<8x1xf32> to vector<8x8xf32>
    %252 = arith.mulf %247, %251 : vector<8x8xf32>
    %253 = arith.truncf %252 : vector<8x8xf32> to vector<8x8xbf16>
    %cst_108 = arith.constant dense<0.000000e+00> : vector<8x32xf32>
    %254 = tpu.matmul %253, %237, %cst_108 {dimension_numbers = #tpu.dot_dimension_numbers<[1], [0], [0], [1], [0, 0, 1, 1], [], []>} : vector<8x8xbf16>, vector<8x32xbf16>, vector<8x32xf32> -> vector<8x32xf32>
    %255 = arith.truncf %254 : vector<8x32xf32> to vector<8x32xbf16>
    %c1_109 = arith.constant 1 : index
    %c0_110 = arith.constant 0 : index
    %c0_111 = arith.constant 0 : index
    %256 = vector.load %arg8[%c1_109, %c0_110, %c0_111] : memref<2x128x128xbf16, #tpu.memory_space<vmem>>, vector<1x32x128xbf16>
    %257 = vector.shape_cast %256 : vector<1x32x128xbf16> to vector<32x128xbf16>
    %cst_112 = arith.constant dense<0.000000e+00> : vector<8x128xf32>
    %258 = tpu.matmul %255, %257, %cst_112 {dimension_numbers = #tpu.dot_dimension_numbers<[1], [0], [0], [1], [0, 0, 1, 1], [], []>} : vector<8x32xbf16>, vector<32x128xbf16>, vector<8x128xf32> -> vector<8x128xf32>
    %259 = arith.addf %234, %258 : vector<8x128xf32>
    %260 = vector.extract_strided_slice %233 {offsets = [0, 32], sizes = [8, 32], strides = [1, 1]} : vector<8x384xbf16> to vector<8x32xbf16>
    %261 = vector.extract_strided_slice %233 {offsets = [0, 160], sizes = [8, 32], strides = [1, 1]} : vector<8x384xbf16> to vector<8x32xbf16>
    %262 = vector.extract_strided_slice %233 {offsets = [0, 288], sizes = [8, 32], strides = [1, 1]} : vector<8x384xbf16> to vector<8x32xbf16>
    %cst_113 = arith.constant dense<0.000000e+00> : vector<8x8xf32>
    %263 = tpu.matmul %260, %261, %cst_113 {dimension_numbers = #tpu.dot_dimension_numbers<[1], [1], [0], [0], [0, 0, 1, 0], [], []>} : vector<8x32xbf16>, vector<8x32xbf16>, vector<8x8xf32> -> vector<8x8xf32>
    %cst_114 = arith.constant 0.176776692 : f32
    %264 = vector.broadcast %cst_114 : f32 to vector<8x8xf32>
    %265 = arith.mulf %263, %264 : vector<8x8xf32>
    %266 = vector.broadcast %1 : vector<1x8xf32> to vector<8x8xf32>
    %267 = arith.addf %265, %266 : vector<8x8xf32>
    %cst_115 = arith.constant dense<0xFF800000> : vector<8xf32>
    %268 = vector.multi_reduction <maximumf>, %267, %cst_115 [1] : vector<8x8xf32> to vector<8xf32>
    %269 = vector.shape_cast %268 : vector<8xf32> to vector<8x1xf32>
    %270 = vector.broadcast %269 : vector<8x1xf32> to vector<8x8xf32>
    %271 = arith.subf %267, %270 : vector<8x8xf32>
    %272 = math.exp %271 : vector<8x8xf32>
    %cst_116 = arith.constant dense<0.000000e+00> : vector<8xf32>
    %273 = vector.multi_reduction <add>, %272, %cst_116 [1] : vector<8x8xf32> to vector<8xf32>
    %274 = vector.shape_cast %273 : vector<8xf32> to vector<8x1xf32>
    %275 = tpu.reciprocal %274 {approx = true} : vector<8x1xf32> -> vector<8x1xf32>
    %276 = vector.broadcast %275 : vector<8x1xf32> to vector<8x8xf32>
    %277 = arith.mulf %272, %276 : vector<8x8xf32>
    %278 = arith.truncf %277 : vector<8x8xf32> to vector<8x8xbf16>
    %cst_117 = arith.constant dense<0.000000e+00> : vector<8x32xf32>
    %279 = tpu.matmul %278, %262, %cst_117 {dimension_numbers = #tpu.dot_dimension_numbers<[1], [0], [0], [1], [0, 0, 1, 1], [], []>} : vector<8x8xbf16>, vector<8x32xbf16>, vector<8x32xf32> -> vector<8x32xf32>
    %280 = arith.truncf %279 : vector<8x32xf32> to vector<8x32xbf16>
    %c1_118 = arith.constant 1 : index
    %c32_119 = arith.constant 32 : index
    %c0_120 = arith.constant 0 : index
    %281 = vector.load %arg8[%c1_118, %c32_119, %c0_120] : memref<2x128x128xbf16, #tpu.memory_space<vmem>>, vector<1x32x128xbf16>
    %282 = vector.shape_cast %281 : vector<1x32x128xbf16> to vector<32x128xbf16>
    %cst_121 = arith.constant dense<0.000000e+00> : vector<8x128xf32>
    %283 = tpu.matmul %280, %282, %cst_121 {dimension_numbers = #tpu.dot_dimension_numbers<[1], [0], [0], [1], [0, 0, 1, 1], [], []>} : vector<8x32xbf16>, vector<32x128xbf16>, vector<8x128xf32> -> vector<8x128xf32>
    %284 = arith.addf %259, %283 : vector<8x128xf32>
    %285 = vector.extract_strided_slice %233 {offsets = [0, 64], sizes = [8, 32], strides = [1, 1]} : vector<8x384xbf16> to vector<8x32xbf16>
    %286 = vector.extract_strided_slice %233 {offsets = [0, 192], sizes = [8, 32], strides = [1, 1]} : vector<8x384xbf16> to vector<8x32xbf16>
    %287 = vector.extract_strided_slice %233 {offsets = [0, 320], sizes = [8, 32], strides = [1, 1]} : vector<8x384xbf16> to vector<8x32xbf16>
    %cst_122 = arith.constant dense<0.000000e+00> : vector<8x8xf32>
    %288 = tpu.matmul %285, %286, %cst_122 {dimension_numbers = #tpu.dot_dimension_numbers<[1], [1], [0], [0], [0, 0, 1, 0], [], []>} : vector<8x32xbf16>, vector<8x32xbf16>, vector<8x8xf32> -> vector<8x8xf32>
    %cst_123 = arith.constant 0.176776692 : f32
    %289 = vector.broadcast %cst_123 : f32 to vector<8x8xf32>
    %290 = arith.mulf %288, %289 : vector<8x8xf32>
    %291 = vector.broadcast %1 : vector<1x8xf32> to vector<8x8xf32>
    %292 = arith.addf %290, %291 : vector<8x8xf32>
    %cst_124 = arith.constant dense<0xFF800000> : vector<8xf32>
    %293 = vector.multi_reduction <maximumf>, %292, %cst_124 [1] : vector<8x8xf32> to vector<8xf32>
    %294 = vector.shape_cast %293 : vector<8xf32> to vector<8x1xf32>
    %295 = vector.broadcast %294 : vector<8x1xf32> to vector<8x8xf32>
    %296 = arith.subf %292, %295 : vector<8x8xf32>
    %297 = math.exp %296 : vector<8x8xf32>
    %cst_125 = arith.constant dense<0.000000e+00> : vector<8xf32>
    %298 = vector.multi_reduction <add>, %297, %cst_125 [1] : vector<8x8xf32> to vector<8xf32>
    %299 = vector.shape_cast %298 : vector<8xf32> to vector<8x1xf32>
    %300 = tpu.reciprocal %299 {approx = true} : vector<8x1xf32> -> vector<8x1xf32>
    %301 = vector.broadcast %300 : vector<8x1xf32> to vector<8x8xf32>
    %302 = arith.mulf %297, %301 : vector<8x8xf32>
    %303 = arith.truncf %302 : vector<8x8xf32> to vector<8x8xbf16>
    %cst_126 = arith.constant dense<0.000000e+00> : vector<8x32xf32>
    %304 = tpu.matmul %303, %287, %cst_126 {dimension_numbers = #tpu.dot_dimension_numbers<[1], [0], [0], [1], [0, 0, 1, 1], [], []>} : vector<8x8xbf16>, vector<8x32xbf16>, vector<8x32xf32> -> vector<8x32xf32>
    %305 = arith.truncf %304 : vector<8x32xf32> to vector<8x32xbf16>
    %c1_127 = arith.constant 1 : index
    %c64_128 = arith.constant 64 : index
    %c0_129 = arith.constant 0 : index
    %306 = vector.load %arg8[%c1_127, %c64_128, %c0_129] : memref<2x128x128xbf16, #tpu.memory_space<vmem>>, vector<1x32x128xbf16>
    %307 = vector.shape_cast %306 : vector<1x32x128xbf16> to vector<32x128xbf16>
    %cst_130 = arith.constant dense<0.000000e+00> : vector<8x128xf32>
    %308 = tpu.matmul %305, %307, %cst_130 {dimension_numbers = #tpu.dot_dimension_numbers<[1], [0], [0], [1], [0, 0, 1, 1], [], []>} : vector<8x32xbf16>, vector<32x128xbf16>, vector<8x128xf32> -> vector<8x128xf32>
    %309 = arith.addf %284, %308 : vector<8x128xf32>
    %310 = vector.extract_strided_slice %233 {offsets = [0, 96], sizes = [8, 32], strides = [1, 1]} : vector<8x384xbf16> to vector<8x32xbf16>
    %311 = vector.extract_strided_slice %233 {offsets = [0, 224], sizes = [8, 32], strides = [1, 1]} : vector<8x384xbf16> to vector<8x32xbf16>
    %312 = vector.extract_strided_slice %233 {offsets = [0, 352], sizes = [8, 32], strides = [1, 1]} : vector<8x384xbf16> to vector<8x32xbf16>
    %cst_131 = arith.constant dense<0.000000e+00> : vector<8x8xf32>
    %313 = tpu.matmul %310, %311, %cst_131 {dimension_numbers = #tpu.dot_dimension_numbers<[1], [1], [0], [0], [0, 0, 1, 0], [], []>} : vector<8x32xbf16>, vector<8x32xbf16>, vector<8x8xf32> -> vector<8x8xf32>
    %cst_132 = arith.constant 0.176776692 : f32
    %314 = vector.broadcast %cst_132 : f32 to vector<8x8xf32>
    %315 = arith.mulf %313, %314 : vector<8x8xf32>
    %316 = vector.broadcast %1 : vector<1x8xf32> to vector<8x8xf32>
    %317 = arith.addf %315, %316 : vector<8x8xf32>
    %cst_133 = arith.constant dense<0xFF800000> : vector<8xf32>
    %318 = vector.multi_reduction <maximumf>, %317, %cst_133 [1] : vector<8x8xf32> to vector<8xf32>
    %319 = vector.shape_cast %318 : vector<8xf32> to vector<8x1xf32>
    %320 = vector.broadcast %319 : vector<8x1xf32> to vector<8x8xf32>
    %321 = arith.subf %317, %320 : vector<8x8xf32>
    %322 = math.exp %321 : vector<8x8xf32>
    %cst_134 = arith.constant dense<0.000000e+00> : vector<8xf32>
    %323 = vector.multi_reduction <add>, %322, %cst_134 [1] : vector<8x8xf32> to vector<8xf32>
    %324 = vector.shape_cast %323 : vector<8xf32> to vector<8x1xf32>
    %325 = tpu.reciprocal %324 {approx = true} : vector<8x1xf32> -> vector<8x1xf32>
    %326 = vector.broadcast %325 : vector<8x1xf32> to vector<8x8xf32>
    %327 = arith.mulf %322, %326 : vector<8x8xf32>
    %328 = arith.truncf %327 : vector<8x8xf32> to vector<8x8xbf16>
    %cst_135 = arith.constant dense<0.000000e+00> : vector<8x32xf32>
    %329 = tpu.matmul %328, %312, %cst_135 {dimension_numbers = #tpu.dot_dimension_numbers<[1], [0], [0], [1], [0, 0, 1, 1], [], []>} : vector<8x8xbf16>, vector<8x32xbf16>, vector<8x32xf32> -> vector<8x32xf32>
    %330 = arith.truncf %329 : vector<8x32xf32> to vector<8x32xbf16>
    %c1_136 = arith.constant 1 : index
    %c96_137 = arith.constant 96 : index
    %c0_138 = arith.constant 0 : index
    %331 = vector.load %arg8[%c1_136, %c96_137, %c0_138] : memref<2x128x128xbf16, #tpu.memory_space<vmem>>, vector<1x32x128xbf16>
    %332 = vector.shape_cast %331 : vector<1x32x128xbf16> to vector<32x128xbf16>
    %cst_139 = arith.constant dense<0.000000e+00> : vector<8x128xf32>
    %333 = tpu.matmul %330, %332, %cst_139 {dimension_numbers = #tpu.dot_dimension_numbers<[1], [0], [0], [1], [0, 0, 1, 1], [], []>} : vector<8x32xbf16>, vector<32x128xbf16>, vector<8x128xf32> -> vector<8x128xf32>
    %334 = arith.addf %309, %333 : vector<8x128xf32>
    %c1_140 = arith.constant 1 : index
    %c0_141 = arith.constant 0 : index
    %c0_142 = arith.constant 0 : index
    %335 = vector.load %arg9[%c1_140, %c0_141, %c0_142] : memref<2x1x128xf32, #tpu.memory_space<vmem>>, vector<1x1x128xf32>
    %336 = vector.shape_cast %335 : vector<1x1x128xf32> to vector<1x128xf32>
    %337 = vector.broadcast %336 : vector<1x128xf32> to vector<8x128xf32>
    %338 = arith.addf %334, %337 : vector<8x128xf32>
    %339 = arith.addf %224, %338 : vector<8x128xf32>
    %c1_143 = arith.constant 1 : index
    %c0_144 = arith.constant 0 : index
    %c0_145 = arith.constant 0 : index
    %340 = vector.load %arg10[%c1_143, %c0_144, %c0_145] : memref<2x1x128xf32, #tpu.memory_space<vmem>>, vector<1x1x128xf32>
    %341 = vector.shape_cast %340 : vector<1x1x128xf32> to vector<1x128xf32>
    %c1_146 = arith.constant 1 : index
    %c0_147 = arith.constant 0 : index
    %c0_148 = arith.constant 0 : index
    %342 = vector.load %arg11[%c1_146, %c0_147, %c0_148] : memref<2x1x128xf32, #tpu.memory_space<vmem>>, vector<1x1x128xf32>
    %343 = vector.shape_cast %342 : vector<1x1x128xf32> to vector<1x128xf32>
    %cst_149 = arith.constant dense<0.000000e+00> : vector<8xf32>
    %344 = vector.multi_reduction <add>, %339, %cst_149 [1] : vector<8x128xf32> to vector<8xf32>
    %345 = vector.shape_cast %344 : vector<8xf32> to vector<8x1xf32>
    %cst_150 = arith.constant 1.280000e+02 : f32
    %346 = vector.broadcast %cst_150 : f32 to vector<8x1xf32>
    %347 = arith.divf %345, %346 : vector<8x1xf32>
    %348 = vector.broadcast %347 : vector<8x1xf32> to vector<8x128xf32>
    %349 = arith.subf %339, %348 : vector<8x128xf32>
    %350 = arith.mulf %349, %349 : vector<8x128xf32>
    %cst_151 = arith.constant dense<0.000000e+00> : vector<8xf32>
    %351 = vector.multi_reduction <add>, %350, %cst_151 [1] : vector<8x128xf32> to vector<8xf32>
    %352 = vector.shape_cast %351 : vector<8xf32> to vector<8x1xf32>
    %cst_152 = arith.constant 1.280000e+02 : f32
    %353 = vector.broadcast %cst_152 : f32 to vector<8x1xf32>
    %354 = arith.divf %352, %353 : vector<8x1xf32>
    %355 = vector.broadcast %347 : vector<8x1xf32> to vector<8x128xf32>
    %356 = arith.subf %339, %355 : vector<8x128xf32>
    %cst_153 = arith.constant 9.99999996E-13 : f32
    %357 = vector.broadcast %cst_153 : f32 to vector<8x1xf32>
    %358 = arith.addf %354, %357 : vector<8x1xf32>
    %359 = math.rsqrt %358 : vector<8x1xf32>
    %360 = vector.broadcast %359 : vector<8x1xf32> to vector<8x128xf32>
    %361 = arith.mulf %356, %360 : vector<8x128xf32>
    %362 = vector.broadcast %341 : vector<1x128xf32> to vector<8x128xf32>
    %363 = arith.mulf %361, %362 : vector<8x128xf32>
    %364 = vector.broadcast %343 : vector<1x128xf32> to vector<8x128xf32>
    %365 = arith.addf %363, %364 : vector<8x128xf32>
    %366 = arith.truncf %365 : vector<8x128xf32> to vector<8x128xbf16>
    %c1_154 = arith.constant 1 : index
    %c0_155 = arith.constant 0 : index
    %c0_156 = arith.constant 0 : index
    %367 = vector.load %arg12[%c1_154, %c0_155, %c0_156] : memref<2x128x256xbf16, #tpu.memory_space<vmem>>, vector<1x128x256xbf16>
    %368 = vector.shape_cast %367 : vector<1x128x256xbf16> to vector<128x256xbf16>
    %cst_157 = arith.constant dense<0.000000e+00> : vector<8x256xf32>
    %369 = tpu.matmul %366, %368, %cst_157 {dimension_numbers = #tpu.dot_dimension_numbers<[1], [0], [0], [1], [0, 0, 1, 1], [], []>} : vector<8x128xbf16>, vector<128x256xbf16>, vector<8x256xf32> -> vector<8x256xf32>
    %c1_158 = arith.constant 1 : index
    %c0_159 = arith.constant 0 : index
    %c0_160 = arith.constant 0 : index
    %370 = vector.load %arg13[%c1_158, %c0_159, %c0_160] : memref<2x1x256xf32, #tpu.memory_space<vmem>>, vector<1x1x256xf32>
    %371 = vector.shape_cast %370 : vector<1x1x256xf32> to vector<1x256xf32>
    %372 = vector.broadcast %371 : vector<1x256xf32> to vector<8x256xf32>
    %373 = arith.addf %369, %372 : vector<8x256xf32>
    %cst_161 = arith.constant 5.000000e-01 : f32
    %374 = vector.broadcast %cst_161 : f32 to vector<8x256xf32>
    %375 = arith.mulf %374, %373 : vector<8x256xf32>
    %cst_162 = arith.constant 4.471500e-02 : f32
    %376 = vector.broadcast %cst_162 : f32 to vector<8x256xf32>
    %377 = arith.mulf %376, %373 : vector<8x256xf32>
    %378 = arith.mulf %377, %373 : vector<8x256xf32>
    %379 = arith.mulf %378, %373 : vector<8x256xf32>
    %380 = arith.addf %373, %379 : vector<8x256xf32>
    %cst_163 = arith.constant 0.797884583 : f32
    %381 = vector.broadcast %cst_163 : f32 to vector<8x256xf32>
    %382 = arith.mulf %381, %380 : vector<8x256xf32>
    %383 = math.tanh %382 : vector<8x256xf32>
    %cst_164 = arith.constant 1.000000e+00 : f32
    %384 = vector.broadcast %cst_164 : f32 to vector<8x256xf32>
    %385 = arith.addf %384, %383 : vector<8x256xf32>
    %386 = arith.mulf %375, %385 : vector<8x256xf32>
    %387 = arith.truncf %386 : vector<8x256xf32> to vector<8x256xbf16>
    %c1_165 = arith.constant 1 : index
    %c0_166 = arith.constant 0 : index
    %c0_167 = arith.constant 0 : index
    %388 = vector.load %arg14[%c1_165, %c0_166, %c0_167] : memref<2x256x128xbf16, #tpu.memory_space<vmem>>, vector<1x256x128xbf16>
    %389 = vector.shape_cast %388 : vector<1x256x128xbf16> to vector<256x128xbf16>
    %cst_168 = arith.constant dense<0.000000e+00> : vector<8x128xf32>
    %390 = tpu.matmul %387, %389, %cst_168 {dimension_numbers = #tpu.dot_dimension_numbers<[1], [0], [0], [1], [0, 0, 1, 1], [], []>} : vector<8x256xbf16>, vector<256x128xbf16>, vector<8x128xf32> -> vector<8x128xf32>
    %c1_169 = arith.constant 1 : index
    %c0_170 = arith.constant 0 : index
    %c0_171 = arith.constant 0 : index
    %391 = vector.load %arg15[%c1_169, %c0_170, %c0_171] : memref<2x1x128xf32, #tpu.memory_space<vmem>>, vector<1x1x128xf32>
    %392 = vector.shape_cast %391 : vector<1x1x128xf32> to vector<1x128xf32>
    %393 = vector.broadcast %392 : vector<1x128xf32> to vector<8x128xf32>
    %394 = arith.addf %390, %393 : vector<8x128xf32>
    %395 = arith.addf %365, %394 : vector<8x128xf32>
    %c1_172 = arith.constant 1 : index
    %c0_173 = arith.constant 0 : index
    %c0_174 = arith.constant 0 : index
    %396 = vector.load %arg16[%c1_172, %c0_173, %c0_174] : memref<2x1x128xf32, #tpu.memory_space<vmem>>, vector<1x1x128xf32>
    %397 = vector.shape_cast %396 : vector<1x1x128xf32> to vector<1x128xf32>
    %c1_175 = arith.constant 1 : index
    %c0_176 = arith.constant 0 : index
    %c0_177 = arith.constant 0 : index
    %398 = vector.load %arg17[%c1_175, %c0_176, %c0_177] : memref<2x1x128xf32, #tpu.memory_space<vmem>>, vector<1x1x128xf32>
    %399 = vector.shape_cast %398 : vector<1x1x128xf32> to vector<1x128xf32>
    %cst_178 = arith.constant dense<0.000000e+00> : vector<8xf32>
    %400 = vector.multi_reduction <add>, %395, %cst_178 [1] : vector<8x128xf32> to vector<8xf32>
    %401 = vector.shape_cast %400 : vector<8xf32> to vector<8x1xf32>
    %cst_179 = arith.constant 1.280000e+02 : f32
    %402 = vector.broadcast %cst_179 : f32 to vector<8x1xf32>
    %403 = arith.divf %401, %402 : vector<8x1xf32>
    %404 = vector.broadcast %403 : vector<8x1xf32> to vector<8x128xf32>
    %405 = arith.subf %395, %404 : vector<8x128xf32>
    %406 = arith.mulf %405, %405 : vector<8x128xf32>
    %cst_180 = arith.constant dense<0.000000e+00> : vector<8xf32>
    %407 = vector.multi_reduction <add>, %406, %cst_180 [1] : vector<8x128xf32> to vector<8xf32>
    %408 = vector.shape_cast %407 : vector<8xf32> to vector<8x1xf32>
    %cst_181 = arith.constant 1.280000e+02 : f32
    %409 = vector.broadcast %cst_181 : f32 to vector<8x1xf32>
    %410 = arith.divf %408, %409 : vector<8x1xf32>
    %411 = vector.broadcast %403 : vector<8x1xf32> to vector<8x128xf32>
    %412 = arith.subf %395, %411 : vector<8x128xf32>
    %cst_182 = arith.constant 9.99999996E-13 : f32
    %413 = vector.broadcast %cst_182 : f32 to vector<8x1xf32>
    %414 = arith.addf %410, %413 : vector<8x1xf32>
    %415 = math.rsqrt %414 : vector<8x1xf32>
    %416 = vector.broadcast %415 : vector<8x1xf32> to vector<8x128xf32>
    %417 = arith.mulf %412, %416 : vector<8x128xf32>
    %418 = vector.broadcast %397 : vector<1x128xf32> to vector<8x128xf32>
    %419 = arith.mulf %417, %418 : vector<8x128xf32>
    %420 = vector.broadcast %399 : vector<1x128xf32> to vector<8x128xf32>
    %421 = arith.addf %419, %420 : vector<8x128xf32>
    %422 = vector.extract_strided_slice %421 {offsets = [0, 0], sizes = [1, 128], strides = [1, 1]} : vector<8x128xf32> to vector<1x128xf32>
    %423 = arith.truncf %422 : vector<1x128xf32> to vector<1x128xbf16>
    %c0_183 = arith.constant 0 : index
    %c0_184 = arith.constant 0 : index
    %424 = vector.load %arg18[%c0_183, %c0_184] : memref<128x128xbf16, #tpu.memory_space<vmem>>, vector<128x128xbf16>
    %cst_185 = arith.constant dense<0.000000e+00> : vector<1x128xf32>
    %425 = tpu.matmul %423, %424, %cst_185 {dimension_numbers = #tpu.dot_dimension_numbers<[1], [0], [0], [1], [0, 0, 1, 1], [], []>} : vector<1x128xbf16>, vector<128x128xbf16>, vector<1x128xf32> -> vector<1x128xf32>
    %c0_186 = arith.constant 0 : index
    %c0_187 = arith.constant 0 : index
    %426 = vector.load %arg19[%c0_186, %c0_187] : memref<1x128xf32, #tpu.memory_space<vmem>>, vector<1x128xf32>
    %427 = arith.addf %425, %426 : vector<1x128xf32>
    %c0_188 = arith.constant 0 : index
    %c0_189 = arith.constant 0 : index
    %c0_190 = arith.constant 0 : index
    %428 = vector.load %arg20[%c0_188, %c0_189, %c0_190] : memref<1x1x128xf32, #tpu.memory_space<vmem>>, vector<1x1x128xf32>
    %429 = vector.shape_cast %428 : vector<1x1x128xf32> to vector<1x128xf32>
    %430 = vector.shape_cast %427 : vector<1x128xf32> to vector<1x1x128xf32>
    tpu.vector_store %arg20[%c0_188, %c0_189, %c0_190], %430 {strides = array<i32>} : memref<1x1x128xf32, #tpu.memory_space<vmem>>, vector<1x1x128xf32>,
    %431 = tpu.iota {dimensions = array<i32: 1>} : vector<1x128xi32>
    %c4_i32 = arith.constant 4 : i32
    %432 = vector.broadcast %c4_i32 : i32 to vector<1x128xi32>
    %433 = arith.cmpi slt, %431, %432 : vector<1x128xi32>
    %cst_191 = arith.constant -1.000000e+09 : f32
    %434 = vector.broadcast %cst_191 : f32 to vector<1x128xf32>
    %435 = arith.select %433, %427, %434 : vector<1x128xi1>, vector<1x128xf32>
    %cst_192 = arith.constant dense<0xFF800000> : vector<1xf32>
    %436 = vector.multi_reduction <maximumf>, %435, %cst_192 [1] : vector<1x128xf32> to vector<1xf32>
    %437 = vector.shape_cast %436 : vector<1xf32> to vector<1x1xf32>
    %438 = vector.broadcast %437 : vector<1x1xf32> to vector<1x128xf32>
    %439 = arith.subf %435, %438 : vector<1x128xf32>
    %440 = math.exp %439 : vector<1x128xf32>
    %cst_193 = arith.constant dense<0.000000e+00> : vector<1xf32>
    %441 = vector.multi_reduction <add>, %440, %cst_193 [1] : vector<1x128xf32> to vector<1xf32>
    %442 = vector.shape_cast %441 : vector<1xf32> to vector<1x1xf32>
    %443 = math.log %442 : vector<1x1xf32>
    %444 = arith.addf %437, %443 : vector<1x1xf32>
    %c0_194 = arith.constant 0 : index
    %c0_195 = arith.constant 0 : index
    %c0_196 = arith.constant 0 : index
    %445 = vector.load %arg3[%c0_194, %c0_195, %c0_196] : memref<1x1x128xf32, #tpu.memory_space<vmem>>, vector<1x1x128xf32>
    %446 = vector.shape_cast %445 : vector<1x1x128xf32> to vector<1x128xf32>
    %447 = vector.broadcast %444 : vector<1x1xf32> to vector<1x128xf32>
    %448 = arith.subf %447, %427 : vector<1x128xf32>
    %449 = arith.mulf %446, %448 : vector<1x128xf32>
    %cst_197 = arith.constant dense<0.000000e+00> : vector<1xf32>
    %450 = vector.multi_reduction <add>, %449, %cst_197 [1] : vector<1x128xf32> to vector<1xf32>
    %451 = vector.shape_cast %450 : vector<1xf32> to vector<1x1xf32>
    %452 = vector.shape_cast %451 : vector<1x1xf32> to vector<1x1xf32>
    %453 = vector.broadcast %452 : vector<1x1xf32> to vector<1x128xf32>
    %c0_198 = arith.constant 0 : index
    %c0_199 = arith.constant 0 : index
    %c0_200 = arith.constant 0 : index
    %454 = vector.load %arg21[%c0_198, %c0_199, %c0_200] : memref<1x1x128xf32, #tpu.memory_space<vmem>>, vector<1x1x128xf32>
    %455 = vector.shape_cast %454 : vector<1x1x128xf32> to vector<1x128xf32>
    %456 = vector.shape_cast %453 : vector<1x128xf32> to vector<1x1x128xf32>
    tpu.vector_store %arg21[%c0_198, %c0_199, %c0_200], %456 {strides = array<i32>} : memref<1x1x128xf32, #tpu.memory_space<vmem>>, vector<1x1x128xf32>,
    return
  }
  func.func @transform_0(%arg0: i32) -> (i32, i32, i32) {
    %c0_i32 = arith.constant 0 : i32
    %c0_i32_0 = arith.constant 0 : i32
    %c0_i32_1 = arith.constant 0 : i32
    return %arg0, %c0_i32, %c0_i32_0 : i32, i32, i32
  }
  func.func @transform_1(%arg0: i32) -> (i32, i32, i32) {
    %c0_i32 = arith.constant 0 : i32
    %c0_i32_0 = arith.constant 0 : i32
    %c0_i32_1 = arith.constant 0 : i32
    return %arg0, %c0_i32, %c0_i32_0 : i32, i32, i32
  }
  func.func @transform_2(%arg0: i32) -> (i32, i32, i32) {
    %c0_i32 = arith.constant 0 : i32
    %c0_i32_0 = arith.constant 0 : i32
    %c0_i32_1 = arith.constant 0 : i32
    return %arg0, %c0_i32, %c0_i32_0 : i32, i32, i32
  }
  func.func @transform_3(%arg0: i32) -> (i32, i32) {
    %c0_i32 = arith.constant 0 : i32
    %c0_i32_0 = arith.constant 0 : i32
    %c0_i32_1 = arith.constant 0 : i32
    return %c0_i32, %c0_i32_0 : i32, i32
  }
  func.func @transform_4(%arg0: i32) -> (i32, i32) {
    %c0_i32 = arith.constant 0 : i32
    %c0_i32_0 = arith.constant 0 : i32
    %c0_i32_1 = arith.constant 0 : i32
    return %c0_i32, %c0_i32_0 : i32, i32
  }
  func.func @transform_5(%arg0: i32) -> (i32, i32, i32) {
    %c0_i32 = arith.constant 0 : i32
    %c0_i32_0 = arith.constant 0 : i32
    %c0_i32_1 = arith.constant 0 : i32
    %c0_i32_2 = arith.constant 0 : i32
    return %c0_i32, %c0_i32_0, %c0_i32_1 : i32, i32, i32
  }
  func.func @transform_6(%arg0: i32) -> (i32, i32, i32) {
    %c0_i32 = arith.constant 0 : i32
    %c0_i32_0 = arith.constant 0 : i32
    %c0_i32_1 = arith.constant 0 : i32
    %c0_i32_2 = arith.constant 0 : i32
    return %c0_i32, %c0_i32_0, %c0_i32_1 : i32, i32, i32
  }
  func.func @transform_7(%arg0: i32) -> (i32, i32, i32) {
    %c0_i32 = arith.constant 0 : i32
    %c0_i32_0 = arith.constant 0 : i32
    %c0_i32_1 = arith.constant 0 : i32
    %c0_i32_2 = arith.constant 0 : i32
    return %c0_i32, %c0_i32_0, %c0_i32_1 : i32, i32, i32
  }
  func.func @transform_8(%arg0: i32) -> (i32, i32, i32) {
    %c0_i32 = arith.constant 0 : i32
    %c0_i32_0 = arith.constant 0 : i32
    %c0_i32_1 = arith.constant 0 : i32
    %c0_i32_2 = arith.constant 0 : i32
    return %c0_i32, %c0_i32_0, %c0_i32_1 : i32, i32, i32
  }
  func.func @transform_9(%arg0: i32) -> (i32, i32, i32) {
    %c0_i32 = arith.constant 0 : i32
    %c0_i32_0 = arith.constant 0 : i32
    %c0_i32_1 = arith.constant 0 : i32
    %c0_i32_2 = arith.constant 0 : i32
    return %c0_i32, %c0_i32_0, %c0_i32_1 : i32, i32, i32
  }
  func.func @transform_10(%arg0: i32) -> (i32, i32, i32) {
    %c0_i32 = arith.constant 0 : i32
    %c0_i32_0 = arith.constant 0 : i32
    %c0_i32_1 = arith.constant 0 : i32
    %c0_i32_2 = arith.constant 0 : i32
    return %c0_i32, %c0_i32_0, %c0_i32_1 : i32, i32, i32
  }
  func.func @transform_11(%arg0: i32) -> (i32, i32, i32) {
    %c0_i32 = arith.constant 0 : i32
    %c0_i32_0 = arith.constant 0 : i32
    %c0_i32_1 = arith.constant 0 : i32
    %c0_i32_2 = arith.constant 0 : i32
    return %c0_i32, %c0_i32_0, %c0_i32_1 : i32, i32, i32
  }
  func.func @transform_12(%arg0: i32) -> (i32, i32, i32) {
    %c0_i32 = arith.constant 0 : i32
    %c0_i32_0 = arith.constant 0 : i32
    %c0_i32_1 = arith.constant 0 : i32
    %c0_i32_2 = arith.constant 0 : i32
    return %c0_i32, %c0_i32_0, %c0_i32_1 : i32, i32, i32
  }
  func.func @transform_13(%arg0: i32) -> (i32, i32, i32) {
    %c0_i32 = arith.constant 0 : i32
    %c0_i32_0 = arith.constant 0 : i32
    %c0_i32_1 = arith.constant 0 : i32
    %c0_i32_2 = arith.constant 0 : i32
    return %c0_i32, %c0_i32_0, %c0_i32_1 : i32, i32, i32
  }
  func.func @transform_14(%arg0: i32) -> (i32, i32, i32) {
    %c0_i32 = arith.constant 0 : i32
    %c0_i32_0 = arith.constant 0 : i32
    %c0_i32_1 = arith.constant 0 : i32
    %c0_i32_2 = arith.constant 0 : i32
    return %c0_i32, %c0_i32_0, %c0_i32_1 : i32, i32, i32
  }
  func.func @transform_15(%arg0: i32) -> (i32, i32, i32) {
    %c0_i32 = arith.constant 0 : i32
    %c0_i32_0 = arith.constant 0 : i32
    %c0_i32_1 = arith.constant 0 : i32
    %c0_i32_2 = arith.constant 0 : i32
    return %c0_i32, %c0_i32_0, %c0_i32_1 : i32, i32, i32
  }
  func.func @transform_16(%arg0: i32) -> (i32, i32, i32) {
    %c0_i32 = arith.constant 0 : i32
    %c0_i32_0 = arith.constant 0 : i32
    %c0_i32_1 = arith.constant 0 : i32
    %c0_i32_2 = arith.constant 0 : i32
    return %c0_i32, %c0_i32_0, %c0_i32_1 : i32, i32, i32
  }
  func.func @transform_17(%arg0: i32) -> (i32, i32) {
    %c0_i32 = arith.constant 0 : i32
    %c0_i32_0 = arith.constant 0 : i32
    %c0_i32_1 = arith.constant 0 : i32
    return %c0_i32, %c0_i32_0 : i32, i32
  }
  func.func @transform_18(%arg0: i32) -> (i32, i32) {
    %c0_i32 = arith.constant 0 : i32
    %c0_i32_0 = arith.constant 0 : i32
    %c0_i32_1 = arith.constant 0 : i32
    return %c0_i32, %c0_i32_0 : i32, i32
  }
  func.func @transform_19(%arg0: i32) -> (i32, i32, i32) {
    %c0_i32 = arith.constant 0 : i32
    %c0_i32_0 = arith.constant 0 : i32
    %c0_i32_1 = arith.constant 0 : i32
    return %arg0, %c0_i32, %c0_i32_0 : i32, i32, i32
  }
  func.func @transform_20(%arg0: i32) -> (i32, i32, i32) {
    %c0_i32 = arith.constant 0 : i32
    %c0_i32_0 = arith.constant 0 : i32
    %c0_i32_1 = arith.constant 0 : i32
    return %arg0, %c0_i32, %c0_i32_0 : i32, i32, i32
  }
}

</mosaic_0001>

<bundles_post_ra>
// kernel: forward.1
= control target key start
LH: loop header
LB: loop body
LE: loop exit
PB: predicated region body
PF: predicated region fallthrough
CT: control target
= control target key end

     0   :  { %s5598_s0 = inlined_call_operand.vmem [shape: f32[2,8,128], index: 0, kind: input, shape index: {}]   ;;  %s5599_s1 = inlined_call_operand.vmem [shape: f32[2,1,8], index: 1, kind: input, shape index: {}]   ;;  %s5600_s2 = inlined_call_operand.vmem [shape: f32[2,1,128], index: 2, kind: input, shape index: {}]   ;;  %s5601_s3 = inlined_call_operand.vmem [shape: f32[1,128], index: 3, kind: input, shape index: {}]   ;;  %s5602_s4 = inlined_call_operand.vmem [shape: f32[1,128], index: 4, kind: input, shape index: {}]   ;;  %s5603_s5 = inlined_call_operand.hbm [shape: bf16[2,128,384], index: 5, kind: input, shape index: {}]   ;;  %s5604_s6 = inlined_call_operand.vmem [shape: f32[2,1,384], index: 6, kind: input, shape index: {}]   ;;  %s5605_s7 = inlined_call_operand.vmem [shape: bf16[2,128,128], index: 7, kind: input, shape index: {}]   ;;  %s5606_s8 = inlined_call_operand.vmem [shape: f32[2,1,128], index: 8, kind: input, shape index: {}]   ;;  %s5607_s9 = inlined_call_operand.vmem [shape: f32[2,1,128], index: 9, kind: input, shape index: {}]   ;;  %s5608_s10 = inlined_call_operand.vmem [shape: f32[2,1,128], index: 10, kind: input, shape index: {}]   ;;  %s5609_s11 = inlined_call_operand.vmem [shape: bf16[2,128,256], index: 11, kind: input, shape index: {}]   ;;  %s5610_s12 = inlined_call_operand.vmem [shape: f32[2,1,256], index: 12, kind: input, shape index: {}]   ;;  %s5611_s13 = inlined_call_operand.hbm [shape: bf16[2,256,128], index: 13, kind: input, shape index: {}]   ;;  %s5612_s14 = inlined_call_operand.vmem [shape: f32[2,1,128], index: 14, kind: input, shape index: {}]   ;;  %s5613_s15 = inlined_call_operand.vmem [shape: f32[2,1,128], index: 15, kind: input, shape index: {}]   ;;  %s5614_s16 = inlined_call_operand.vmem [shape: f32[2,1,128], index: 16, kind: input, shape index: {}]   ;;  %s5615_s17 = inlined_call_operand.hbm [shape: bf16[128,128], index: 17, kind: input, shape index: {}]   ;;  %s5616_s18 = inlined_call_operand.vmem [shape: f32[1,128], index: 18, kind: input, shape index: {}]   ;;  %s5617_s19 = inlined_call_operand.hbm [shape: f32[2,1,128], index: 19, kind: output, shape index: {0}]   ;;  %s5618_s20 = inlined_call_operand.vmem [shape: f32[2,1,128], index: 20, kind: output, shape index: {1}]  }
   0x1   :  { %5633 = sst [smem:[#allocation19_spill]] %s5598_s0 }
   0x2   :  { %5634 = sst [smem:[#allocation20_spill]] %s5599_s1 }
   0x3   :  { %5635 = sst [smem:[#allocation21_spill]] %s5600_s2 }
   0x4   :  { %5636 = sst [smem:[#allocation22_spill]] %s5601_s3 }
   0x5   :  { %5637 = sst [smem:[#allocation23_spill]] %s5602_s4 }
   0x6   :  { %5638 = sst [smem:[#allocation24_spill]] %s5611_s13 }
   0x7   :  { %5639 = sst [smem:[#allocation25_spill]] %s5616_s18 }
   0x8   :  { %5640 = sst [smem:[#allocation26_spill]] %s5617_s19 }
   0x9   :  { %5641 = sst [smem:[#allocation27_spill]] %s5618_s20 }
   0xa   :  { %26 = vsyncpa [#allocation3], 0 }
   0xb   :  { %27 = vsyncpa [#allocation6], 0 }
   0xc   :  { %28 = vsyncpa [#allocation4], 0 }
   0xd   :  { %30 = vsyncpa [#allocation4 + $0x1], 0  ;;  %s4900_s1 = smov 0   ;;  %s4902_s22 = smov 0  }
   0xe   :  { %s4904_s23 = smov 0   ;;  %s4906_s24 = smov 0  }
   0xf LB: > { %5642 = sst [smem:[#allocation12_spill]] %s4767_s1  ;;  %s4921_s2 = sadd.s32 4294967295, %s4779_s24   ;;  %s4779_s24 = sphi %s4906_s24, %s5676_s24   ;;  %s4775_s23 = sphi %s4904_s23, %s5678_s23   ;;  %s4771_s22 = sphi %s4902_s22, %s5680_s22   ;;  %s4767_s1 = sphi %s4900_s1, %s5679_s1  }
  0x10   : > { %5643 = sst [smem:[#allocation13_spill]] %s4775_s23  ;;  %s3746_s25 = sadd.s32 4294967294, %s4779_s24  }
  0x11   : > { %5644 = sst [smem:[#allocation14_spill]] %s4779_s24  ;;  %s4925_s3 = sadd.s32 1, %s4779_s24  }
  0x12   : > { %5645 = sst [smem:[#allocation15_spill]] %s4925_s3  ;;  %s457_s26 = sadd.s32 1, %s4775_s23 }
  0x13   : > { %s454_s27 = ssub.s32 %s4779_s24, %s4925_s3  ;;  %p467_p0 = scmp.ne.s32.totalorder %s4775_s23, %s4771_s22 }
  0x14   : > { %p455_p1 = scmp.eq.s32.totalorder %s454_s27, 0  ;;  %p468_p2 = scmp.eq.s32.totalorder %s4921_s2, 1 }
  0x15   : > { %p473_p3 = scmp.ne.s32.totalorder %s4771_s22, %s4767_s1  ;;  %p474_p4 = scmp.eq.s32.totalorder %s3746_s25, 1 }
  0x16   : > { %s4936_s28 = scalar_select %p455_p1, %s4775_s23, %s457_s26  }
  0x17   : > { %p4938_p5 = por %p468_p2, %p467_p0  ;;  %p4942_p6 = por %p474_p4, %p473_p3 }
  0x18   : > { %5646 = sst [smem:[#allocation16_spill]] %s4936_s28  ;;  %p3747_p7 = scmp.ge.s32.totalorder %s4779_s24, 1 }
  0x19   : > { %s5647_s4 = scalar_select %p4938_p5, 1, 0 }
  0x1a   : > { %s5649_s29 = scalar_select %p4942_p6, 1, 0 }
  0x1b   : > { %5648 = sst [smem:[#allocation17_spill]] %s5647_s4  ;;  %p507_p8 = scmp.lt.s32.totalorder %s4779_s24, 3 }
  0x1c   : > { %5650 = sst [smem:[#allocation18_spill]] %s5649_s29  ;;  %p5625_p9 = scmp.eq.s32.totalorder %s4921_s2, 0 }
  0x1d   : > { %p4949_p10 = pnand %p3747_p7, %p507_p8  ;;  %s4781_s0 = smov [#allocation5]  }
  0x1e   : > { %s559_s21 = sshll.u32 %s4781_s0, 4  ;;  %s4782_s26 = smov [#allocation2]   ;;  %s560_s21 = int_to_ptr.vmem [resolvable:$true] %s559_s21 }
  0x1f   : > { %s5651_s30 = scalar_select %p4949_p10, 1, 0 }
  0x20   : > { %p4336_p11 = pneg %p4949_p10  ;;  %s525_s27 = sshll.u32 %s4782_s26, 4  ;;  %s4961_s27 = int_to_ptr.vmem [resolvable:$true] %s525_s27 }
  0x21   : > { %s5653_s13 = sld [smem:[#allocation24_spill]] }
  0x22   : > { %p4957_p12 = pnand %p5625_p9, %p4336_p11 }
  0x24   : > { %p4971_p0 = pneg %p4957_p12 }
  0x27   : > { %s4625_s3 = scalar_lea.hbm %s5653_s13, 4096 }
  0x28   : > { %p4626_p13 = scmp.ne.s32.totalorder %s5653_s13, %s4625_s3  ;;  %p4632_p3 = scmp.lt.u32.totalorder %s4625_s3, %s5653_s13 }
  0x2a   : > { %p4628_p1 = pnand %p4971_p0, %p4626_p13 }
  0x2c   : > { %p4629_p2 = pneg %p4628_p1 }
  0x2e   : > { %p4634_p4 = pnand %p4632_p3, %p4629_p2 }
  0x30   : > { %4637 = shalt.err (!%p4634_p4)
}
  0x31   : > { %s4638_s23 = scalar_lea.vmem %s560_s21, 4096  ;;  %p4646_p9 = scmp.lt.s32.totalorder %s560_s21, %s560_s21 }
  0x32   : > { %p4639_p7 = scmp.ne.s32.totalorder %s560_s21, %s4638_s23  ;;  %p4647_p6 = scmp.lt.s32.totalorder %s4638_s23, %s4638_s23 }
  0x34   : > { %p4641_p8 = pnand %p4639_p7, %p4971_p0  ;;  %p4648_p5 = por %p4647_p6, %p4646_p9 }
  0x36   : > { %p4642_p11 = pneg %p4641_p8 }
  0x38   : > { %p4649_p10 = pnand %p4648_p5, %p4642_p11 }
  0x3a   : > { %4652 = shalt.err (!%p4649_p10)
}
  0x3b   : > { %s5631_s1 = smov 64   ;;  %s5632_s28 = smov 4  }
  0x3c   : > { %4342 = dma.hbm_to_vmem [thread:$0]  (!%p4957_p12), %s5653_s13, 4096, %s560_s21, [#allocation6], %s5631_s1, %s5631_s1, %s5632_s28  }
  0x3d   : > { %s4653_s20 = scalar_lea.hbm %s5603_s5, 6144 }
  0x3e   : > { %p4654_p5 = scmp.ne.s32.totalorder %s5603_s5, %s4653_s20  ;;  %p4660_p10 = scmp.lt.u32.totalorder %s4653_s20, %s5603_s5 }
  0x40   : > { %p4656_p6 = pnand %p4654_p5, %p4971_p0 }
  0x42   : > { %p4657_p9 = pneg %p4656_p6 }
  0x44   : > { %p4662_p13 = pnand %p4660_p10, %p4657_p9 }
  0x46   : > { %4665 = shalt.err (!%p4662_p13)
}
  0x47   : > { %s4666_s21 = scalar_lea.vmem %s4961_s27, 6144  ;;  %p4674_p4 = scmp.lt.s32.totalorder %s4961_s27, %s4961_s27 }
  0x48   : > { %p4667_p1 = scmp.ne.s32.totalorder %s4961_s27, %s4666_s21  ;;  %p4675_p7 = scmp.lt.s32.totalorder %s4666_s21, %s4666_s21 }
  0x4a   : > { %p4669_p2 = pnand %p4667_p1, %p4971_p0  ;;  %p4676_p8 = por %p4675_p7, %p4674_p4 }
  0x4c   : > { %p4670_p3 = pneg %p4669_p2 }
  0x4e   : > { %p4677_p11 = pnand %p4676_p8, %p4670_p3 }
  0x50   : > { %4680 = shalt.err (!%p4677_p11)
}
  0x51   : > { %s4785_s19 = smov 192   ;;  %s4786_s18 = smov 12  }
  0x52   : > { %4339 = dma.hbm_to_vmem [thread:$0]  (!%p4957_p12), %s5603_s5, 6144, %s4961_s27, [#allocation3], %s4785_s19, %s4785_s19, %s4786_s18  }
  0x53   : > { %s4787_s24 = smov [#allocation7]   ;;  %s4681_s23 = scalar_lea.hbm %s5615_s17, 1024 }
  0x54   : > { %s581_s3 = sshll.u32 %s4787_s24, 4  ;;  %p4682_p5 = scmp.ne.s32.totalorder %s5615_s17, %s4681_s23  ;;  %s582_s3 = int_to_ptr.vmem [resolvable:$true] %s581_s3 }
  0x55   : > { %p4688_p10 = scmp.lt.u32.totalorder %s4681_s23, %s5615_s17 }
  0x56   : > { %p4684_p6 = pnand %p4682_p5, %p4971_p0 }
  0x58   : > { %p4685_p9 = pneg %p4684_p6 }
  0x5a   : > { %p4690_p13 = pnand %p4688_p10, %p4685_p9 }
  0x5c   : > { %4693 = shalt.err (!%p4690_p13)
}
  0x5d   : > { %s4694_s27 = scalar_lea.vmem %s582_s3, 1024  ;;  %p4702_p4 = scmp.lt.s32.totalorder %s582_s3, %s582_s3 }
  0x5e   : > { %p4695_p1 = scmp.ne.s32.totalorder %s582_s3, %s4694_s27  ;;  %p4703_p7 = scmp.lt.s32.totalorder %s4694_s27, %s4694_s27 }
  0x60   : > { %p4697_p2 = pnand %p4695_p1, %p4971_p0  ;;  %p4704_p8 = por %p4703_p7, %p4702_p4 }
  0x62   : > { %p4698_p3 = pneg %p4697_p2 }
  0x64   : > { %p4705_p11 = pnand %p4704_p8, %p4698_p3 }
  0x66   : > { %4708 = shalt.err (!%p4705_p11)
}
  0x67   : > { %s5655_s1 = smov 4   ;;  %s5656_s19 = smov 64  }
  0x68   : > { %4345 = dma.hbm_to_vmem [thread:$0]  (!%p4957_p12), %s5615_s17, 1024, %s582_s3, [#allocation6], %s5656_s19, %s5656_s19, %s5655_s1  }
  0x69   : > { %p5657_p5 = scmp.ne.s32.totalorder %s5651_s30, 0 }
  0x6a   : > { %p5658_p0 = scmp.eq.s32.totalorder (!%p5657_p5), %s4921_s2, 0 }
  0x6b   : > { %619 = sbr.rel (%p5657_p5) target bundleno = 8915 (0x22d3), region = 96 }
  0x72   : > { %4754 = dma.done.wait (%p5658_p0), [#allocation3], 6144   ;;  %p5659_p6 = pmov %p5658_p0 }
  0x73   : > { %p5660_p9 = pmov %p5658_p0 }
  0x74   : > { %4756 = vsyncadd (%p5659_p6), [#allocation3], 4294961152 }
  0x75   : > { %4758 = dma.done.wait (%p5660_p9), [#allocation6], 5120   ;;  %p5661_p10 = pmov %p5658_p0 }
  0x76   : > { %p692_p13 = scmp.lt.s32.totalorder %s4921_s2, 1  ;;  %s5662_s20 = sld [smem:[#allocation19_spill]]  ;;  %v4402_v1 = vld [vmem:[#allocation2 + $0x4] ss:$12 sps:$4 sm:$0xff]   ;;  %v4404_v2 = vld [vmem:[#allocation2] ss:$12 sps:$4 sm:$0xff]   ;;  %v771_v41 = vlaneseq }
  0x77   : > { %4760 = vsyncadd (%p5661_p10), [#allocation6], 4294962176  ;;  %v4788_v3 = vmov 0.0   ;;  %v4405_v4 = vld [vmem:[#allocation2 + $0x8] ss:$12 sps:$4 sm:$0xff]   ;;  %914 = vmatprep.subr.bf16.mxu0 %v4402_v1  ;;  %v4789_v25 = vmov 0  }
  0x78   : > { %s5046_s25 = scalar_select %p692_p13, %s4921_s2, 1  ;;  %4102 = vmatprep.subr.bf16.mxu1 %v4788_v3  ;;  %v4406_v5 = vld [vmem:[#allocation2 + $0x1c] ss:$12 sps:$4 sm:$0xff]   ;;  %v4408_v6 = vld [vmem:[#allocation2 + $0x18] ss:$12 sps:$4 sm:$0xff]   ;;  %915 = vmatpush1.bf16.msra.mxu0 %v4404_v2  ;;  %vm4790_vm0 = vmmov 0  }
  0x79   : > { %v4409_v7 = vld [vmem:[#allocation2 + $0x20] ss:$12 sps:$4 sm:$0xff]   ;;  %4103 = vmatpush3.bf16.msra.mxu1 %v4405_v4  ;;  %916 = vmatprep.subr.bf16.mxu0 %v4406_v5  ;;  %v4412_v13 = vld [vmem:[#allocation2 + $0x30] ss:$12 sps:$4 sm:$0xff]   ;;  %v4413_v14 = vld [vmem:[#allocation2 + $0x38] ss:$12 sps:$4 sm:$0xff]  }
  0x7a   : > { %s3756_s30 = sshll.u32 %s5046_s25, 3  ;;  %v4410_v8 = vld [vmem:[#allocation2 + $0x34] ss:$12 sps:$4 sm:$0xff]   ;;  %4104 = vmatprep.subr.bf16.mxu1 %v4788_v3  ;;  %v4414_v15 = vld [vmem:[#allocation2 + $0x4c] ss:$12 sps:$4 sm:$0xff]   ;;  %946 = vmatprep.mubr.bf16.mxu0 %v4789_v25  ;;  %s5663_s29 = sld [smem:[#allocation22_spill]] }
  0x7b   : > { %v4416_v16 = vld [vmem:[#allocation2 + $0x48] ss:$12 sps:$4 sm:$0xff]   ;;  %v4417_v17 = vld [vmem:[#allocation2 + $0x50] ss:$12 sps:$4 sm:$0xff]   ;;  %v4420_v19 = vld [vmem:[#allocation2 + $0x60] ss:$12 sps:$4 sm:$0xff]   ;;  %4118 = vmatprep.mubr.msk.bf16.mxu1 %vm4790_vm0, %v4788_v3 }
  0x7c   : > { %s695_s4 = scalar_lea.vmem %s5662_s20, %s3756_s30  ;;  %917 = vmatpush1.bf16.msra.mxu0 %v4408_v6  ;;  %v4418_v18 = vld [vmem:[#allocation2 + $0x64] ss:$12 sps:$4 sm:$0xff]   ;;  %v4421_v20 = vld [vmem:[#allocation2 + $0x68] ss:$12 sps:$4 sm:$0xff]   ;;  %v4425_v23 = vld [vmem:[#allocation2 + $0x80] ss:$12 sps:$4 sm:$0xff]  }
  0x7d   : > { %v707_v0 = vld [vmem:[%s695_s4] sm:$0xff]  ;;  %4105 = vmatpush3.bf16.msra.mxu1 %v4409_v7  ;;  %918 = vmatprep.subr.bf16.mxu0 %v4410_v8  ;;  %v4422_v21 = vld [vmem:[#allocation2 + $0x7c] ss:$12 sps:$4 sm:$0xff]   ;;  %v4430_v28 = vld [vmem:[#allocation2 + $0xac] ss:$12 sps:$4 sm:$0xff]   ;;  %s5664_s21 = sld [smem:[#allocation23_spill]] }
  0x7e   : > { %710 = vadd.xlane.f32.xlu0 %v707_v0  ;;  %4106 = vmatprep.subr.bf16.mxu1 %v4788_v3  ;;  %v4424_v22 = vld [vmem:[#allocation2 + $0x78] ss:$12 sps:$4 sm:$0xff]   ;;  %v4426_v24 = vld [vmem:[#allocation2 + $0x94] ss:$12 sps:$4 sm:$0xff]   ;;  %v4428_v26 = vld [vmem:[#allocation2 + $0x90] ss:$12 sps:$4 sm:$0xff]  }
  0x7f   : > { %v4429_v27 = vld [vmem:[#allocation2 + $0x98] ss:$12 sps:$4 sm:$0xff]   ;;  %v4432_v29 = vld [vmem:[#allocation2 + $0xa8] ss:$12 sps:$4 sm:$0xff]   ;;  %v4433_v30 = vld [vmem:[#allocation2 + $0xb0] ss:$12 sps:$4 sm:$0xff]  }
  0x80   : > { %919 = vmatpush1.bf16.msra.mxu0 %v4412_v13  ;;  %v3757_v35 = vld [vmem:[%s5663_s29] ss:$0 sm:$0xff]  ;;  %v5080_v42 = vshrl.u32 %v771_v41, 7  ;;  %vm998_vm1 = vcmask 261120   ;;  %s4791_s19 = smov 96   ;;  %vm1069_vm2 = vcmask 1043456  }
  0x81   : > { %4107 = vmatpush3.bf16.msra.mxu1 %v4413_v14  ;;  %920 = vmatprep.subr.bf16.mxu0 %v4414_v15  ;;  %v769_v44 = vld [vmem:[%s5604_s6] sm:$0x7]  ;;  %s5665_s30 = sld [smem:[#allocation20_spill]]  ;;  %vm1053_vm3 = vcmask 64512   ;;  %s4792_s18 = smov 64   ;;  %vm3584_vm5 = vcmask 1040384  }
  0x82   : > { %4108 = vmatprep.subr.bf16.mxu1 %v4788_v3  ;;  %v5083_v43 = vsub.s32 1, %v5080_v42  ;;  %v781_v45 = vsub.s32 2, %v5080_v42  ;;  %v5091_v47 = vsub.s32 0, %v5080_v42  ;;  %s4793_s27 = smov 32   ;;  %s5666_s26 = sld [smem:[#allocation25_spill]] }
  0x83   : > { %v3758_v37 = vld [vmem:[%s5664_s21] ss:$0 sm:$0xff]  ;;  %s5668_s13 = sld [smem:[#allocation21_spill]]  ;;  %s5669_s4 = sld [smem:[#allocation26_spill]] }
  0x84   : > { %921 = vmatpush1.bf16.msra.mxu0 %v4416_v16  ;;  %v778_v46 = vrot.slane %v769_v44, %v5083_v43  ;;  %v782_v52 = vrot.slane %v769_v44, %v781_v45  ;;  %v774_v58 = vrot.slane %v769_v44, %v5091_v47  ;;  %v4436_v44 = vld [vmem:[%s5605_s7 + $0x10] sm:$0xff]  }
  0x85   : > { %4109 = vmatpush3.bf16.msra.mxu1 %v4417_v17  ;;  %922 = vmatprep.subr.bf16.mxu0 %v4418_v18 }
  0x86   : > { %4110 = vmatprep.subr.bf16.mxu1 %v4788_v3 }
  0x87   : > { %s5118_s0 = scalar_lea.vmem %s5665_s30, %s5046_s25 }
  0x88   : > { %923 = vmatpush1.bf16.msra.mxu0 %v4420_v19  ;;  %v5121_v4 = vld [vmem:[%s5118_s0] ss:$0 sm:$0xff] }
  0x89   : > { %4111 = vmatpush3.bf16.msra.mxu1 %v4421_v20  ;;  %924 = vmatprep.subr.bf16.mxu0 %v4422_v21  ;;  %s701_s28 = scalar_lea.vmem %s5668_s13, %s5046_s25 }
  0x8a   : > { %4112 = vmatprep.subr.bf16.mxu1 %v4788_v3 }
  0x8c   : > { %925 = vmatpush1.bf16.msra.mxu0 %v4424_v22 }
  0x8d   : > { %4113 = vmatpush3.bf16.msra.mxu1 %v4425_v23  ;;  %926 = vmatprep.subr.bf16.mxu0 %v4426_v24 }
  0x8e   : > { %4114 = vmatprep.subr.bf16.mxu1 %v4788_v3 }
  0x90   : > { %927 = vmatpush1.bf16.msra.mxu0 %v4428_v26 }
  0x91   : > { %4115 = vmatpush3.bf16.msra.mxu1 %v4429_v27  ;;  %928 = vmatprep.subr.bf16.mxu0 %v4430_v28 }
  0x92   : > { %4116 = vmatprep.subr.bf16.mxu1 %v4788_v3 }
  0x94   : > { %929 = vmatpush1.bf16.msra.mxu0 %v4432_v29 }
  0x95   : > { %4117 = vmatpush3.bf16.msra.mxu1 %v4433_v30  ;;  %4146 = vmatprep.subr.bf16.mxu0 %v4788_v3 }
  0x96   : > { %4122 = vmatprep.subr.bf16.mxu1 %v4788_v3 }
 0x10b   : > { %v711_v9 = vpop.xlane.xlu0 %710 }
 0x10c   : > { %v713_v10 = vmul.f32 0.0078125, %v711_v9 }
 0x10e   : > { %v714_v11 = vsub.f32 %v707_v0, %v713_v10 }
 0x110   : > { %v715_v12 = vmul.f32 %v714_v11, %v714_v11 }
 0x112   : > { %716 = vadd.xlane.f32.xlu0 %v715_v12 }
 0x19f   : > { %v717_v31 = vpop.xlane.xlu0 %716 }
 0x1a0   : > { %v718_v32 = vmul.f32 0.0078125, %v717_v31 }
 0x1a2   : > { %v719_v33 = vadd.f32 1e-12, %v718_v32 }
 0x1a4   : > { %4570 = vrsqrt.f32 %v719_v33 }
 0x1ae   : > { %v4571_v34 = vpop.eup %4570 }
 0x1af   : > { %v721_v36 = vmul.f32 %v4571_v34, %v714_v11 }
 0x1b1   : > { %v728_v38 = vmul.f32 %v3757_v35, %v721_v36 }
 0x1b3   : > { %v5071_v39 = vadd.f32 %v3758_v37, %v728_v38 }
 0x1b5   : > { %v736_v40 = vpack.c.bf16 %v5071_v39, %v5071_v39 }
 0x1b7   : > { %947 = vmatmul.mubr.bf16.vlgmr.msra.gmra.mrb[0].mxu0 %v736_v40  ;;  %4119 = vmatmul.mubr.bf16.vlgmr.msra.gmra.mrb[0].mxu1 %v736_v40 }
 0x1b8   : > { %4124 = vmatprep.mubr.msk.bf16.mxu1 %vm4790_vm0, %v4788_v3  ;;  %4150 = vmatprep.mubr.msk.bf16.mxu0 %vm4790_vm0, %v4788_v3 }
 0x1b9   : > { %4147 = vmatpush3.bf16.msra.mxu0 %v4436_v44 }
 0x1ba   : > { %4148 = vmatprep.subr.bf16.mxu0 %v4788_v3 }
 0x28a   : > { %v948_v48 = vpop.f32.mrb[0].mxu0  ;;  %v989_v49 = vpop.f32.mrb[0].mxu1 }
 0x28b   : > { %v950_v50 = vpop.f32.mrb[1].mxu0  ;;  %v4120_v51 = vpop.f32.mrb[1].mxu1  ;;  %v990_v60 = vadd.f32 %v989_v49, %v782_v52  ;;  %v949_v62 = vadd.f32 %v948_v48, %v774_v58 }
 0x28c   : > { %v951_v53 = vadd.f32 %v950_v50, %v778_v46  ;;  %v952_v54 = vpop.f32.mrb[2].mxu0  ;;  %v992_v55 = vpop.f32.mrb[2].mxu1  ;;  %v4437_v46 = vld [vmem:[%s5605_s7 + $0x18] sm:$0xff]  }
 0x28d   : > { %v953_v56 = vpop.f32.mrb[3].mxu0  ;;  %v4121_v57 = vpop.f32.mrb[3].mxu1  ;;  %v5103_v63 = vpack.c.bf16 %v990_v60, %v990_v60  ;;  %v5105_v0 = vpack.c.bf16 %v949_v62, %v949_v62  ;;  %4149 = vmatpush3.bf16.msra.mxu0 %v4437_v46  ;;  %v4435_v55 = vld [vmem:[%s5605_s7 + $0x8] sm:$0xff]  }
 0x28e   : > { %v5096_v59 = vpack.c.bf16 %v951_v53, %v951_v53  ;;  %4162 = vmatprep.subr.bf16.mxu0 %v4788_v3  ;;  %v4434_v53 = vld [vmem:[%s5605_s7] sm:$0xff]  }
 0x28f   : > { %v1071_v1 = vsel %vm1069_vm2, %v5103_v63, 0 }
 0x290   : > { %1122 = vrot.lane.b32.xlu0 %v5096_v59, %s4791_s19  ;;  %v1003_v61 = vsel %vm998_vm1, %v5096_v59, 0 }
 0x291   : > { %4123 = vmatpush3.bf16.xpose.msra.mxu1 %v1003_v61 }
 0x292   : > { %4128 = vmatprep.subr.bf16.mxu1 %v4788_v3 }
 0x298   : > { %4125 = vmatmul.mubr.msk.bf16.vlgmr.msra.gmra.mrb[4].mxu1 %vm998_vm1, %v5105_v0 }
 0x299   : > { %4129 = vmatpush3.bf16.msra.mxu1 %v1071_v1  ;;  %4130 = vmatprep.mubr.msk.bf16.mxu1 %vm4790_vm0, %v4788_v3 }
 0x29a   : > { %4134 = vmatprep.subr.bf16.mxu1 %v4788_v3 }
 0x302   : > { %v1123_v19 = vpop.permute.xlu0 %1122 }
 0x303   : > { %v1128_v21 = vsel %vm998_vm1, %v1123_v19, 0 }
 0x36b   : > { %v1039_v2 = vpop.f32.mrb[4].mxu1 }
 0x36c   : > { %v1045_v5 = vmul.f32 0.17677669, %v1039_v2  ;;  %v4126_v6 = vpop.f32.mrb[5].mxu1 }
 0x36d   : > { %v1042_v7 = vpop.f32.mrb[6].mxu1 }
 0x36e   : > { %v4127_v8 = vpop.f32.mrb[7].mxu1  ;;  %v1052_v9 = vadd.f32 %v5121_v4, %v1045_v5 }
 0x370   : > { %v1054_v10 = vsel %vm1053_vm3, %v1052_v9, -inf }
 0x371   : > { %1055 = vmax.xlane.f32.xlu1 %v1054_v10 }
 0x3fe   : > { %v1056_v11 = vpop.xlane.xlu1 %1055 }
 0x3ff   : > { %v1057_v12 = vsub.f32 %v1052_v9, %v1056_v11 }
 0x401   : > { %v1058_v13 = vmul.f32 1.442695, %v1057_v12 }
 0x403   : > { %4572 = vpow2.f32 %v1058_v13 }
 0x40d   : > { %v4573_v14 = vpop.eup %4572 }
 0x40e   : > { %v1060_v15 = vsel %vm1053_vm3, %v4573_v14, 0.0 }
 0x40f   : > { %1061 = vadd.xlane.f32.xlu1 %v1060_v15 }
 0x420   : > { %1119 = vrot.lane.b32.xlu1 %v5105_v0, %s4791_s19 }
 0x49c   : > { %v1062_v16 = vpop.xlane.xlu1 %1061 }
 0x49d   : > { %4574 = vrcp.f32 %v1062_v16 }
 0x4a0   : > { %v1120_v22 = vpop.permute.xlu1 %1119 }
 0x4a7   : > { %v4575_v17 = vpop.eup %4574 }
 0x4a8   : > { %v1064_v18 = vmul.f32 %v4575_v17, %v4573_v14 }
 0x4aa   : > { %v1065_v20 = vpack.c.bf16 %v1064_v18, %v1064_v18 }
 0x4ac   : > { %4131 = vmatmul.mubr.msk.bf16.vlgmr.msra.gmra.mrb[8].mxu1 %vm1053_vm3, %v1065_v20 }
 0x4ad   : > { %4135 = vmatpush3.bf16.xpose.msra.mxu1 %v1128_v21  ;;  %4136 = vmatprep.mubr.msk.bf16.mxu1 %vm4790_vm0, %v4788_v3 }
 0x4ae   : > { %4140 = vmatprep.subr.bf16.mxu1 %v4788_v3 }
 0x4b4   : > { %4137 = vmatmul.mubr.msk.bf16.vlgmr.msra.gmra.mrb[12].mxu1 %vm998_vm1, %v1120_v22 }
 0x4b5   : > { %4142 = vmatprep.mubr.msk.bf16.mxu1 %vm4790_vm0, %v4788_v3 }
 0x57f   : > { %v1107_v23 = vpop.f32.mrb[8].mxu1 }
 0x580   : > { %v4132_v24 = vpop.f32.mrb[9].mxu1  ;;  %v1113_v56 = vpack.c.bf16 %v1107_v23, %v1107_v23 }
 0x581   : > { %v1110_v26 = vpop.f32.mrb[10].mxu1 }
 0x582   : > { %v4133_v27 = vpop.f32.mrb[11].mxu1 }
 0x587   : > { %v1164_v28 = vpop.f32.mrb[12].mxu1 }
 0x588   : > { %v1170_v29 = vmul.f32 0.17677669, %v1164_v28  ;;  %v4138_v30 = vpop.f32.mrb[13].mxu1  ;;  %v4438_v28 = vld [vmem:[%s5605_s7 + $0x20] sm:$0xff]  }
 0x589   : > { %v1167_v31 = vpop.f32.mrb[14].mxu1 }
 0x58a   : > { %v4139_v32 = vpop.f32.mrb[15].mxu1  ;;  %v1171_v33 = vadd.f32 %v5121_v4, %v1170_v29 }
 0x58c   : > { %v1172_v34 = vsel %vm1053_vm3, %v1171_v33, -inf }
 0x58d   : > { %1173 = vmax.xlane.f32.xlu1 %v1172_v34 }
 0x59e   : > { %1350 = vrot.lane.b32.xlu1 %v5096_v59, %s4792_s18 }
 0x5a2   : > { %1348 = vrot.lane.b32.xlu1 %v5105_v0, %s4792_s18 }
 0x61a   : > { %v1174_v35 = vpop.xlane.xlu1 %1173 }
 0x61b   : > { %v1175_v36 = vsub.f32 %v1171_v33, %v1174_v35 }
 0x61d   : > { %v1176_v37 = vmul.f32 1.442695, %v1175_v36  ;;  %v4439_v36 = vld [vmem:[%s5605_s7 + $0x28] sm:$0xff]  }
 0x61e   : > { %v1351_v57 = vpop.permute.xlu1 %1350 }
 0x61f   : > { %4576 = vpow2.f32 %v1176_v37  ;;  %v1356_v1 = vsel %vm998_vm1, %v1351_v57, 0 }
 0x622   : > { %v1349_v7 = vpop.permute.xlu1 %1348 }
 0x629   : > { %v4577_v38 = vpop.eup %4576 }
 0x62a   : > { %v1178_v40 = vsel %vm1053_vm3, %v4577_v38, 0.0 }
 0x62b   : > { %1179 = vadd.xlane.f32.xlu0 %v1178_v40 }
 0x641   : > { %1185 = vrot.lane.b32.xlu0 %v5103_v63, %s4791_s19 }
 0x6b8   : > { %v1180_v48 = vpop.xlane.xlu0 %1179 }
 0x6b9   : > { %4578 = vrcp.f32 %v1180_v48 }
 0x6bc   : > { %v1186_v49 = vpop.permute.xlu0 %1185 }
 0x6bd   : > { %v1191_v50 = vsel %vm1069_vm2, %v1186_v49, 0 }
 0x6be   : > { %4141 = vmatpush3.bf16.msra.mxu1 %v1191_v50 }
 0x6bf   : > { %4154 = vmatprep.subr.bf16.mxu1 %v4788_v3 }
 0x6c3   : > { %v4579_v51 = vpop.eup %4578 }
 0x6c4   : > { %v1182_v52 = vmul.f32 %v4579_v51, %v4577_v38 }
 0x6c6   : > { %v1183_v54 = vpack.c.bf16 %v1182_v52, %v1182_v52 }
 0x6c8   : > { %4143 = vmatmul.mubr.msk.bf16.vlgmr.msra.gmra.mrb[16].mxu1 %vm1053_vm3, %v1183_v54 }
 0x6c9   : > { %4155 = vmatpush3.bf16.msra.mxu1 %v4434_v53  ;;  %4158 = vmatprep.mubr.msk.bf16.mxu1 %vm4790_vm0, %v4788_v3 }
 0x6ca   : > { %4156 = vmatprep.subr.bf16.mxu1 %v4788_v3 }
 0x6cd   : > { %4157 = vmatpush3.bf16.msra.mxu1 %v4435_v55 }
 0x6ce   : > { %4168 = vmatprep.subr.bf16.mxu1 %v4788_v3 }
 0x6d0   : > { %4159 = vmatmul.mubr.msk.bf16.vlgmr.msra.gmra.mrb[20].mxu1 %vm998_vm1, %v1113_v56 }
 0x6d1   : > { %4170 = vmatprep.mubr.msk.bf16.mxu1 %vm4790_vm0, %v4788_v3 }
 0x79b   : > { %v1227_v58 = vpop.f32.mrb[16].mxu1 }
 0x79c   : > { %v1233_v60 = vpack.c.bf16 %v1227_v58, %v1227_v58  ;;  %v4144_v61 = vpop.f32.mrb[17].mxu1 }
 0x79d   : > { %v1230_v62 = vpop.f32.mrb[18].mxu1 }
 0x79e   : > { %v4145_v2 = vpop.f32.mrb[19].mxu1  ;;  %4151 = vmatmul.mubr.msk.bf16.vlgmr.msra.gmra.mrb[4].mxu0 %vm998_vm1, %v1233_v60 }
 0x79f   : > { %4163 = vmatpush3.bf16.xpose.msra.mxu0 %v1356_v1  ;;  %4164 = vmatprep.mubr.msk.bf16.mxu0 %vm4790_vm0, %v4788_v3  ;;  %v4440_v1 = vld [vmem:[%s5605_s7 + $0x30] sm:$0xff]  }
 0x7a0   : > { %4174 = vmatprep.subr.bf16.mxu0 %v4788_v3 }
 0x7a3   : > { %v1342_v5 = vpop.f32.mrb[20].mxu1 }
 0x7a4   : > { %v4160_v6 = vpop.f32.mrb[21].mxu1 }
 0x7a5   : > { %v1345_v8 = vpop.f32.mrb[22].mxu1 }
 0x7a6   : > { %v4161_v9 = vpop.f32.mrb[23].mxu1  ;;  %4165 = vmatmul.mubr.msk.bf16.vlgmr.msra.gmra.mrb[8].mxu0 %vm998_vm1, %v1349_v7 }
 0x7a7   : > { %4178 = vmatprep.mubr.msk.bf16.mxu0 %vm4790_vm0, %v4788_v3  ;;  %4175 = vmatpush3.bf16.msra.mxu0 %v4438_v28  ;;  %v4444_v28 = vld [vmem:[%s5609_s11 + $0x4] ss:$8 sps:$4 sm:$0xff]  }
 0x7a8   : > { %4176 = vmatprep.subr.bf16.mxu0 %v4788_v3 }
 0x7ab   : > { %4177 = vmatpush3.bf16.msra.mxu0 %v4439_v36  ;;  %v4456_v36 = vld [vmem:[%s5609_s11 + $0x44] ss:$8 sps:$4 sm:$0xff]  }
 0x7ac   : > { %4188 = vmatprep.subr.bf16.mxu0 %v4788_v3 }
 0x871   : > { %v1287_v10 = vpop.f32.mrb[4].mxu0 }
 0x872   : > { %v5177_v11 = vadd.f32 %v1342_v5, %v1287_v10  ;;  %v4152_v12 = vpop.f32.mrb[5].mxu0 }
 0x873   : > { %v1290_v13 = vpop.f32.mrb[6].mxu0 }
 0x874   : > { %v4153_v14 = vpop.f32.mrb[7].mxu0  ;;  %v4441_v13 = vld [vmem:[%s5605_s7 + $0x38] sm:$0xff]  }
 0x879   : > { %v1392_v15 = vpop.f32.mrb[8].mxu0 }
 0x87a   : > { %v1398_v16 = vmul.f32 0.17677669, %v1392_v15  ;;  %v4166_v17 = vpop.f32.mrb[9].mxu0 }
 0x87b   : > { %v1395_v18 = vpop.f32.mrb[10].mxu0 }
 0x87c   : > { %v4167_v19 = vpop.f32.mrb[11].mxu0  ;;  %v1399_v20 = vadd.f32 %v5121_v4, %v1398_v16 }
 0x87d   : > { %v3804_v19 = vld [vmem:[%s5606_s8] ss:$0 sm:$0xff] }
 0x87e   : > { %v1400_v21 = vsel %vm1053_vm3, %v1399_v20, -inf }
 0x87f   : > { %1401 = vmax.xlane.f32.xlu1 %v1400_v21 }
 0x890   : > { %1523 = vrot.lane.b32.xlu1 %v5096_v59, %s4793_s27 }
 0x894   : > { %1521 = vrot.lane.b32.xlu1 %v5105_v0, %s4793_s27 }
 0x90c   : > { %v1402_v22 = vpop.xlane.xlu1 %1401 }
 0x90d   : > { %v1403_v23 = vsub.f32 %v1399_v20, %v1402_v22 }
 0x90f   : > { %v1404_v24 = vmul.f32 1.442695, %v1403_v23 }
 0x910   : > { %v1524_v32 = vpop.permute.xlu1 %1523 }
 0x911   : > { %4580 = vpow2.f32 %v1404_v24  ;;  %v1529_v34 = vsel %vm998_vm1, %v1524_v32, 0 }
 0x914   : > { %v1522_v35 = vpop.permute.xlu1 %1521 }
 0x91b   : > { %v4581_v26 = vpop.eup %4580 }
 0x91c   : > { %v1406_v27 = vsel %vm1053_vm3, %v4581_v26, 0.0 }
 0x91d   : > { %1407 = vadd.xlane.f32.xlu0 %v1406_v27  ;;  %v4442_v27 = vld [vmem:[%s5609_s11] ss:$8 sps:$4 sm:$0xff]  }
 0x933   : > { %1412 = vrot.lane.b32.xlu0 %v5103_v63, %s4792_s18 }
 0x9aa   : > { %v1408_v59 = vpop.xlane.xlu0 %1407 }
 0x9ab   : > { %4582 = vrcp.f32 %v1408_v59  ;;  %v4447_v59 = vld [vmem:[%s5609_s11 + $0x14] ss:$8 sps:$4 sm:$0xff]  }
 0x9ae   : > { %v1413_v0 = vpop.permute.xlu0 %1412 }
 0x9af   : > { %v1418_v29 = vsel %vm1069_vm2, %v1413_v0, 0  ;;  %v4445_v0 = vld [vmem:[%s5609_s11 + $0x10] ss:$8 sps:$4 sm:$0xff]  }
 0x9b0   : > { %4169 = vmatpush3.bf16.msra.mxu1 %v1418_v29  ;;  %v4448_v29 = vld [vmem:[%s5609_s11 + $0x20] ss:$8 sps:$4 sm:$0xff]  }
 0x9b1   : > { %4182 = vmatprep.subr.bf16.mxu1 %v4788_v3 }
 0x9b5   : > { %v4583_v30 = vpop.eup %4582 }
 0x9b6   : > { %v1410_v31 = vmul.f32 %v4583_v30, %v4581_v26 }
 0x9b8   : > { %v1411_v33 = vpack.c.bf16 %v1410_v31, %v1410_v31 }
 0x9ba   : > { %4171 = vmatmul.mubr.msk.bf16.vlgmr.msra.gmra.mrb[24].mxu1 %vm1053_vm3, %v1411_v33 }
 0x9bb   : > { %4183 = vmatpush3.bf16.xpose.msra.mxu1 %v1529_v34  ;;  %4184 = vmatprep.mubr.msk.bf16.mxu1 %vm4790_vm0, %v4788_v3  ;;  %v4453_v34 = vld [vmem:[%s5609_s11 + $0x34] ss:$8 sps:$4 sm:$0xff]  }
 0x9bc   : > { %4194 = vmatprep.subr.bf16.mxu1 %v4788_v3 }
 0x9c2   : > { %4185 = vmatmul.mubr.msk.bf16.vlgmr.msra.gmra.mrb[28].mxu1 %vm998_vm1, %v1522_v35  ;;  %v4451_v35 = vld [vmem:[%s5609_s11 + $0x30] ss:$8 sps:$4 sm:$0xff]  }
 0x9c3   : > { %4198 = vmatprep.mubr.msk.bf16.mxu1 %vm4790_vm0, %v4788_v3  ;;  %4195 = vmatpush3.bf16.msra.mxu1 %v4440_v1  ;;  %v4468_v1 = vld [vmem:[#allocation5 + $0x48] sm:$0xff]  }
 0x9c4   : > { %4196 = vmatprep.subr.bf16.mxu1 %v4788_v3 }
 0x9c7   : > { %4197 = vmatpush3.bf16.msra.mxu1 %v4441_v13  ;;  %v4478_v13 = vld [vmem:[#allocation5 + $0x70] sm:$0xff]  }
 0xa8d   : > { %v1454_v37 = vpop.f32.mrb[24].mxu1 }
 0xa8e   : > { %v1460_v38 = vpack.c.bf16 %v1454_v37, %v1454_v37  ;;  %v4172_v40 = vpop.f32.mrb[25].mxu1  ;;  %v4454_v37 = vld [vmem:[%s5609_s11 + $0x40] ss:$8 sps:$4 sm:$0xff]  }
 0xa8f   : > { %v1457_v44 = vpop.f32.mrb[26].mxu1  ;;  %v4457_v40 = vld [vmem:[%s5609_s11 + $0x50] ss:$8 sps:$4 sm:$0xff]  }
 0xa90   : > { %v4173_v46 = vpop.f32.mrb[27].mxu1  ;;  %4179 = vmatmul.mubr.msk.bf16.vlgmr.msra.gmra.mrb[12].mxu0 %vm998_vm1, %v1460_v38  ;;  %v4459_v38 = vld [vmem:[%s5609_s11 + $0x54] ss:$8 sps:$4 sm:$0xff]   ;;  %v4462_v44 = vld [vmem:[%s5609_s11 + $0x64] ss:$8 sps:$4 sm:$0xff]  }
 0xa91   : > { %4190 = vmatprep.mubr.msk.bf16.mxu0 %vm4790_vm0, %v4788_v3  ;;  %v4460_v46 = vld [vmem:[%s5609_s11 + $0x60] ss:$8 sps:$4 sm:$0xff]  }
 0xa95   : > { %v1565_v48 = vpop.f32.mrb[28].mxu1 }
 0xa96   : > { %v1571_v49 = vmul.f32 0.17677669, %v1565_v48  ;;  %v4186_v50 = vpop.f32.mrb[29].mxu1  ;;  %v4465_v48 = vld [vmem:[%s5609_s11 + $0x74] ss:$8 sps:$4 sm:$0xff]  }
 0xa97   : > { %v1568_v51 = vpop.f32.mrb[30].mxu1 }
 0xa98   : > { %v4187_v52 = vpop.f32.mrb[31].mxu1  ;;  %v1572_v53 = vadd.f32 %v5121_v4, %v1571_v49  ;;  %v4463_v49 = vld [vmem:[%s5609_s11 + $0x70] ss:$8 sps:$4 sm:$0xff]  }
 0xa9a   : > { %v1573_v54 = vsel %vm1053_vm3, %v1572_v53, -inf }
 0xa9b   : > { %1574 = vmax.xlane.f32.xlu0 %v1573_v54  ;;  %v3805_v54 = vld [vmem:[%s5607_s9] ss:$0 sm:$0xff] }
 0xab1   : > { %1585 = vrot.lane.b32.xlu0 %v5103_v63, %s4793_s27 }
 0xb28   : > { %v1575_v55 = vpop.xlane.xlu0 %1574 }
 0xb29   : > { %v1576_v56 = vsub.f32 %v1572_v53, %v1575_v55 }
 0xb2b   : > { %v1577_v57 = vmul.f32 1.442695, %v1576_v56  ;;  %v3806_v56 = vld [vmem:[%s5608_s10] ss:$0 sm:$0xff] }
 0xb2c   : > { %v1586_v58 = vpop.permute.xlu0 %1585 }
 0xb2d   : > { %4584 = vpow2.f32 %v1577_v57  ;;  %v1591_v60 = vsel %vm1069_vm2, %v1586_v58, 0 }
 0xb2e   : > { %4189 = vmatpush3.bf16.msra.mxu0 %v1591_v60 }
 0xb2f   : > { %1839 = vmatprep.subr.bf16.mxu0 %v4444_v28 }
 0xb37   : > { %v4585_v61 = vpop.eup %4584 }
 0xb38   : > { %v1579_v62 = vsel %vm1053_vm3, %v4585_v61, 0.0 }
 0xb39   : > { %1580 = vadd.xlane.f32.xlu1 %v1579_v62  ;;  %v4467_v62 = vld [vmem:[#allocation5] sm:$0xff]  }
 0xb63   : > { %v1514_v63 = vpop.f32.mrb[12].mxu0 }
 0xb64   : > { %v1520_v2 = vadd.f32 %v1514_v63, %v5177_v11  ;;  %v4180_v5 = vpop.f32.mrb[13].mxu0  ;;  %v4469_v63 = vld [vmem:[#allocation5 + $0x8] sm:$0xff]  }
 0xb65   : > { %v1517_v6 = vpop.f32.mrb[14].mxu0  ;;  %v4471_v5 = vld [vmem:[#allocation5 + $0x10] sm:$0xff]  }
 0xb66   : > { %v4181_v7 = vpop.f32.mrb[15].mxu0  ;;  %v4472_v6 = vld [vmem:[#allocation5 + $0x58] sm:$0xff]  }
 0xb67   : > { %v4473_v7 = vld [vmem:[#allocation5 + $0x18] sm:$0xff]  }
 0xbc6   : > { %v1581_v8 = vpop.xlane.xlu1 %1580 }
 0xbc7   : > { %4586 = vrcp.f32 %v1581_v8  ;;  %v4474_v8 = vld [vmem:[#allocation5 + $0x60] sm:$0xff]  }
 0xbd1   : > { %v4587_v9 = vpop.eup %4586 }
 0xbd2   : > { %v1583_v10 = vmul.f32 %v4587_v9, %v4585_v61  ;;  %v4466_v61 = vld [vmem:[#allocation5 + $0x40] sm:$0xff]  }
 0xbd3   : > { %4012 = vmatprep.subr.bf16.mxu1 %v4466_v61  ;;  %v4475_v9 = vld [vmem:[#allocation5 + $0x20] sm:$0xff]   ;;  %v4485_v61 = vld [vmem:[#allocation2 + $0xc8] ss:$12 sps:$4 sm:$0xff]  }
 0xbd4   : > { %v1584_v12 = vpack.c.bf16 %v1583_v10, %v1583_v10  ;;  %v4476_v10 = vld [vmem:[#allocation5 + $0x68] sm:$0xff]  }
 0xbd6   : > { %4191 = vmatmul.mubr.msk.bf16.vlgmr.msra.gmra.mrb[16].mxu0 %vm1053_vm3, %v1584_v12  ;;  %v4477_v12 = vld [vmem:[#allocation5 + $0x28] sm:$0xff]  }
 0xbd7   : > { %1871 = vmatprep.mubr.bf16.mxu0 %v4789_v25  ;;  %1840 = vmatpush1.bf16.msra.mxu0 %v4442_v27 }
 0xbd8   : > { %1841 = vmatprep.subr.bf16.mxu0 %v4447_v59 }
 0xbdb   : > { %1842 = vmatpush1.bf16.msra.mxu0 %v4445_v0 }
 0xca9   : > { %v1627_v14 = vpop.f32.mrb[16].mxu0 }
 0xcaa   : > { %v1633_v15 = vpack.c.bf16 %v1627_v14, %v1627_v14  ;;  %v4192_v11 = vpop.f32.mrb[17].mxu0  ;;  %v4479_v14 = vld [vmem:[#allocation5 + $0x30] sm:$0xff]  }
 0xcab   : > { %v1630_v16 = vpop.f32.mrb[18].mxu0  ;;  %v4481_v11 = vld [vmem:[#allocation5 + $0x38] sm:$0xff]  }
 0xcac   : > { %v4193_v17 = vpop.f32.mrb[19].mxu0  ;;  %4199 = vmatmul.mubr.msk.bf16.vlgmr.msra.gmra.mrb[32].mxu1 %vm998_vm1, %v1633_v15  ;;  %v4480_v15 = vld [vmem:[#allocation5 + $0x78] sm:$0xff]   ;;  %v1747_v16 = vld [vmem:[%s5610_s12] sm:$0x3] }
 0xcad   : > { %4013 = vmatpush3.bf16.msra.mxu1 %v4467_v62  ;;  %v1752_v17 = vrot.slane %v1747_v16, %v5091_v47  ;;  %v4488_v62 = vld [vmem:[#allocation2 + $0xdc] ss:$12 sps:$4 sm:$0xff]  }
 0xcae   : > { %4014 = vmatprep.subr.bf16.mxu1 %v4468_v1  ;;  %v4489_v1 = vld [vmem:[#allocation2 + $0xe0] ss:$12 sps:$4 sm:$0xff]  }
 0xcb1   : > { %4015 = vmatpush3.bf16.msra.mxu1 %v4469_v63  ;;  %v4486_v63 = vld [vmem:[#allocation2 + $0xd8] ss:$12 sps:$4 sm:$0xff]  }
 0xd7f   : > { %v1687_v18 = vpop.f32.mrb[32].mxu1 }
 0xd80   : > { %v1693_v20 = vadd.f32 %v1687_v18, %v1520_v2  ;;  %v4200_v21 = vpop.f32.mrb[33].mxu1  ;;  %v4470_v2 = vld [vmem:[#allocation5 + $0x50] sm:$0xff]   ;;  %v1756_v18 = vrot.slane %v1747_v16, %v5083_v43  ;;  %v4504_v16 = vld [vmem:[#allocation2 + $0x13c] ss:$12 sps:$4 sm:$0xff]  }
 0xd81   : > { %v1690_v22 = vpop.f32.mrb[34].mxu1  ;;  %4016 = vmatprep.subr.bf16.mxu1 %v4470_v2  ;;  %v4492_v2 = vld [vmem:[#allocation2 + $0xf4] ss:$12 sps:$4 sm:$0xff]  }
 0xd82   : > { %v1701_v23 = vadd.f32 %v3804_v19, %v1693_v20  ;;  %v4201_v24 = vpop.f32.mrb[35].mxu1  ;;  %4017 = vmatpush3.bf16.msra.mxu1 %v4471_v5  ;;  %v4490_v5 = vld [vmem:[#allocation2 + $0xf0] ss:$12 sps:$4 sm:$0xff]  }
 0xd83   : > { %4018 = vmatprep.subr.bf16.mxu1 %v4472_v6 }
 0xd84   : > { %v1702_v26 = vadd.f32 %v1701_v23, %v5071_v39  ;;  %v4450_v39 = vld [vmem:[%s5609_s11 + $0x24] ss:$8 sps:$4 sm:$0xff]  }
 0xd85   : > { %1843 = vmatprep.subr.bf16.mxu0 %v4450_v39 }
 0xd86   : > { %1705 = vadd.xlane.f32.xlu1 %v1702_v26  ;;  %1844 = vmatpush1.bf16.msra.mxu0 %v4448_v29 }
 0xd87   : > { %1845 = vmatprep.subr.bf16.mxu0 %v4453_v34  ;;  %4019 = vmatpush3.bf16.msra.mxu1 %v4473_v7 }
 0xd88   : > { %4020 = vmatprep.subr.bf16.mxu1 %v4474_v8 }
 0xd8a   : > { %1846 = vmatpush1.bf16.msra.mxu0 %v4451_v35 }
 0xd8b   : > { %1847 = vmatprep.subr.bf16.mxu0 %v4456_v36  ;;  %4021 = vmatpush3.bf16.msra.mxu1 %v4475_v9  ;;  %v4493_v9 = vld [vmem:[#allocation2 + $0xf8] ss:$12 sps:$4 sm:$0xff]  }
 0xd8c   : > { %4022 = vmatprep.subr.bf16.mxu1 %v4476_v10  ;;  %v4496_v10 = vld [vmem:[#allocation2 + $0x10c] ss:$12 sps:$4 sm:$0xff]  }
 0xd8e   : > { %1848 = vmatpush1.bf16.msra.mxu0 %v4454_v37 }
 0xd8f   : > { %1849 = vmatprep.subr.bf16.mxu0 %v4459_v38  ;;  %4023 = vmatpush3.bf16.msra.mxu1 %v4477_v12  ;;  %v4494_v12 = vld [vmem:[#allocation2 + $0x108] ss:$12 sps:$4 sm:$0xff]  }
 0xd90   : > { %4024 = vmatprep.subr.bf16.mxu1 %v4478_v13  ;;  %v4497_v13 = vld [vmem:[#allocation2 + $0x110] ss:$12 sps:$4 sm:$0xff]  }
 0xd92   : > { %1850 = vmatpush1.bf16.msra.mxu0 %v4457_v40 }
 0xd93   : > { %1851 = vmatprep.subr.bf16.mxu0 %v4462_v44  ;;  %4025 = vmatpush3.bf16.msra.mxu1 %v4479_v14  ;;  %v4500_v14 = vld [vmem:[#allocation2 + $0x124] ss:$12 sps:$4 sm:$0xff]  }
 0xd94   : > { %4026 = vmatprep.subr.bf16.mxu1 %v4480_v15  ;;  %v4498_v15 = vld [vmem:[#allocation2 + $0x120] ss:$12 sps:$4 sm:$0xff]  }
 0xd96   : > { %1852 = vmatpush1.bf16.msra.mxu0 %v4460_v46 }
 0xd97   : > { %1853 = vmatprep.subr.bf16.mxu0 %v4465_v48  ;;  %4027 = vmatpush3.bf16.msra.mxu1 %v4481_v11  ;;  %v4501_v11 = vld [vmem:[#allocation2 + $0x128] ss:$12 sps:$4 sm:$0xff]  }
 0xd98   : > { %4202 = vmatprep.subr.bf16.mxu1 %v4788_v3 }
 0xd9a   : > { %1854 = vmatpush1.bf16.msra.mxu0 %v4463_v49 }
 0xe13   : > { %v1706_v30 = vpop.xlane.xlu1 %1705 }
 0xe14   : > { %v1707_v31 = vmul.f32 0.0078125, %v1706_v30 }
 0xe16   : > { %v1708_v32 = vsub.f32 %v1702_v26, %v1707_v31 }
 0xe18   : > { %v1709_v33 = vmul.f32 %v1708_v32, %v1708_v32 }
 0xe1a   : > { %1710 = vadd.xlane.f32.xlu1 %v1709_v33 }
 0xea7   : > { %v1711_v50 = vpop.xlane.xlu1 %1710 }
 0xea8   : > { %v1712_v51 = vmul.f32 0.0078125, %v1711_v50  ;;  %v3823_v50 = vld [vmem:[%s5612_s14] ss:$0 sm:$0xff] }
 0xeaa   : > { %v1713_v52 = vadd.f32 1e-12, %v1712_v51 }
 0xeac   : > { %4588 = vrsqrt.f32 %v1713_v52 }
 0xeb6   : > { %v4589_v53 = vpop.eup %4588 }
 0xeb7   : > { %v1715_v55 = vmul.f32 %v4589_v53, %v1708_v32 }
 0xeb9   : > { %v1722_v57 = vmul.f32 %v3805_v54, %v1715_v55 }
 0xebb   : > { %v5284_v58 = vadd.f32 %v3806_v56, %v1722_v57  ;;  %v4482_v57 = vld [vmem:[#allocation2 + $0xc0] ss:$12 sps:$4 sm:$0xff]  }
 0xebd   : > { %v1730_v60 = vpack.c.bf16 %v5284_v58, %v5284_v58 }
 0xebf   : > { %1872 = vmatmul.mubr.bf16.vlgmr.msra.gmra.mrb[20].mxu0 %v1730_v60  ;;  %v4484_v60 = vld [vmem:[#allocation2 + $0xc4] ss:$12 sps:$4 sm:$0xff]  }
 0xec0   : > { %2315 = vmatprep.mubr.bf16.mxu0 %v4789_v25  ;;  %2283 = vmatprep.subr.bf16.mxu0 %v4484_v60 }
 0xec1   : > { %2284 = vmatpush1.bf16.msra.mxu0 %v4482_v57 }
 0xec2   : > { %2285 = vmatprep.subr.bf16.mxu0 %v4488_v62 }
 0xec5   : > { %2286 = vmatpush1.bf16.msra.mxu0 %v4486_v63 }
 0xec6   : > { %2287 = vmatprep.subr.bf16.mxu0 %v4492_v2 }
 0xec9   : > { %2288 = vmatpush1.bf16.msra.mxu0 %v4490_v5 }
 0xeca   : > { %2289 = vmatprep.subr.bf16.mxu0 %v4496_v10 }
 0xecd   : > { %2290 = vmatpush1.bf16.msra.mxu0 %v4494_v12 }
 0xece   : > { %2291 = vmatprep.subr.bf16.mxu0 %v4500_v14 }
 0xed1   : > { %2292 = vmatpush1.bf16.msra.mxu0 %v4498_v15 }
 0xed2   : > { %2293 = vmatprep.subr.bf16.mxu0 %v4504_v16 }
 0xf92   : > { %v1873_v19 = vpop.f32.mrb[20].mxu0 }
 0xf93   : > { %v1874_v20 = vadd.f32 %v1873_v19, %v1752_v17  ;;  %v1875_v21 = vpop.f32.mrb[21].mxu0  ;;  %v4502_v17 = vld [vmem:[#allocation2 + $0x138] ss:$12 sps:$4 sm:$0xff]   ;;  %v4508_v19 = vld [vmem:[#allocation2 + $0x154] ss:$12 sps:$4 sm:$0xff]  }
 0xf94   : > { %v1876_v22 = vadd.f32 %v1875_v21, %v1756_v18  ;;  %v1877_v23 = vpop.f32.mrb[22].mxu0  ;;  %v4505_v18 = vld [vmem:[#allocation2 + $0x140] ss:$12 sps:$4 sm:$0xff]   ;;  %2294 = vmatpush1.bf16.msra.mxu0 %v4502_v17  ;;  %v4509_v21 = vld [vmem:[#allocation2 + $0x158] ss:$12 sps:$4 sm:$0xff]  }
 0xf95   : > { %v1882_v24 = vmul.f32 0.044715, %v1874_v20  ;;  %v1878_v26 = vpop.f32.mrb[23].mxu0  ;;  %v1880_v35 = vmul.f32 0.5, %v1874_v20  ;;  %2295 = vmatprep.subr.bf16.mxu0 %v4508_v19  ;;  %v4510_v23 = vld [vmem:[#allocation2 + $0x168] ss:$12 sps:$4 sm:$0xff]  }
 0xf96   : > { %v1883_v27 = vmul.f32 0.044715, %v1876_v22  ;;  %v1881_v37 = vmul.f32 0.5, %v1876_v22 }
 0xf97   : > { %v1884_v28 = vmul.f32 %v1882_v24, %v1874_v20  ;;  %v4513_v24 = vld [vmem:[#allocation2 + $0x170] ss:$12 sps:$4 sm:$0xff]  }
 0xf98   : > { %v1885_v59 = vmul.f32 %v1883_v27, %v1876_v22 }
 0xf99   : > { %v1886_v0 = vmul.f32 %v1884_v28, %v1874_v20 }
 0xf9a   : > { %v1887_v39 = vmul.f32 %v1885_v59, %v1876_v22 }
 0xf9b   : > { %v1888_v29 = vadd.f32 %v1886_v0, %v1874_v20  ;;  %v4506_v20 = vld [vmem:[#allocation2 + $0x150] ss:$12 sps:$4 sm:$0xff]   ;;  %v3840_v0 = vld [vmem:[%s5613_s15] ss:$0 sm:$0xff] }
 0xf9c   : > { %v1889_v30 = vadd.f32 %v1887_v39, %v1876_v22  ;;  %v4512_v22 = vld [vmem:[#allocation2 + $0x16c] ss:$12 sps:$4 sm:$0xff]   ;;  %2296 = vmatpush1.bf16.msra.mxu0 %v4506_v20 }
 0xf9d   : > { %v1890_v31 = vmul.f32 0.7978846, %v1888_v29  ;;  %2297 = vmatprep.subr.bf16.mxu0 %v4512_v22  ;;  %v3841_v29 = vld [vmem:[%s5614_s16] ss:$0 sm:$0xff] }
 0xf9e   : > { %v1891_v32 = vmul.f32 0.7978846, %v1889_v30 }
 0xf9f   : > { %4590 = vtanh.f32 %v1890_v31 }
 0xfa0   : > { %4592 = vtanh.f32 %v1891_v32  ;;  %2298 = vmatpush1.bf16.msra.mxu0 %v4510_v23 }
 0xfa1   : > { %4222 = vmatprep.subr.bf16.mxu0 %v4788_v3 }
 0xfa9   : > { %v4591_v33 = vpop.eup %4590 }
 0xfaa   : > { %v4593_v34 = vpop.eup %4592  ;;  %v1894_v36 = vadd.f32 1.0, %v4591_v33  ;;  %v3842_v33 = vld [vmem:[%s5604_s6 + $0x3] sm:$0x7] }
 0xfab   : > { %v1895_v38 = vadd.f32 1.0, %v4593_v34  ;;  %v2143_v34 = vrot.slane %v3842_v33, %v5091_v47 }
 0xfac   : > { %v1896_v40 = vmul.f32 %v1894_v36, %v1880_v35  ;;  %v2151_v35 = vrot.slane %v3842_v33, %v781_v45  ;;  %v2147_v36 = vrot.slane %v3842_v33, %v5083_v43  ;;  %v4514_v33 = vld [vmem:[%s5605_s7 + $0x40] sm:$0xff]  }
 0xfad   : > { %v1897_v44 = vmul.f32 %v1895_v38, %v1881_v37 }
 0xfae   : > { %v1898_v48 = vpack.c.bf16 %v1896_v40, %v1896_v40 }
 0xfaf   : > { %v1899_v46 = vpack.c.bf16 %v1897_v44, %v1897_v44 }
 0xfb1   : > { %2067 = vmatprep.mubr.bf16.mxu1 %v1899_v46 }
 0xfb2   : > { %2068 = vmatmul.mubr.bf16.vlgmr.msra.gmra.mrb[36].mxu1 %v1898_v48 }
 0xfb3   : > { %4218 = vmatprep.mubr.msk.bf16.mxu1 %vm4790_vm0, %v4788_v3  ;;  %4203 = vmatpush3.bf16.msra.mxu1 %v4485_v61 }
 0xfb4   : > { %4204 = vmatprep.subr.bf16.mxu1 %v4788_v3 }
 0xfb7   : > { %4205 = vmatpush3.bf16.msra.mxu1 %v4489_v1 }
 0xfb8   : > { %4206 = vmatprep.subr.bf16.mxu1 %v4788_v3 }
 0xfbb   : > { %4207 = vmatpush3.bf16.msra.mxu1 %v4493_v9 }
 0xfbc   : > { %4208 = vmatprep.subr.bf16.mxu1 %v4788_v3 }
 0xfbf   : > { %4209 = vmatpush3.bf16.msra.mxu1 %v4497_v13 }
 0xfc0   : > { %4210 = vmatprep.subr.bf16.mxu1 %v4788_v3 }
 0xfc3   : > { %4211 = vmatpush3.bf16.msra.mxu1 %v4501_v11 }
 0xfc4   : > { %4212 = vmatprep.subr.bf16.mxu1 %v4788_v3 }
 0xfc7   : > { %4213 = vmatpush3.bf16.msra.mxu1 %v4505_v18 }
 0xfc8   : > { %4214 = vmatprep.subr.bf16.mxu1 %v4788_v3 }
 0xfcb   : > { %4215 = vmatpush3.bf16.msra.mxu1 %v4509_v21 }
 0xfcc   : > { %4216 = vmatprep.subr.bf16.mxu1 %v4788_v3 }
 0xfcf   : > { %4217 = vmatpush3.bf16.msra.mxu1 %v4513_v24 }
 0xfd0   : > { %4228 = vmatprep.subr.bf16.mxu1 %v4788_v3 }
0x1085   : > { %v4028_v49 = vpop.f32.mrb[36].mxu1 }
0x1086   : > { %v4029_v51 = vpop.f32.mrb[37].mxu1 }
0x1087   : > { %v4030_v52 = vadd.f32 %v4029_v51, %v4028_v49  ;;  %v4031_v53 = vpop.f32.mrb[38].mxu1 }
0x1088   : > { %v4032_v54 = vpop.f32.mrb[39].mxu1 }
0x1089   : > { %v2070_v55 = vadd.f32 %v4030_v52, %v3823_v50 }
0x108b   : > { %v2075_v56 = vadd.f32 %v2070_v55, %v5284_v58 }
0x108d   : > { %2078 = vadd.xlane.f32.xlu1 %v2075_v56 }
0x111a   : > { %v2079_v58 = vpop.xlane.xlu1 %2078 }
0x111b   : > { %v2080_v6 = vmul.f32 0.0078125, %v2079_v58 }
0x111d   : > { %v2081_v7 = vsub.f32 %v2075_v56, %v2080_v6 }
0x111f   : > { %v2082_v8 = vmul.f32 %v2081_v7, %v2081_v7 }
0x1121   : > { %2083 = vadd.xlane.f32.xlu1 %v2082_v8 }
0x11ae   : > { %v2084_v26 = vpop.xlane.xlu1 %2083 }
0x11af   : > { %v2085_v27 = vmul.f32 0.0078125, %v2084_v26 }
0x11b1   : > { %v2086_v28 = vadd.f32 1e-12, %v2085_v27 }
0x11b3   : > { %4594 = vrsqrt.f32 %v2086_v28  ;;  %v4516_v28 = vld [vmem:[%s5605_s7 + $0x50] sm:$0xff]  }
0x11bd   : > { %v4595_v59 = vpop.eup %4594 }
0x11be   : > { %v2088_v39 = vmul.f32 %v4595_v59, %v2081_v7  ;;  %v4517_v59 = vld [vmem:[%s5605_s7 + $0x58] sm:$0xff]  }
0x11c0   : > { %v2095_v30 = vmul.f32 %v3840_v0, %v2088_v39 }
0x11c2   : > { %v5316_v31 = vadd.f32 %v3841_v29, %v2095_v30 }
0x11c4   : > { %v2103_v32 = vpack.c.bf16 %v5316_v31, %v5316_v31 }
0x11c6   : > { %2316 = vmatmul.mubr.bf16.vlgmr.msra.gmra.mrb[24].mxu0 %v2103_v32  ;;  %4219 = vmatmul.mubr.bf16.vlgmr.msra.gmra.mrb[40].mxu1 %v2103_v32 }
0x11c7   : > { %4224 = vmatprep.mubr.msk.bf16.mxu0 %vm4790_vm0, %v4788_v3  ;;  %4230 = vmatprep.mubr.msk.bf16.mxu1 %vm4790_vm0, %v4788_v3 }
0x1299   : > { %v2317_v37 = vpop.f32.mrb[24].mxu0  ;;  %v2358_v38 = vpop.f32.mrb[40].mxu1 }
0x129a   : > { %v2318_v40 = vadd.f32 %v2317_v37, %v2143_v34  ;;  %v2359_v44 = vadd.f32 %v2358_v38, %v2151_v35  ;;  %v2319_v46 = vpop.f32.mrb[25].mxu0  ;;  %v4220_v48 = vpop.f32.mrb[41].mxu1  ;;  %v4515_v35 = vld [vmem:[%s5605_s7 + $0x48] sm:$0xff]  }
0x129b   : > { %v2320_v49 = vadd.f32 %v2319_v46, %v2147_v36  ;;  %v2321_v50 = vpop.f32.mrb[26].mxu0  ;;  %v2361_v51 = vpop.f32.mrb[42].mxu1 }
0x129c   : > { %v5331_v52 = vpack.c.bf16 %v2318_v40, %v2318_v40  ;;  %v5333_v53 = vpack.c.bf16 %v2359_v44, %v2359_v44  ;;  %v2322_v54 = vpop.f32.mrb[27].mxu0  ;;  %v4221_v55 = vpop.f32.mrb[43].mxu1 }
0x129d   : > { %v5335_v56 = vpack.c.bf16 %v2320_v49, %v2320_v49 }
0x129e   : > { %2480 = vrot.lane.b32.xlu1 %v5331_v52, %s4791_s19  ;;  %v2431_v42 = vsel %vm1069_vm2, %v5333_v53, 0 }
0x129f   : > { %4229 = vmatpush3.bf16.msra.mxu1 %v2431_v42  ;;  %2483 = vrot.lane.b32.xlu0 %v5335_v56, %s4791_s19  ;;  %v2371_v45 = vsel %vm998_vm1, %v5335_v56, 0 }
0x12a0   : > { %4223 = vmatpush3.bf16.xpose.msra.mxu0 %v2371_v45  ;;  %4240 = vmatprep.subr.bf16.mxu1 %v4788_v3 }
0x12a1   : > { %4234 = vmatprep.subr.bf16.mxu0 %v4788_v3 }
0x12a7   : > { %4225 = vmatmul.mubr.msk.bf16.vlgmr.msra.gmra.mrb[28].mxu0 %vm998_vm1, %v5331_v52 }
0x12a8   : > { %4236 = vmatprep.mubr.msk.bf16.mxu0 %vm4790_vm0, %v4788_v3 }
0x1310   : > { %v2481_v61 = vpop.permute.xlu1 %2480 }
0x1311   : > { %v2484_v57 = vpop.permute.xlu0 %2483 }
0x1312   : > { %v2489_v60 = vsel %vm998_vm1, %v2484_v57, 0 }
0x1313   : > { %4235 = vmatpush3.bf16.xpose.msra.mxu0 %v2489_v60 }
0x1314   : > { %4246 = vmatprep.subr.bf16.mxu0 %v4788_v3 }
0x131a   : > { %4237 = vmatmul.mubr.msk.bf16.vlgmr.msra.gmra.mrb[32].mxu0 %vm998_vm1, %v2481_v61 }
0x131b   : > { %4250 = vmatprep.mubr.msk.bf16.mxu0 %vm4790_vm0, %v4788_v3  ;;  %4247 = vmatpush3.bf16.msra.mxu0 %v4516_v28 }
0x131c   : > { %4248 = vmatprep.subr.bf16.mxu0 %v4788_v3 }
0x131f   : > { %4249 = vmatpush3.bf16.msra.mxu0 %v4517_v59 }
0x1320   : > { %4262 = vmatprep.subr.bf16.mxu0 %v4788_v3 }
0x137a   : > { %v2407_v62 = vpop.f32.mrb[28].mxu0 }
0x137b   : > { %v2413_v1 = vmul.f32 0.17677669, %v2407_v62  ;;  %v4226_v63 = vpop.f32.mrb[29].mxu0 }
0x137c   : > { %v2410_v2 = vpop.f32.mrb[30].mxu0 }
0x137d   : > { %v4227_v5 = vpop.f32.mrb[31].mxu0  ;;  %v2414_v58 = vadd.f32 %v5121_v4, %v2413_v1 }
0x137f   : > { %v2415_v6 = vsel %vm1053_vm3, %v2414_v58, -inf }
0x1380   : > { %2416 = vmax.xlane.f32.xlu0 %v2415_v6 }
0x13ed   : > { %v2525_v7 = vpop.f32.mrb[32].mxu0 }
0x13ee   : > { %v2531_v8 = vmul.f32 0.17677669, %v2525_v7  ;;  %v4238_v9 = vpop.f32.mrb[33].mxu0 }
0x13ef   : > { %v2528_v10 = vpop.f32.mrb[34].mxu0 }
0x13f0   : > { %v4239_v12 = vpop.f32.mrb[35].mxu0  ;;  %v2532_v13 = vadd.f32 %v5121_v4, %v2531_v8  ;;  %v4624_v10 = vld [vmem:[%s5118_s0] ss:$0 sm:$0xff]  ;;  %s3972_s0 = sshll.u32 %s4921_s2, 4 }
0x13f1   : > { %s5556_s24 = scalar_lea.hbm %s5669_s4, %s3972_s0 }
0x13f2   : > { %v2533_v14 = vsel %vm1053_vm3, %v2532_v13, -inf }
0x13f3   : > { %2534 = vmax.xlane.f32.xlu1 %v2533_v14 }
0x1404   : > { %2711 = vrot.lane.b32.xlu1 %v5335_v56, %s4792_s18 }
0x140d   : > { %v2417_v15 = vpop.xlane.xlu0 %2416 }
0x140e   : > { %v2418_v11 = vsub.f32 %v2414_v58, %v2417_v15 }
0x1410   : > { %v2419_v16 = vmul.f32 1.442695, %v2418_v11 }
0x1412   : > { %4596 = vpow2.f32 %v2419_v16 }
0x141c   : > { %v4597_v17 = vpop.eup %4596 }
0x141d   : > { %v2421_v18 = vsel %vm1053_vm3, %v4597_v17, 0.0 }
0x141e   : > { %2422 = vadd.xlane.f32.xlu0 %v2421_v18 }
0x1480   : > { %v2535_v19 = vpop.xlane.xlu1 %2534 }
0x1481   : > { %v2536_v20 = vsub.f32 %v2532_v13, %v2535_v19 }
0x1483   : > { %v2537_v21 = vmul.f32 1.442695, %v2536_v20 }
0x1484   : > { %v2712_v46 = vpop.permute.xlu1 %2711 }
0x1485   : > { %4598 = vpow2.f32 %v2537_v21  ;;  %v2717_v54 = vsel %vm998_vm1, %v2712_v46, 0 }
0x148f   : > { %v4599_v22 = vpop.eup %4598 }
0x1490   : > { %v2539_v4 = vsel %vm1053_vm3, %v4599_v22, 0.0 }
0x1491   : > { %2540 = vadd.xlane.f32.xlu0 %v2539_v4 }
0x14a7   : > { %2546 = vrot.lane.b32.xlu0 %v5333_v53, %s4791_s19  ;;  %s5667_s19 = sld [smem:[#allocation17_spill]] }
0x14ab   : > { %v2423_v23 = vpop.xlane.xlu0 %2422  ;;  %2709 = vrot.lane.b32.xlu0 %v5331_v52, %s4792_s18 }
0x14ac   : > { %4600 = vrcp.f32 %v2423_v23 }
0x14ad   : > { %p5670_p1 = scmp.ne.s32.totalorder %s5667_s19, 0 }
0x14b6   : > { %v4601_v24 = vpop.eup %4600 }
0x14b7   : > { %v2425_v26 = vmul.f32 %v4601_v24, %v4597_v17 }
0x14b9   : > { %v2426_v27 = vpack.c.bf16 %v2425_v26, %v2425_v26  ;;  %v4519_v26 = vld [vmem:[%s5605_s7 + $0x68] sm:$0xff]  }
0x14bb   : > { %4231 = vmatmul.mubr.msk.bf16.vlgmr.msra.gmra.mrb[44].mxu1 %vm1053_vm3, %v2426_v27 }
0x14bc   : > { %4242 = vmatprep.mubr.msk.bf16.mxu1 %vm4790_vm0, %v4788_v3 }
0x151e   : > { %v2541_v0 = vpop.xlane.xlu0 %2540 }
0x151f   : > { %4602 = vrcp.f32 %v2541_v0 }
0x1522   : > { %v2547_v39 = vpop.permute.xlu0 %2546 }
0x1523   : > { %v2552_v29 = vsel %vm1069_vm2, %v2547_v39, 0 }
0x1524   : > { %4241 = vmatpush3.bf16.msra.mxu1 %v2552_v29 }
0x1525   : > { %4254 = vmatprep.subr.bf16.mxu1 %v4788_v3 }
0x1526   : > { %v2710_v42 = vpop.permute.xlu0 %2709 }
0x1529   : > { %v4603_v30 = vpop.eup %4602 }
0x152a   : > { %v2543_v32 = vmul.f32 %v4603_v30, %v4599_v22 }
0x152c   : > { %v2544_v34 = vpack.c.bf16 %v2543_v32, %v2543_v32 }
0x152e   : > { %4243 = vmatmul.mubr.msk.bf16.vlgmr.msra.gmra.mrb[48].mxu1 %vm1053_vm3, %v2544_v34 }
0x152f   : > { %4255 = vmatpush3.bf16.msra.mxu1 %v4514_v33  ;;  %4258 = vmatprep.mubr.msk.bf16.mxu1 %vm4790_vm0, %v4788_v3 }
0x1530   : > { %4256 = vmatprep.subr.bf16.mxu1 %v4788_v3 }
0x1533   : > { %4257 = vmatpush3.bf16.msra.mxu1 %v4515_v35 }
0x1534   : > { %4268 = vmatprep.subr.bf16.mxu1 %v4788_v3 }
0x158e   : > { %v2467_v36 = vpop.f32.mrb[44].mxu1 }
0x158f   : > { %v2473_v37 = vpack.c.bf16 %v2467_v36, %v2467_v36  ;;  %v4232_v38 = vpop.f32.mrb[45].mxu1 }
0x1590   : > { %v2470_v40 = vpop.f32.mrb[46].mxu1 }
0x1591   : > { %v4233_v44 = vpop.f32.mrb[47].mxu1  ;;  %4259 = vmatmul.mubr.msk.bf16.vlgmr.msra.gmra.mrb[52].mxu1 %vm998_vm1, %v2473_v37 }
0x1592   : > { %4270 = vmatprep.mubr.msk.bf16.mxu1 %vm4790_vm0, %v4788_v3 }
0x1601   : > { %v2588_v48 = vpop.f32.mrb[48].mxu1 }
0x1602   : > { %v2594_v49 = vpack.c.bf16 %v2588_v48, %v2588_v48  ;;  %v4244_v50 = vpop.f32.mrb[49].mxu1  ;;  %v4520_v48 = vld [vmem:[%s5605_s7 + $0x70] sm:$0xff]  }
0x1603   : > { %v2591_v51 = vpop.f32.mrb[50].mxu1 }
0x1604   : > { %v4245_v55 = vpop.f32.mrb[51].mxu1  ;;  %4251 = vmatmul.mubr.msk.bf16.vlgmr.msra.gmra.mrb[36].mxu0 %vm998_vm1, %v2594_v49 }
0x1605   : > { %4263 = vmatpush3.bf16.xpose.msra.mxu0 %v2717_v54  ;;  %4264 = vmatprep.mubr.msk.bf16.mxu0 %vm4790_vm0, %v4788_v3 }
0x1606   : > { %4274 = vmatprep.subr.bf16.mxu0 %v4788_v3 }
0x160c   : > { %4265 = vmatmul.mubr.msk.bf16.vlgmr.msra.gmra.mrb[40].mxu0 %vm998_vm1, %v2710_v42 }
0x160d   : > { %4278 = vmatprep.mubr.msk.bf16.mxu0 %vm4790_vm0, %v4788_v3 }
0x1664   : > { %v2703_v45 = vpop.f32.mrb[52].mxu1 }
0x1665   : > { %v4260_v57 = vpop.f32.mrb[53].mxu1 }
0x1666   : > { %v2706_v60 = vpop.f32.mrb[54].mxu1 }
0x1667   : > { %v4261_v61 = vpop.f32.mrb[55].mxu1 }
0x16d7   : > { %v2648_v62 = vpop.f32.mrb[36].mxu0 }
0x16d8   : > { %v5403_v1 = vadd.f32 %v2703_v45, %v2648_v62  ;;  %v4252_v63 = vpop.f32.mrb[37].mxu0  ;;  %v4521_v62 = vld [vmem:[%s5605_s7 + $0x78] sm:$0xff]  }
0x16d9   : > { %v2651_v2 = vpop.f32.mrb[38].mxu0 }
0x16da   : > { %v4253_v5 = vpop.f32.mrb[39].mxu0 }
0x16df   : > { %v2753_v58 = vpop.f32.mrb[40].mxu0 }
0x16e0   : > { %v2759_v6 = vmul.f32 0.17677669, %v2753_v58  ;;  %v4266_v7 = vpop.f32.mrb[41].mxu0 }
0x16e1   : > { %v2756_v8 = vpop.f32.mrb[42].mxu0  ;;  %v3904_v7 = vld [vmem:[%s5606_s8 + $0x1] ss:$0 sm:$0xff] }
0x16e2   : > { %v4267_v9 = vpop.f32.mrb[43].mxu0  ;;  %v2760_v12 = vadd.f32 %v4624_v10, %v2759_v6 }
0x16e4   : > { %v2761_v13 = vsel %vm1053_vm3, %v2760_v12, -inf }
0x16e5   : > { %2762 = vmax.xlane.f32.xlu0 %v2761_v13 }
0x16fb   : > { %2773 = vrot.lane.b32.xlu0 %v5333_v53, %s4792_s18 }
0x16ff   : > { %2882 = vrot.lane.b32.xlu0 %v5331_v52, %s4793_s27  ;;  %v4518_v52 = vld [vmem:[%s5605_s7 + $0x60] sm:$0xff]  }
0x1700   : > { %4275 = vmatpush3.bf16.msra.mxu0 %v4518_v52 }
0x1701   : > { %4276 = vmatprep.subr.bf16.mxu0 %v4788_v3 }
0x1704   : > { %4277 = vmatpush3.bf16.msra.mxu0 %v4519_v26  ;;  %v4542_v26 = vld [vmem:[%s5609_s11 + $0xe4] ss:$8 sps:$4 sm:$0xff]  }
0x1705   : > { %4288 = vmatprep.subr.bf16.mxu0 %v4788_v3 }
0x1772   : > { %v2763_v14 = vpop.xlane.xlu0 %2762 }
0x1773   : > { %v2764_v15 = vsub.f32 %v2760_v12, %v2763_v14  ;;  %v4522_v14 = vld [vmem:[%s5609_s11 + $0x80] ss:$8 sps:$4 sm:$0xff]  }
0x1775   : > { %v2765_v11 = vmul.f32 1.442695, %v2764_v15  ;;  %v4524_v15 = vld [vmem:[%s5609_s11 + $0x84] ss:$8 sps:$4 sm:$0xff]  }
0x1776   : > { %v2774_v16 = vpop.permute.xlu0 %2773 }
0x1777   : > { %4604 = vpow2.f32 %v2765_v11  ;;  %v2779_v17 = vsel %vm1069_vm2, %v2774_v16, 0  ;;  %v4527_v11 = vld [vmem:[%s5609_s11 + $0x94] ss:$8 sps:$4 sm:$0xff]   ;;  %v4525_v16 = vld [vmem:[%s5609_s11 + $0x90] ss:$8 sps:$4 sm:$0xff]  }
0x1778   : > { %4269 = vmatpush3.bf16.msra.mxu1 %v2779_v17  ;;  %v4528_v17 = vld [vmem:[%s5609_s11 + $0xa0] ss:$8 sps:$4 sm:$0xff]  }
0x1779   : > { %4282 = vmatprep.subr.bf16.mxu1 %v4788_v3 }
0x1781   : > { %v4605_v18 = vpop.eup %4604 }
0x1782   : > { %v2767_v19 = vsel %vm1053_vm3, %v4605_v18, 0.0 }
0x1783   : > { %2768 = vadd.xlane.f32.xlu1 %v2767_v19 }
0x1794   : > { %2884 = vrot.lane.b32.xlu1 %v5335_v56, %s4793_s27  ;;  %v2883_v56 = vpop.permute.xlu0 %2882 }
0x1810   : > { %v2769_v20 = vpop.xlane.xlu1 %2768 }
0x1811   : > { %4606 = vrcp.f32 %v2769_v20 }
0x1814   : > { %v2885_v4 = vpop.permute.xlu1 %2884 }
0x1815   : > { %v2890_v24 = vsel %vm998_vm1, %v2885_v4, 0  ;;  %v4536_v4 = vld [vmem:[%s5609_s11 + $0xc4] ss:$8 sps:$4 sm:$0xff]  }
0x181b   : > { %v4607_v21 = vpop.eup %4606 }
0x181c   : > { %v2771_v22 = vmul.f32 %v4607_v21, %v4605_v18  ;;  %v4533_v21 = vld [vmem:[%s5609_s11 + $0xb4] ss:$8 sps:$4 sm:$0xff]  }
0x181e   : > { %v2772_v23 = vpack.c.bf16 %v2771_v22, %v2771_v22  ;;  %v4531_v22 = vld [vmem:[%s5609_s11 + $0xb0] ss:$8 sps:$4 sm:$0xff]  }
0x1820   : > { %4271 = vmatmul.mubr.msk.bf16.vlgmr.msra.gmra.mrb[56].mxu1 %vm1053_vm3, %v2772_v23  ;;  %v4534_v23 = vld [vmem:[%s5609_s11 + $0xc0] ss:$8 sps:$4 sm:$0xff]  }
0x1821   : > { %4283 = vmatpush3.bf16.xpose.msra.mxu1 %v2890_v24  ;;  %4284 = vmatprep.mubr.msk.bf16.mxu1 %vm4790_vm0, %v4788_v3  ;;  %v4539_v24 = vld [vmem:[%s5609_s11 + $0xd4] ss:$8 sps:$4 sm:$0xff]  }
0x1822   : > { %4294 = vmatprep.subr.bf16.mxu1 %v4788_v3 }
0x1828   : > { %4285 = vmatmul.mubr.msk.bf16.vlgmr.msra.gmra.mrb[60].mxu1 %vm998_vm1, %v2883_v56  ;;  %v4537_v56 = vld [vmem:[%s5609_s11 + $0xd0] ss:$8 sps:$4 sm:$0xff]  }
0x1829   : > { %4298 = vmatprep.mubr.msk.bf16.mxu1 %vm4790_vm0, %v4788_v3  ;;  %4295 = vmatpush3.bf16.msra.mxu1 %v4520_v48  ;;  %v4550_v48 = vld [vmem:[#allocation5 + $0xd0] sm:$0xff]  }
0x182a   : > { %4296 = vmatprep.subr.bf16.mxu1 %v4788_v3 }
0x182d   : > { %4297 = vmatpush3.bf16.msra.mxu1 %v4521_v62  ;;  %v3925_v62 = vld [vmem:[%s5610_s12 + $0x2] sm:$0x3] }
0x18f3   : > { %v2815_v27 = vpop.f32.mrb[56].mxu1 }
0x18f4   : > { %v2821_v28 = vpack.c.bf16 %v2815_v27, %v2815_v27  ;;  %v4272_v59 = vpop.f32.mrb[57].mxu1  ;;  %v4540_v27 = vld [vmem:[%s5609_s11 + $0xe0] ss:$8 sps:$4 sm:$0xff]  }
0x18f5   : > { %v2818_v0 = vpop.f32.mrb[58].mxu1  ;;  %v4543_v59 = vld [vmem:[%s5609_s11 + $0xf0] ss:$8 sps:$4 sm:$0xff]  }
0x18f6   : > { %v4273_v39 = vpop.f32.mrb[59].mxu1  ;;  %4279 = vmatmul.mubr.msk.bf16.vlgmr.msra.gmra.mrb[44].mxu0 %vm998_vm1, %v2821_v28  ;;  %v4545_v28 = vld [vmem:[%s5609_s11 + $0xf4] ss:$8 sps:$4 sm:$0xff]  }
0x18f7   : > { %4290 = vmatprep.mubr.msk.bf16.mxu0 %vm4790_vm0, %v4788_v3 }
0x18fb   : > { %v2926_v29 = vpop.f32.mrb[60].mxu1 }
0x18fc   : > { %v2932_v30 = vmul.f32 0.17677669, %v2926_v29  ;;  %v4286_v32 = vpop.f32.mrb[61].mxu1 }
0x18fd   : > { %v2929_v33 = vpop.f32.mrb[62].mxu1  ;;  %v3907_v32 = vld [vmem:[%s5607_s9 + $0x1] ss:$0 sm:$0xff] }
0x18fe   : > { %v4287_v34 = vpop.f32.mrb[63].mxu1  ;;  %v2933_v35 = vadd.f32 %v4624_v10, %v2932_v30 }
0x18ff   : > { %v3908_v34 = vld [vmem:[%s5608_s10 + $0x1] ss:$0 sm:$0xff] }
0x1900   : > { %v2934_v36 = vsel %vm1053_vm3, %v2933_v35, -inf }
0x1901   : > { %2935 = vmax.xlane.f32.xlu1 %v2934_v36 }
0x198e   : > { %v2936_v37 = vpop.xlane.xlu1 %2935 }
0x198f   : > { %v2937_v38 = vsub.f32 %v2933_v35, %v2936_v37 }
0x1991   : > { %v2938_v40 = vmul.f32 1.442695, %v2937_v38  ;;  %v4546_v38 = vld [vmem:[#allocation5 + $0xc0] sm:$0xff]  }
0x1992   : > { %4071 = vmatprep.subr.bf16.mxu1 %v4546_v38  ;;  %v4567_v38 = vld [vmem:[#allocation7 + $0x28] sm:$0xff]  }
0x1993   : > { %4608 = vpow2.f32 %v2938_v40  ;;  %v4547_v40 = vld [vmem:[#allocation5 + $0x80] sm:$0xff]  }
0x199d   : > { %v4609_v44 = vpop.eup %4608 }
0x199e   : > { %v2940_v46 = vsel %vm1053_vm3, %v4609_v44, 0.0 }
0x199f   : > { %2941 = vadd.xlane.f32.xlu0 %v2940_v46  ;;  %v4549_v46 = vld [vmem:[#allocation5 + $0x88] sm:$0xff]  }
0x19b5   : > { %2946 = vrot.lane.b32.xlu0 %v5333_v53, %s4793_s27  ;;  %s685_s27 = sand.u32 1, %s4771_s22  }
0x19b6   : > { %s686_s23 = scalar_lea.vmem [#allocation8], %s685_s27  ;;  %s3605_s3 = scalar_lea.sflag [#allocation4], %s685_s27 }
0x19b7   : > { %s3620_s18 = sshll.u32 %s686_s23, 4  ;;  %s3621_s18 = int_to_ptr.vmem [resolvable:$true] %s3620_s18 }
0x19b8   : > { %s4709_s29 = scalar_lea.vmem %s3621_s18, 16 }
0x19b9   : > { %p4710_p12 = scmp.ne.s32.totalorder %s3621_s18, %s4709_s29 }
0x19bb   : > { %p4711_p2 = pnand %p4710_p12, %p5670_p1 }
0x19bd   : > { %p4712_p3 = pneg %p4711_p2 }
0x19c9   : > { %v2875_v49 = vpop.f32.mrb[44].mxu0 }
0x19ca   : > { %v2881_v50 = vadd.f32 %v2875_v49, %v5403_v1  ;;  %v4280_v51 = vpop.f32.mrb[45].mxu0  ;;  %v4551_v49 = vld [vmem:[#allocation5 + $0x90] sm:$0xff]  }
0x19cb   : > { %v2878_v54 = vpop.f32.mrb[46].mxu0  ;;  %v4553_v51 = vld [vmem:[#allocation5 + $0x98] sm:$0xff]  }
0x19cc   : > { %v4281_v55 = vpop.f32.mrb[47].mxu0  ;;  %v4554_v54 = vld [vmem:[#allocation5 + $0xe0] sm:$0xff]  }
0x19cd   : > { %v4555_v55 = vld [vmem:[#allocation5 + $0xa0] sm:$0xff]  }
0x1a2c   : > { %v2942_v42 = vpop.xlane.xlu0 %2941 }
0x1a2d   : > { %4610 = vrcp.f32 %v2942_v42  ;;  %v4556_v42 = vld [vmem:[#allocation5 + $0xe8] sm:$0xff]  }
0x1a30   : > { %v2947_v45 = vpop.permute.xlu0 %2946 }
0x1a31   : > { %v2952_v57 = vsel %vm1069_vm2, %v2947_v45, 0  ;;  %v4557_v45 = vld [vmem:[#allocation5 + $0xa8] sm:$0xff]  }
0x1a32   : > { %4289 = vmatpush3.bf16.msra.mxu0 %v2952_v57  ;;  %v4558_v57 = vld [vmem:[#allocation5 + $0xf0] sm:$0xff]  }
0x1a33   : > { %3205 = vmatprep.subr.bf16.mxu0 %v4524_v15 }
0x1a37   : > { %v4611_v53 = vpop.eup %4610 }
0x1a38   : > { %v2944_v60 = vmul.f32 %v4611_v53, %v4609_v44  ;;  %v4548_v44 = vld [vmem:[#allocation5 + $0xc8] sm:$0xff]   ;;  %v4559_v53 = vld [vmem:[#allocation5 + $0xb0] sm:$0xff]  }
0x1a3a   : > { %v2945_v61 = vpack.c.bf16 %v2944_v60, %v2944_v60  ;;  %v4560_v60 = vld [vmem:[#allocation5 + $0xf8] sm:$0xff]  }
0x1a3c   : > { %4291 = vmatmul.mubr.msk.bf16.vlgmr.msra.gmra.mrb[48].mxu0 %vm1053_vm3, %v2945_v61  ;;  %v4561_v61 = vld [vmem:[#allocation5 + $0xb8] sm:$0xff]  }
0x1a3d   : > { %3237 = vmatprep.mubr.bf16.mxu0 %v4789_v25  ;;  %3206 = vmatpush1.bf16.msra.mxu0 %v4522_v14 }
0x1a3e   : > { %3207 = vmatprep.subr.bf16.mxu0 %v4527_v11 }
0x1a41   : > { %3208 = vmatpush1.bf16.msra.mxu0 %v4525_v16 }
0x1b0f   : > { %v2988_v1 = vpop.f32.mrb[48].mxu0 }
0x1b10   : > { %v2994_v63 = vpack.c.bf16 %v2988_v1, %v2988_v1  ;;  %v4292_v2 = vpop.f32.mrb[49].mxu0  ;;  %v3118_v1 = vrot.slane %v3925_v62, %v5091_v47 }
0x1b11   : > { %v2991_v5 = vpop.f32.mrb[50].mxu0 }
0x1b12   : > { %v4293_v58 = vpop.f32.mrb[51].mxu0  ;;  %4299 = vmatmul.mubr.msk.bf16.vlgmr.msra.gmra.mrb[64].mxu1 %vm998_vm1, %v2994_v63  ;;  %v3122_v63 = vrot.slane %v3925_v62, %v5083_v43 }
0x1b13   : > { %4072 = vmatpush3.bf16.msra.mxu1 %v4547_v40  ;;  %v4568_v40 = vld [vmem:[#allocation7 + $0x30] sm:$0xff]  }
0x1b14   : > { %4073 = vmatprep.subr.bf16.mxu1 %v4548_v44  ;;  %v4569_v44 = vld [vmem:[#allocation7 + $0x38] sm:$0xff]  }
0x1b17   : > { %4074 = vmatpush3.bf16.msra.mxu1 %v4549_v46 }
0x1b18   : > { %4075 = vmatprep.subr.bf16.mxu1 %v4550_v48 }
0x1b1b   : > { %4076 = vmatpush3.bf16.msra.mxu1 %v4551_v49 }
0x1be5   : > { %v3048_v6 = vpop.f32.mrb[64].mxu1 }
0x1be6   : > { %v3054_v8 = vadd.f32 %v3048_v6, %v2881_v50  ;;  %v4300_v9 = vpop.f32.mrb[65].mxu1  ;;  %v4552_v50 = vld [vmem:[#allocation5 + $0xd8] sm:$0xff]  }
0x1be7   : > { %v3051_v25 = vpop.f32.mrb[66].mxu1  ;;  %4077 = vmatprep.subr.bf16.mxu1 %v4552_v50 }
0x1be8   : > { %v3063_v10 = vadd.f32 %v3904_v7, %v3054_v8  ;;  %v4301_v12 = vpop.f32.mrb[67].mxu1  ;;  %4078 = vmatpush3.bf16.msra.mxu1 %v4553_v51  ;;  %v3962_v51 = vld [vmem:[%s5613_s15 + $0x1] ss:$0 sm:$0xff] }
0x1be9   : > { %4079 = vmatprep.subr.bf16.mxu1 %v4554_v54 }
0x1bea   : > { %v3064_v13 = vadd.f32 %v3063_v10, %v5316_v31  ;;  %v4530_v31 = vld [vmem:[%s5609_s11 + $0xa4] ss:$8 sps:$4 sm:$0xff]  }
0x1beb   : > { %3209 = vmatprep.subr.bf16.mxu0 %v4530_v31 }
0x1bec   : > { %3069 = vadd.xlane.f32.xlu1 %v3064_v13  ;;  %3210 = vmatpush1.bf16.msra.mxu0 %v4528_v17 }
0x1bed   : > { %3211 = vmatprep.subr.bf16.mxu0 %v4533_v21  ;;  %4080 = vmatpush3.bf16.msra.mxu1 %v4555_v55  ;;  %v3963_v55 = vld [vmem:[%s5614_s16 + $0x1] ss:$0 sm:$0xff] }
0x1bee   : > { %4081 = vmatprep.subr.bf16.mxu1 %v4556_v42 }
0x1bf0   : > { %3212 = vmatpush1.bf16.msra.mxu0 %v4531_v22 }
0x1bf1   : > { %3213 = vmatprep.subr.bf16.mxu0 %v4536_v4  ;;  %4082 = vmatpush3.bf16.msra.mxu1 %v4557_v45 }
0x1bf2   : > { %4083 = vmatprep.subr.bf16.mxu1 %v4558_v57 }
0x1bf4   : > { %3214 = vmatpush1.bf16.msra.mxu0 %v4534_v23 }
0x1bf5   : > { %3215 = vmatprep.subr.bf16.mxu0 %v4539_v24  ;;  %4084 = vmatpush3.bf16.msra.mxu1 %v4559_v53  ;;  %v3943_v24 = vld [vmem:[%s5612_s14 + $0x1] ss:$0 sm:$0xff]  ;;  %v3490_v53 = vld [vmem:[%s5666_s26] sm:$0x1]  ;;  %s4794_s26 = smov [#allocation8]  }
0x1bf6   : > { %4085 = vmatprep.subr.bf16.mxu1 %v4560_v60  ;;  %s4713_s21 = sshll.u32 %s4794_s26, 4  ;;  %s4714_s21 = int_to_ptr.vmem [resolvable:$false] %s4713_s21 }
0x1bf7   : > { %s4715_s1 = scalar_lea.vmem %s4714_s21, 32  ;;  %p4716_p4 = scmp.lt.s32.totalorder %s3621_s18, %s4714_s21 }
0x1bf8   : > { %3216 = vmatpush1.bf16.msra.mxu0 %v4537_v56  ;;  %p4717_p7 = scmp.lt.s32.totalorder %s4715_s1, %s4709_s29 }
0x1bf9   : > { %3217 = vmatprep.subr.bf16.mxu0 %v4542_v26  ;;  %4086 = vmatpush3.bf16.msra.mxu1 %v4561_v61 }
0x1bfa   : > { %p4718_p8 = por %p4717_p7, %p4716_p4 }
0x1bfc   : > { %3218 = vmatpush1.bf16.msra.mxu0 %v4540_v27  ;;  %p4719_p11 = pnand %p4718_p8, %p4712_p3 }
0x1bfd   : > { %3219 = vmatprep.subr.bf16.mxu0 %v4545_v28 }
0x1c00   : > { %3220 = vmatpush1.bf16.msra.mxu0 %v4543_v59 }
0x1c01   : > { %4302 = vmatprep.subr.bf16.mxu0 %v4788_v3 }
0x1c79   : > { %v3070_v18 = vpop.xlane.xlu1 %3069 }
0x1c7a   : > { %v3071_v19 = vmul.f32 0.0078125, %v3070_v18 }
0x1c7c   : > { %v3072_v52 = vsub.f32 %v3064_v13, %v3071_v19 }
0x1c7e   : > { %v3073_v20 = vmul.f32 %v3072_v52, %v3072_v52 }
0x1c80   : > { %3074 = vadd.xlane.f32.xlu1 %v3073_v20 }
0x1d0d   : > { %v3075_v0 = vpop.xlane.xlu1 %3074 }
0x1d0e   : > { %v3076_v39 = vmul.f32 0.0078125, %v3075_v0 }
0x1d10   : > { %v3077_v29 = vadd.f32 1e-12, %v3076_v39  ;;  %v4562_v39 = vld [vmem:[#allocation7] sm:$0xff]  }
0x1d12   : > { %4612 = vrsqrt.f32 %v3077_v29  ;;  %v4563_v29 = vld [vmem:[#allocation7 + $0x8] sm:$0xff]  }
0x1d1c   : > { %v4613_v30 = vpop.eup %4612 }
0x1d1d   : > { %v3079_v33 = vmul.f32 %v4613_v30, %v3072_v52 }
0x1d1f   : > { %v3086_v35 = vmul.f32 %v3907_v32, %v3079_v33 }
0x1d21   : > { %v5510_v36 = vadd.f32 %v3908_v34, %v3086_v35  ;;  %v4564_v35 = vld [vmem:[#allocation7 + $0x10] sm:$0xff]  }
0x1d23   : > { %v3094_v37 = vpack.c.bf16 %v5510_v36, %v5510_v36 }
0x1d25   : > { %3238 = vmatmul.mubr.bf16.vlgmr.msra.gmra.mrb[52].mxu0 %v3094_v37  ;;  %v4565_v37 = vld [vmem:[#allocation7 + $0x18] sm:$0xff]  }
0x1d26   : > { %4318 = vmatprep.mubr.msk.bf16.mxu0 %vm4790_vm0, %v4788_v3  ;;  %4303 = vmatpush3.bf16.msra.mxu0 %v4562_v39 }
0x1d27   : > { %4304 = vmatprep.subr.bf16.mxu0 %v4788_v3 }
0x1d2a   : > { %4305 = vmatpush3.bf16.msra.mxu0 %v4563_v29 }
0x1d2b   : > { %4306 = vmatprep.subr.bf16.mxu0 %v4788_v3 }
0x1d2e   : > { %4307 = vmatpush3.bf16.msra.mxu0 %v4564_v35 }
0x1d2f   : > { %4308 = vmatprep.subr.bf16.mxu0 %v4788_v3 }
0x1d32   : > { %4309 = vmatpush3.bf16.msra.mxu0 %v4565_v37 }
0x1d33   : > { %4310 = vmatprep.subr.bf16.mxu0 %v4788_v3 }
0x1df8   : > { %v3239_v2 = vpop.f32.mrb[52].mxu0 }
0x1df9   : > { %v3240_v5 = vadd.f32 %v3239_v2, %v3118_v1  ;;  %v3241_v58 = vpop.f32.mrb[53].mxu0 }
0x1dfa   : > { %v3242_v6 = vadd.f32 %v3241_v58, %v3122_v63  ;;  %v3243_v7 = vpop.f32.mrb[54].mxu0 }
0x1dfb   : > { %v3248_v8 = vmul.f32 0.044715, %v3240_v5  ;;  %v3244_v9 = vpop.f32.mrb[55].mxu0  ;;  %v3246_v17 = vmul.f32 0.5, %v3240_v5 }
0x1dfc   : > { %v3249_v25 = vmul.f32 0.044715, %v3242_v6  ;;  %v3247_v19 = vmul.f32 0.5, %v3242_v6 }
0x1dfd   : > { %v3250_v10 = vmul.f32 %v3248_v8, %v3240_v5 }
0x1dfe   : > { %v3251_v12 = vmul.f32 %v3249_v25, %v3242_v6 }
0x1dff   : > { %v3252_v13 = vmul.f32 %v3250_v10, %v3240_v5 }
0x1e00   : > { %v3253_v14 = vmul.f32 %v3251_v12, %v3242_v6 }
0x1e01   : > { %v3254_v15 = vadd.f32 %v3252_v13, %v3240_v5  ;;  %v3597_v13 = vld [vmem:[%s701_s28] sm:$0x1] }
0x1e02   : > { %v3255_v11 = vadd.f32 %v3253_v14, %v3242_v6 }
0x1e03   : > { %v3256_v16 = vmul.f32 0.7978846, %v3254_v15 }
0x1e04   : > { %v3257_v31 = vmul.f32 0.7978846, %v3255_v11 }
0x1e05   : > { %4614 = vtanh.f32 %v3256_v16 }
0x1e06   : > { %4616 = vtanh.f32 %v3257_v31 }
0x1e0f   : > { %v4615_v47 = vpop.eup %4614 }
0x1e10   : > { %v4617_v43 = vpop.eup %4616  ;;  %v3260_v18 = vadd.f32 1.0, %v4615_v47 }
0x1e11   : > { %v3261_v52 = vadd.f32 1.0, %v4617_v43 }
0x1e12   : > { %v3262_v20 = vmul.f32 %v3260_v18, %v3246_v17 }
0x1e13   : > { %v3263_v21 = vmul.f32 %v3261_v52, %v3247_v19 }
0x1e14   : > { %v3264_v4 = vpack.c.bf16 %v3262_v20, %v3262_v20 }
0x1e15   : > { %v3265_v22 = vpack.c.bf16 %v3263_v21, %v3263_v21 }
0x1e17   : > { %3435 = vmatprep.mubr.bf16.mxu1 %v3265_v22 }
0x1e18   : > { %3436 = vmatmul.mubr.bf16.vlgmr.msra.gmra.mrb[68].mxu1 %v3264_v4 }
0x1eeb   : > { %v4087_v23 = vpop.f32.mrb[68].mxu1 }
0x1eec   : > { %v4088_v56 = vpop.f32.mrb[69].mxu1 }
0x1eed   : > { %v4089_v26 = vadd.f32 %v4088_v56, %v4087_v23  ;;  %v4090_v27 = vpop.f32.mrb[70].mxu1 }
0x1eee   : > { %v4091_v28 = vpop.f32.mrb[71].mxu1 }
0x1eef   : > { %v3438_v59 = vadd.f32 %v4089_v26, %v3943_v24 }
0x1ef1   : > { %v3443_v0 = vadd.f32 %v3438_v59, %v5510_v36  ;;  %v4566_v36 = vld [vmem:[#allocation7 + $0x20] sm:$0xff]  }
0x1ef2   : > { %4311 = vmatpush3.bf16.msra.mxu0 %v4566_v36 }
0x1ef3   : > { %3448 = vadd.xlane.f32.xlu1 %v3443_v0  ;;  %4312 = vmatprep.subr.bf16.mxu0 %v4788_v3 }
0x1ef6   : > { %4313 = vmatpush3.bf16.msra.mxu0 %v4567_v38 }
0x1ef7   : > { %4314 = vmatprep.subr.bf16.mxu0 %v4788_v3 }
0x1efa   : > { %4315 = vmatpush3.bf16.msra.mxu0 %v4568_v40 }
0x1efb   : > { %4316 = vmatprep.subr.bf16.mxu0 %v4788_v3  ;;  %v3581_v3 = vand.u32 127, %v771_v41 }
0x1efd   : > { %vm3582_vm4 = vcmp.lt.s32.totalorder %v3581_v3, 4 }
0x1efe   : > { %4317 = vmatpush3.bf16.msra.mxu0 %v4569_v44 }
0x1f80   : > { %v3449_v30 = vpop.xlane.xlu1 %3448 }
0x1f81   : > { %v3450_v32 = vmul.f32 0.0078125, %v3449_v30 }
0x1f83   : > { %v3451_v33 = vsub.f32 %v3443_v0, %v3450_v32 }
0x1f85   : > { %v3452_v34 = vmul.f32 %v3451_v33, %v3451_v33 }
0x1f87   : > { %3453 = vadd.xlane.f32.xlu1 %v3452_v34 }
0x2014   : > { %v3454_v46 = vpop.xlane.xlu1 %3453 }
0x2015   : > { %v3455_v48 = vmul.f32 0.0078125, %v3454_v46 }
0x2017   : > { %v3456_v49 = vadd.f32 1e-12, %v3455_v48 }
0x2019   : > { %4618 = vrsqrt.f32 %v3456_v49 }
0x2023   : > { %v4619_v50 = vpop.eup %4618 }
0x2024   : > { %v3458_v54 = vmul.f32 %v4619_v50, %v3451_v33 }
0x2026   : > { %v3465_v42 = vmul.f32 %v3962_v51, %v3458_v54 }
0x2028   : > { %v3472_v45 = vadd.f32 %v3963_v55, %v3465_v42 }
0x202a   : > { %v3473_v57 = vpack.c.bf16 %v3472_v45, %v3472_v45 }
0x202c   : > { %4319 = vmatmul.mubr.bf16.vlgmr.msra.gmra.mrb[56].mxu0 %v3473_v57 }
0x20ff   : > { %v3573_v60 = vpop.f32.mrb[56].mxu0 }
0x2100   : > { %v3574_v61 = vadd.f32 %v3573_v60, %v3490_v53  ;;  %v4320_v62 = vpop.f32.mrb[57].mxu0 }
0x2101   : > { %v3576_v1 = vpop.f32.mrb[58].mxu0 }
0x2102   : > { %3579 = vst [vmem:[%s686_s23] sm:$0x1] %v3574_v61  ;;  %v4321_v63 = vpop.f32.mrb[59].mxu0  ;;  %v3583_v2 = vsel %vm3582_vm4, %v3574_v61, -1e+09 }
0x2103   : > { %v3585_v5 = vsel %vm3584_vm5, %v3583_v2, -inf }
0x2104   : > { %3586 = vmax.xlane.f32.xlu1 %v3585_v5 }
0x2191   : > { %v3587_v41 = vpop.xlane.xlu1 %3586 }
0x2192   : > { %v3588_v58 = vsub.f32 %v3583_v2, %v3587_v41 }
0x2194   : > { %v3589_v6 = vmul.f32 1.442695, %v3588_v58 }
0x2196   : > { %4620 = vpow2.f32 %v3589_v6 }
0x21a0   : > { %v4621_v7 = vpop.eup %4620 }
0x21a1   : > { %v3591_v8 = vsel %vm3584_vm5, %v4621_v7, 0.0 }
0x21a2   : > { %3592 = vadd.xlane.f32.xlu0 %v3591_v8 }
0x222f   : > { %v3593_v9 = vpop.xlane.xlu0 %3592 }
0x2230   : > { %4622 = vlog2.f32 %v3593_v9 }
0x223a   : > { %v4623_v25 = vpop.eup %4622 }
0x223b   : > { %v3595_v10 = vmul.f32 0.6931472, %v4623_v25 }
0x223d   : > { %v3596_v12 = vadd.f32 %v3595_v10, %v3587_v41 }
0x223f   : > { %v3598_v14 = vsub.f32 %v3596_v12, %v3574_v61 }
0x2241   : > { %v3599_v15 = vmul.f32 %v3598_v14, %v3597_v13 }
0x2243   : > { %v3600_v11 = vsel %vm3584_vm5, %v3599_v15, 0.0 }
0x2244   : > { %3601 = vadd.xlane.f32.xlu1 %v3600_v11 }
0x2245   : > { %4722 = shalt.err (!%p4719_p11)
}
0x2246   : > { %s4723_s2 = scalar_lea.hbm %s5556_s24, 16  ;;  %s4727_s13 = scalar_lea.hbm %s5669_s4, 32 }
0x2247   : > { %p4724_p5 = scmp.ne.s32.totalorder %s5556_s24, %s4723_s2  ;;  %p4728_p9 = scmp.lt.u32.totalorder %s5556_s24, %s5669_s4 }
0x2248   : > { %p4729_p10 = scmp.lt.u32.totalorder %s4727_s13, %s4723_s2  ;;  %p4731_p12 = scmp.lt.u32.totalorder %s4723_s2, %s5556_s24 }
0x2249   : > { %p4725_p0 = pnand %p4724_p5, %p5670_p1 }
0x224a   : > { %p4730_p13 = por %p4729_p10, %p4728_p9 }
0x224b   : > { %p4726_p6 = pneg %p4725_p0 }
0x224c   : > { %p4732_p2 = por %p4731_p12, %p4730_p13 }
0x224e   : > { %p4733_p3 = pnand %p4732_p2, %p4726_p6 }
0x2250   : > { %4736 = shalt.err (!%p4733_p3)
}
0x2251   : > { %4334 = dma.vmem_to_hbm [thread:$0]  (%p5670_p1), %s3621_s18, 16, %s5556_s24, %s3605_s3  }
0x2252   : > { %s5671_s29 = sld [smem:[#allocation27_spill]] }
0x2258   : > { %s704_s26 = scalar_lea.vmem %s5671_s29, %s5046_s25 }
0x22d1   : > { %v3602_v16 = vpop.xlane.xlu1 %3601 }
0x22d2   : > { %3603 = vst [vmem:[%s704_s26] sm:$0x1] %v3602_v16 }
0x22d3 PF: > { %s5672_s21 = sld [smem:[#allocation14_spill]]  ;;  %s5673_s1 = sld [smem:[#allocation12_spill]] }
0x22d4   : > { %s5674_s27 = sld [smem:[#allocation18_spill]] }
0x22d9   : > { %p4356_p4 = scmp.ge.s32.totalorder %s5672_s21, 2  ;;  %s3635_s2 = sand.u32 1, %s5673_s1  }
0x22da   : > { %p5675_p7 = scmp.ne.s32.totalorder %s5674_s27, 0  ;;  %s3636_s23 = scalar_lea.sflag [#allocation4], %s3635_s2 }
0x22dc   : > { %p4347_p8 = pnand %p4356_p4, %p5675_p7 }
0x22de   : > { %4762 = dma.done.wait (!%p4347_p8), %s3636_s23, 16  }
0x22df   : > { %4764 = vsyncadd (!%p4347_p8), %s3636_s23, 4294967280  ;;  %s5676_s24 = sld [smem:[#allocation15_spill]]  ;;  %s5677_s19 = sld [smem:[#allocation13_spill]] }
0x22e0   : > { %s5678_s23 = sld [smem:[#allocation16_spill]]  ;;  %s5679_s1 = smov %s4771_s22 }
0x22e5   : > { %p33_p1 = scmp.ge.s32.totalorder %s5676_s24, 4   ;;  %s5680_s22 = smov %s5677_s19 }
0x22e7   :  { %35 = sbr.rel (!%p33_p1) target bundleno = 15 (0xf), region = 174 }
0x22ee   :  { %3646 = vsyncpa [#allocation3], 1 }
0x22ef   :  { %3648 = vsyncpa [#allocation3 + $0x1], 1 }
0x22f0   :  { %3649 = vsyncpa [#allocation6], 1 }
0x22f1   :  { %3650 = vsyncpa [#allocation4], 1 }
0x22f2   :  { %3652 = vsyncpa [#allocation4 + $0x1], 1 }

</bundles_post_ra>
